<compile_context>
chip_gen: v7x
topology: tpu7x:2x2x1
jax: 0.10.0
libtpu: 0.0.40
codegen_flags: <defaults>
</compile_context>

<pallas_src>
import functools

import jax
import jax.numpy as jnp
from jax.experimental import pallas as pl
from jax.experimental.pallas import tpu as pltpu


# --------------------------------------------------------------------------
# Pallas kernel: one batch tile (Bt batch elements) per grid step.
# --------------------------------------------------------------------------
def graphormer_kernel(
    x_ref,        # (Bt, N, F)     f32
    bias_ref,     # (Bt, H, N, N)  bf16  additive bias with mask already fused
    wq_ref, bq_ref,
    wk_ref, bk_ref,
    wv_ref, bv_ref,
    wo_ref, bo_ref,
    w1_ref, b1_ref,
    w2_ref, b2_ref,
    g1_ref, be1_ref,
    g2_ref, be2_ref,
    o_ref,        # (Bt, N, F)     f32
    slab_ref,     # (Bt, N, F)     f32 VMEM scratch: contiguous per-head outputs
    *, num_heads, head_dim,
):
    Bt, N, F = x_ref.shape

    x = x_ref[...]                                        # (Bt, N, F) f32
    x_rows = x.reshape(Bt * N, F).astype(jnp.bfloat16)    # flattened row slab

    # --- QKV projections (bf16 MXU inputs, f32 accumulation). ---
    # 1/sqrt(head_dim) is already folded into wq / bq by the wrapper.
    q = jnp.dot(x_rows, wq_ref[...], preferred_element_type=jnp.float32) + bq_ref[...]
    k = jnp.dot(x_rows, wk_ref[...], preferred_element_type=jnp.float32) + bk_ref[...]
    v = jnp.dot(x_rows, wv_ref[...], preferred_element_type=jnp.float32) + bv_ref[...]

    q3 = q.reshape(Bt, N, F).astype(jnp.bfloat16)
    k3 = k.reshape(Bt, N, F).astype(jnp.bfloat16)
    v3 = v.reshape(Bt, N, F).astype(jnp.bfloat16)

    # dot_general dimension numbers (batched over Bt; no materialized K transpose)
    dn_qk = (((2,), (2,)), ((0,), (0,)))   # (Bt,N,hd) x (Bt,N,hd) -> (Bt,N,N)
    dn_pv = (((2,), (1,)), ((0,), (0,)))   # (Bt,N,N)  x (Bt,N,hd) -> (Bt,N,hd)

    # Per-head attention.  Outputs are written into a contiguous (Bt, N, F)
    # VMEM slab so the output projection below is a single full-K matmul.
    # TODO(synk): replace the unrolled head loop + lane slices with one
    # head-batched dot_general over a (Bt*H, N, hd) layout (and add a head grid
    # axis for realistic H*N) once the required (b,n,h,d)->(b,h,n,d) relayout /
    # multi-batch-dim dot_general is guaranteed to lower in Mosaic.
    for h in range(num_heads):
        lo = h * head_dim
        qh = q3[:, :, lo:lo + head_dim]
        kh = k3[:, :, lo:lo + head_dim]
        vh = v3[:, :, lo:lo + head_dim]

        s = jax.lax.dot_general(qh, kh, dn_qk, preferred_element_type=jnp.float32)
        s = s + bias_ref[:, h].astype(jnp.float32)        # bf16 stream, f32 math

        # numerically-stable softmax over the key axis (f32)
        s = s - jnp.max(s, axis=-1, keepdims=True)
        p = jnp.exp(s)
        p = p * pl.reciprocal(jnp.sum(p, axis=-1, keepdims=True), approx=True)

        slab_ref[:, :, lo:lo + head_dim] = jax.lax.dot_general(
            p.astype(jnp.bfloat16), vh, dn_pv, preferred_element_type=jnp.float32)

    # --- single output projection over the full head slab (K = F) ---
    attn_rows = slab_ref[...].reshape(Bt * N, F).astype(jnp.bfloat16)
    attn = (jnp.dot(attn_rows, wo_ref[...], preferred_element_type=jnp.float32)
            + bo_ref[...]).reshape(Bt, N, F)

    # --- residual + LayerNorm 1 (f32) ---
    y = x + attn
    mu = jnp.mean(y, axis=-1, keepdims=True)
    var = jnp.mean((y - mu) ** 2, axis=-1, keepdims=True)
    y = (y - mu) * jax.lax.rsqrt(var + 1e-5) * g1_ref[...] + be1_ref[...]

    # --- FFN (Linear -> ReLU -> Linear) on the flattened slab, no residual ---
    y_rows = y.reshape(Bt * N, F).astype(jnp.bfloat16)
    h1 = jnp.dot(y_rows, w1_ref[...], preferred_element_type=jnp.float32) + b1_ref[...]
    h1 = jnp.maximum(h1, 0.0)
    f = (jnp.dot(h1.astype(jnp.bfloat16), w2_ref[...],
                 preferred_element_type=jnp.float32) + b2_ref[...]).reshape(Bt, N, F)

    # --- LayerNorm 2 ---
    mu2 = jnp.mean(f, axis=-1, keepdims=True)
    var2 = jnp.mean((f - mu2) ** 2, axis=-1, keepdims=True)
    o_ref[...] = (f - mu2) * jax.lax.rsqrt(var2 + 1e-5) * g2_ref[...] + be2_ref[...]


# --------------------------------------------------------------------------
# Wrapper
# --------------------------------------------------------------------------
def _vmem_capacity_bytes():
    try:
        return int(pltpu.get_tpu_info().vmem_capacity_bytes)
    except Exception:
        return 64 * 2 ** 20       # conservative fallback (v7x-sized VMEM)


def graphormer_layer(x, attn_bias, attn_mask, params, *, num_heads, block_b=None):
    """x: (B,N,F) f32; attn_bias: (B,N,N,H) f32; attn_mask: (B,N,N) bool."""
    B, N, F = x.shape
    H = num_heads
    hd = F // H
    Hidden = params["w1"].shape[1]
    scaling = hd ** (-0.5)

    # Reproduce the in-place mutation in BiasedMHA.forward (first key column is
    # always unmasked), fuse the additive mask into the bias, and downcast the
    # fused stream to bf16: the (B, H, N, N) bias dominates HBM traffic
    # (H*N^2 per token vs N*F for x) and its per-step VMEM block.  -1e30 is
    # representable in bf16 and still underflows to 0 after softmax.
    attn_mask = attn_mask.at[:, :, 0].set(False)
    mask_add = jnp.where(attn_mask, -1e30, 0.0).astype(jnp.float32)       # (B,N,N)
    bias_bh = (jnp.transpose(attn_bias, (0, 3, 1, 2))
               + mask_add[:, None, :, :]).astype(jnp.bfloat16)            # (B,H,N,N)

    # bf16 weights at the MXU inputs (halves weight DMA); 1/sqrt(hd) folded
    # into the q projection for free.  Biases / LN params stay f32.
    wq = (params["wq"] * scaling).astype(jnp.bfloat16)
    bq = (params["bq"] * scaling).astype(jnp.float32)
    wk = params["wk"].astype(jnp.bfloat16)
    wv = params["wv"].astype(jnp.bfloat16)
    wo = params["wo"].astype(jnp.bfloat16)
    w1 = params["w1"].astype(jnp.bfloat16)
    w2 = params["w2"].astype(jnp.bfloat16)

    # ---- per-generation VMEM budget (v5e/v6e: 128 MiB, v7x: 64 MiB) ----
    vmem_budget = int(0.85 * _vmem_capacity_bytes())

    def footprint(bt):
        blocks = 2 * (2 * bt * N * F * 4            # x + out blocks, f32, double-buffered
                      + bt * H * N * N * 2)         # fused bias block, bf16, double-buffered
        weights = 2 * ((4 * F * F + 2 * F * Hidden) * 2   # bf16 weights (x2 buffers)
                       + (9 * F + Hidden) * 4)            # f32 biases / LN params
        live = (bt * N * (6 * F + 2 * Hidden) * 4         # q/k/v, slab, FFN activations
                + 4 * bt * N * N * 4)                     # scores / probabilities
        return blocks + weights + live

    if block_b is None:
        # Largest batch tile that divides B, keeps the MXU M-dim (block_b*N
        # rows) well fed and fits the per-generation VMEM budget.
        block_b = 1
        for bb in range(1, B + 1):
            if B % bb == 0 and bb * N <= 1024 and footprint(bb) <= vmem_budget:
                block_b = bb
    assert B % block_b == 0, "block_b must divide batch size"
    Bt = block_b

    vmem_limit = min(max(int(1.3 * footprint(Bt)), 16 * 2 ** 20), vmem_budget)

    full = lambda shape: pl.BlockSpec(shape, lambda b: (0,) * len(shape))
    # TODO(synk): mark the 16 invariant weight/bias/LN blocks with
    # pipeline_mode=pl.Buffered(1) (constant index_map -> never re-DMA'd) once
    # single-buffered pipelining is guaranteed in the auto-pipeliner; halves
    # the invariant-weight VMEM reservation (matters most on v7x's 64 MiB).

    kernel = functools.partial(graphormer_kernel, num_heads=H, head_dim=hd)

    # TODO(synk): for very large H*N (realistic Graphormer graphs) add a head
    # grid axis ("arbitrary") so the bias block per step is (Bt, 1, N, N), with
    # residual+LN1+FFN+LN2 run under pl.when on the last head.
    return pl.pallas_call(
        kernel,
        out_shape=jax.ShapeDtypeStruct((B, N, F), jnp.float32),
        grid_spec=pltpu.PrefetchScalarGridSpec(
            num_scalar_prefetch=0,
            grid=(B // Bt,),
            in_specs=[
                pl.BlockSpec((Bt, N, F), lambda b: (b, 0, 0)),         # x
                pl.BlockSpec((Bt, H, N, N), lambda b: (b, 0, 0, 0)),   # bias(+mask), bf16
                full((F, F)), full((1, F)),                            # Wq, bq (scaled)
                full((F, F)), full((1, F)),                            # Wk, bk
                full((F, F)), full((1, F)),                            # Wv, bv
                full((F, F)), full((1, F)),                            # Wo, bo
                full((F, Hidden)), full((1, Hidden)),                  # W1, b1
                full((Hidden, F)), full((1, F)),                       # W2, b2
                full((1, F)), full((1, F)),                            # ln1 g/b
                full((1, F)), full((1, F)),                            # ln2 g/b
            ],
            out_specs=pl.BlockSpec((Bt, N, F), lambda b: (b, 0, 0)),
            scratch_shapes=[pltpu.VMEM((Bt, N, F), jnp.float32)],      # head-output slab
        ),
        compiler_params=pltpu.CompilerParams(
            dimension_semantics=("parallel",),
            vmem_limit_bytes=vmem_limit),
    )(
        x, bias_bh,
        wq, bq, wk, params["bk"], wv, params["bv"], wo, params["bo"],
        w1, params["b1"], w2, params["b2"],
        params["g1"], params["be1"], params["g2"], params["be2"],
    )


# --------------------------------------------------------------------------
# Pure-JAX f32 reference (same math as the PyTorch module, eval mode).
# --------------------------------------------------------------------------
def reference(x, attn_bias, attn_mask, p, *, num_heads):
    B, N, F = x.shape
    H = num_heads
    hd = F // H
    scaling = hd ** (-0.5)

    attn_mask = attn_mask.at[:, :, 0].set(False)
    q = (x @ p["wq"] + p["bq"]) * scaling
    k = x @ p["wk"] + p["bk"]
    v = x @ p["wv"] + p["bv"]
    q = q.reshape(B, N, H, hd).transpose(0, 2, 1, 3)
    k = k.reshape(B, N, H, hd).transpose(0, 2, 1, 3)
    v = v.reshape(B, N, H, hd).transpose(0, 2, 1, 3)
    s = jnp.einsum("bhqd,bhkd->bhqk", q, k)
    s = s + jnp.transpose(attn_bias, (0, 3, 1, 2))
    s = jnp.where(attn_mask[:, None, :, :], -jnp.inf, s)
    w = jax.nn.softmax(s, axis=-1)
    a = jnp.einsum("bhqk,bhkd->bhqd", w, v)
    a = a.transpose(0, 2, 1, 3).reshape(B, N, F)
    a = a @ p["wo"] + p["bo"]

    y = x + a

    def ln(z, g, b):
        mu = jnp.mean(z, axis=-1, keepdims=True)
        var = jnp.mean((z - mu) ** 2, axis=-1, keepdims=True)
        return (z - mu) / jnp.sqrt(var + 1e-5) * g + b

    y = ln(y, p["g1"], p["be1"])
    f = jnp.maximum(y @ p["w1"] + p["b1"], 0.0) @ p["w2"] + p["b2"]
    return ln(f, p["g2"], p["be2"])


# --------------------------------------------------------------------------
def xavier_uniform(key, shape, gain=1.0):
    fan_in, fan_out = shape
    bound = gain * (6.0 / (fan_in + fan_out)) ** 0.5
    return jax.random.uniform(key, shape, jnp.float32, -bound, bound)


if __name__ == "__main__":
    # Small smoke-test shapes; F, Hidden multiples of 128, N a multiple of 8.
    # TODO(synk): production Graphormer shapes should keep N a multiple of 128
    # for lane-dense (N, N) score/bias tiles; N=16 here only for a small test.
    B, N, F, H, Hidden = 4, 16, 128, 4, 256

    key = jax.random.PRNGKey(0)
    keys = jax.random.split(key, 16)

    g = 2.0 ** (-0.5)
    params = {
        "wq": xavier_uniform(keys[0], (F, F), g), "bq": jax.random.normal(keys[1], (1, F)) * 0.02,
        "wk": xavier_uniform(keys[2], (F, F), g), "bk": jax.random.normal(keys[3], (1, F)) * 0.02,
        "wv": xavier_uniform(keys[4], (F, F), g), "bv": jax.random.normal(keys[5], (1, F)) * 0.02,
        "wo": xavier_uniform(keys[6], (F, F)),     "bo": jnp.zeros((1, F), jnp.float32),
        "w1": xavier_uniform(keys[7], (F, Hidden)), "b1": jax.random.normal(keys[8], (1, Hidden)) * 0.02,
        "w2": xavier_uniform(keys[9], (Hidden, F)), "b2": jax.random.normal(keys[10], (1, F)) * 0.02,
        "g1": jnp.ones((1, F), jnp.float32), "be1": jnp.zeros((1, F), jnp.float32),
        "g2": jnp.ones((1, F), jnp.float32), "be2": jnp.zeros((1, F), jnp.float32),
    }

    x = jax.random.normal(keys[11], (B, N, F), jnp.float32)
    attn_bias = jax.random.normal(keys[12], (B, N, N, H), jnp.float32) * 0.1
    attn_mask = jax.random.bernoulli(keys[13], 0.2, (B, N, N))   # True = masked

    ref = reference(x, attn_bias, attn_mask, params, num_heads=H)

    # Auto block_b: largest VMEM-feasible batch tile for this generation.
    fn = jax.jit(functools.partial(graphormer_layer, num_heads=H))
    out = jax.block_until_ready(fn(x, attn_bias, attn_mask, params))
    assert out.shape == (B, N, F)
    # bf16 MXU inputs / bf16 bias stream (f32 accumulation & softmax) vs the
    # pure-f32 reference -> loosened tolerance (precision-only difference).
    assert jnp.allclose(out, ref, atol=5e-2, rtol=5e-2), "mismatch vs reference (auto block_b)"

    # Explicit block_b=2 exercises the multi-step grid / index maps.
    fn2 = jax.jit(functools.partial(graphormer_layer, num_heads=H, block_b=2))
    out2 = jax.block_until_ready(fn2(x, attn_bias, attn_mask, params))
    assert jnp.allclose(out2, ref, atol=5e-2, rtol=5e-2), "mismatch vs reference (block_b=2)"

    # TODO(synk): dropout layers treated as identity (eval-mode semantics);
    # 'mul' attn_bias_type not exercised (module default is 'add').
    print("KERNEL_OK")
</pallas_src>

<mosaic_0001>
module attributes {stable_mosaic.version = 11 : i64} {
  func.func @graphormer_kernel(%arg0: i32, %arg1: memref<4x16x128xf32, #tpu.memory_space<vmem>>, %arg2: memref<4x4x16x16xbf16, #tpu.memory_space<vmem>>, %arg3: memref<128x128xbf16, #tpu.memory_space<vmem>>, %arg4: memref<1x128xf32, #tpu.memory_space<vmem>>, %arg5: memref<128x128xbf16, #tpu.memory_space<vmem>>, %arg6: memref<1x128xf32, #tpu.memory_space<vmem>>, %arg7: memref<128x128xbf16, #tpu.memory_space<vmem>>, %arg8: memref<1x128xf32, #tpu.memory_space<vmem>>, %arg9: memref<128x128xbf16, #tpu.memory_space<vmem>>, %arg10: memref<1x128xf32, #tpu.memory_space<vmem>>, %arg11: memref<128x256xbf16, #tpu.memory_space<vmem>>, %arg12: memref<1x256xf32, #tpu.memory_space<vmem>>, %arg13: memref<256x128xbf16, #tpu.memory_space<vmem>>, %arg14: memref<1x128xf32, #tpu.memory_space<vmem>>, %arg15: memref<1x128xf32, #tpu.memory_space<vmem>>, %arg16: memref<1x128xf32, #tpu.memory_space<vmem>>, %arg17: memref<1x128xf32, #tpu.memory_space<vmem>>, %arg18: memref<1x128xf32, #tpu.memory_space<vmem>>, %arg19: memref<4x16x128xf32, #tpu.memory_space<vmem>>, %arg20: memref<4x16x128xf32, #tpu.memory_space<vmem>>) attributes {dimension_semantics = [#tpu.dimension_semantics<parallel>], iteration_bounds = array<i64: 1>, scalar_prefetch = 0 : i64, scratch_operands = 1 : i64, tpu.core_type = #tpu.core_type<tc>, window_params = [{transform_indices = @transform_0, window_bounds = array<i64: 4, 16, 128>}, {transform_indices = @transform_1, window_bounds = array<i64: 4, 4, 16, 16>}, {pipeline_mode = #tpu.pipeline_mode<synchronous>, transform_indices = @transform_2, window_bounds = array<i64: 128, 128>}, {pipeline_mode = #tpu.pipeline_mode<synchronous>, transform_indices = @transform_3, window_bounds = array<i64: 1, 128>}, {pipeline_mode = #tpu.pipeline_mode<synchronous>, transform_indices = @transform_4, window_bounds = array<i64: 128, 128>}, {pipeline_mode = #tpu.pipeline_mode<synchronous>, transform_indices = @transform_5, window_bounds = array<i64: 1, 128>}, {pipeline_mode = #tpu.pipeline_mode<synchronous>, transform_indices = @transform_6, window_bounds = array<i64: 128, 128>}, {pipeline_mode = #tpu.pipeline_mode<synchronous>, transform_indices = @transform_7, window_bounds = array<i64: 1, 128>}, {pipeline_mode = #tpu.pipeline_mode<synchronous>, transform_indices = @transform_8, window_bounds = array<i64: 128, 128>}, {pipeline_mode = #tpu.pipeline_mode<synchronous>, transform_indices = @transform_9, window_bounds = array<i64: 1, 128>}, {pipeline_mode = #tpu.pipeline_mode<synchronous>, transform_indices = @transform_10, window_bounds = array<i64: 128, 256>}, {pipeline_mode = #tpu.pipeline_mode<synchronous>, transform_indices = @transform_11, window_bounds = array<i64: 1, 256>}, {pipeline_mode = #tpu.pipeline_mode<synchronous>, transform_indices = @transform_12, window_bounds = array<i64: 256, 128>}, {pipeline_mode = #tpu.pipeline_mode<synchronous>, transform_indices = @transform_13, window_bounds = array<i64: 1, 128>}, {pipeline_mode = #tpu.pipeline_mode<synchronous>, transform_indices = @transform_14, window_bounds = array<i64: 1, 128>}, {pipeline_mode = #tpu.pipeline_mode<synchronous>, transform_indices = @transform_15, window_bounds = array<i64: 1, 128>}, {pipeline_mode = #tpu.pipeline_mode<synchronous>, transform_indices = @transform_16, window_bounds = array<i64: 1, 128>}, {pipeline_mode = #tpu.pipeline_mode<synchronous>, transform_indices = @transform_17, window_bounds = array<i64: 1, 128>}, {transform_indices = @transform_18, window_bounds = array<i64: 4, 16, 128>}]} {
    %c0 = arith.constant 0 : index
    %c0_0 = arith.constant 0 : index
    %c0_1 = arith.constant 0 : index
    %0 = vector.load %arg1[%c0, %c0_0, %c0_1] : memref<4x16x128xf32, #tpu.memory_space<vmem>>, vector<4x16x128xf32>
    %1 = vector.shape_cast %0 : vector<4x16x128xf32> to vector<64x128xf32>
    %2 = arith.truncf %1 : vector<64x128xf32> to vector<64x128xbf16>
    %c0_2 = arith.constant 0 : index
    %c0_3 = arith.constant 0 : index
    %3 = vector.load %arg3[%c0_2, %c0_3] : memref<128x128xbf16, #tpu.memory_space<vmem>>, vector<128x128xbf16>
    %cst = arith.constant dense<0.000000e+00> : vector<64x128xf32>
    %4 = tpu.matmul %2, %3, %cst {dimension_numbers = #tpu.dot_dimension_numbers<[1], [0], [0], [1], [0, 0, 1, 1], [], []>} : vector<64x128xbf16>, vector<128x128xbf16>, vector<64x128xf32> -> vector<64x128xf32>
    %c0_4 = arith.constant 0 : index
    %c0_5 = arith.constant 0 : index
    %5 = vector.load %arg4[%c0_4, %c0_5] : memref<1x128xf32, #tpu.memory_space<vmem>>, vector<1x128xf32>
    %6 = vector.broadcast %5 : vector<1x128xf32> to vector<64x128xf32>
    %7 = arith.addf %4, %6 : vector<64x128xf32>
    %c0_6 = arith.constant 0 : index
    %c0_7 = arith.constant 0 : index
    %8 = vector.load %arg5[%c0_6, %c0_7] : memref<128x128xbf16, #tpu.memory_space<vmem>>, vector<128x128xbf16>
    %cst_8 = arith.constant dense<0.000000e+00> : vector<64x128xf32>
    %9 = tpu.matmul %2, %8, %cst_8 {dimension_numbers = #tpu.dot_dimension_numbers<[1], [0], [0], [1], [0, 0, 1, 1], [], []>} : vector<64x128xbf16>, vector<128x128xbf16>, vector<64x128xf32> -> vector<64x128xf32>
    %c0_9 = arith.constant 0 : index
    %c0_10 = arith.constant 0 : index
    %10 = vector.load %arg6[%c0_9, %c0_10] : memref<1x128xf32, #tpu.memory_space<vmem>>, vector<1x128xf32>
    %11 = vector.broadcast %10 : vector<1x128xf32> to vector<64x128xf32>
    %12 = arith.addf %9, %11 : vector<64x128xf32>
    %c0_11 = arith.constant 0 : index
    %c0_12 = arith.constant 0 : index
    %13 = vector.load %arg7[%c0_11, %c0_12] : memref<128x128xbf16, #tpu.memory_space<vmem>>, vector<128x128xbf16>
    %cst_13 = arith.constant dense<0.000000e+00> : vector<64x128xf32>
    %14 = tpu.matmul %2, %13, %cst_13 {dimension_numbers = #tpu.dot_dimension_numbers<[1], [0], [0], [1], [0, 0, 1, 1], [], []>} : vector<64x128xbf16>, vector<128x128xbf16>, vector<64x128xf32> -> vector<64x128xf32>
    %c0_14 = arith.constant 0 : index
    %c0_15 = arith.constant 0 : index
    %15 = vector.load %arg8[%c0_14, %c0_15] : memref<1x128xf32, #tpu.memory_space<vmem>>, vector<1x128xf32>
    %16 = vector.broadcast %15 : vector<1x128xf32> to vector<64x128xf32>
    %17 = arith.addf %14, %16 : vector<64x128xf32>
    %18 = vector.shape_cast %7 : vector<64x128xf32> to vector<4x16x128xf32>
    %19 = arith.truncf %18 : vector<4x16x128xf32> to vector<4x16x128xbf16>
    %20 = vector.shape_cast %12 : vector<64x128xf32> to vector<4x16x128xf32>
    %21 = arith.truncf %20 : vector<4x16x128xf32> to vector<4x16x128xbf16>
    %22 = vector.shape_cast %17 : vector<64x128xf32> to vector<4x16x128xf32>
    %23 = arith.truncf %22 : vector<4x16x128xf32> to vector<4x16x128xbf16>
    %24 = vector.extract_strided_slice %19 {offsets = [0, 0, 0], sizes = [4, 16, 32], strides = [1, 1, 1]} : vector<4x16x128xbf16> to vector<4x16x32xbf16>
    %25 = vector.extract_strided_slice %21 {offsets = [0, 0, 0], sizes = [4, 16, 32], strides = [1, 1, 1]} : vector<4x16x128xbf16> to vector<4x16x32xbf16>
    %26 = vector.extract_strided_slice %23 {offsets = [0, 0, 0], sizes = [4, 16, 32], strides = [1, 1, 1]} : vector<4x16x128xbf16> to vector<4x16x32xbf16>
    %cst_16 = arith.constant dense<0.000000e+00> : vector<4x16x16xf32>
    %27 = tpu.matmul %24, %25, %cst_16 {dimension_numbers = #tpu.dot_dimension_numbers<[2], [2], [1], [1], [0, 0, 0, 1, 1, 1], [0], [0]>} : vector<4x16x32xbf16>, vector<4x16x32xbf16>, vector<4x16x16xf32> -> vector<4x16x16xf32>
    %c0_17 = arith.constant 0 : index
    %c0_18 = arith.constant 0 : index
    %c0_19 = arith.constant 0 : index
    %c0_20 = arith.constant 0 : index
    %28 = vector.load %arg2[%c0_17, %c0_18, %c0_19, %c0_20] : memref<4x4x16x16xbf16, #tpu.memory_space<vmem>>, vector<4x1x16x16xbf16>
    %29 = vector.shape_cast %28 : vector<4x1x16x16xbf16> to vector<4x16x16xbf16>
    %30 = arith.extf %29 : vector<4x16x16xbf16> to vector<4x16x16xf32>
    %31 = arith.addf %27, %30 : vector<4x16x16xf32>
    %cst_21 = arith.constant dense<0xFF800000> : vector<4x16xf32>
    %32 = vector.multi_reduction <maximumf>, %31, %cst_21 [2] : vector<4x16x16xf32> to vector<4x16xf32>
    %33 = vector.shape_cast %32 : vector<4x16xf32> to vector<4x16x1xf32>
    %34 = vector.broadcast %33 : vector<4x16x1xf32> to vector<4x16x16xf32>
    %35 = arith.subf %31, %34 : vector<4x16x16xf32>
    %36 = math.exp %35 : vector<4x16x16xf32>
    %cst_22 = arith.constant dense<0.000000e+00> : vector<4x16xf32>
    %37 = vector.multi_reduction <add>, %36, %cst_22 [2] : vector<4x16x16xf32> to vector<4x16xf32>
    %38 = vector.shape_cast %37 : vector<4x16xf32> to vector<4x16x1xf32>
    %39 = tpu.reciprocal %38 {approx = true} : vector<4x16x1xf32> -> vector<4x16x1xf32>
    %40 = vector.broadcast %39 : vector<4x16x1xf32> to vector<4x16x16xf32>
    %41 = arith.mulf %36, %40 : vector<4x16x16xf32>
    %42 = arith.truncf %41 : vector<4x16x16xf32> to vector<4x16x16xbf16>
    %cst_23 = arith.constant dense<0.000000e+00> : vector<4x16x32xf32>
    %43 = tpu.matmul %42, %26, %cst_23 {dimension_numbers = #tpu.dot_dimension_numbers<[2], [1], [1], [2], [0, 0, 0, 1, 1, 2], [0], [0]>} : vector<4x16x16xbf16>, vector<4x16x32xbf16>, vector<4x16x32xf32> -> vector<4x16x32xf32>
    %c0_24 = arith.constant 0 : index
    %c0_25 = arith.constant 0 : index
    %c0_26 = arith.constant 0 : index
    %44 = vector.load %arg20[%c0_24, %c0_25, %c0_26] : memref<4x16x128xf32, #tpu.memory_space<vmem>>, vector<4x16x32xf32>
    tpu.vector_store %arg20[%c0_24, %c0_25, %c0_26], %43 {strides = array<i32>} : memref<4x16x128xf32, #tpu.memory_space<vmem>>, vector<4x16x32xf32>,
    %45 = vector.extract_strided_slice %19 {offsets = [0, 0, 32], sizes = [4, 16, 32], strides = [1, 1, 1]} : vector<4x16x128xbf16> to vector<4x16x32xbf16>
    %46 = vector.extract_strided_slice %21 {offsets = [0, 0, 32], sizes = [4, 16, 32], strides = [1, 1, 1]} : vector<4x16x128xbf16> to vector<4x16x32xbf16>
    %47 = vector.extract_strided_slice %23 {offsets = [0, 0, 32], sizes = [4, 16, 32], strides = [1, 1, 1]} : vector<4x16x128xbf16> to vector<4x16x32xbf16>
    %cst_27 = arith.constant dense<0.000000e+00> : vector<4x16x16xf32>
    %48 = tpu.matmul %45, %46, %cst_27 {dimension_numbers = #tpu.dot_dimension_numbers<[2], [2], [1], [1], [0, 0, 0, 1, 1, 1], [0], [0]>} : vector<4x16x32xbf16>, vector<4x16x32xbf16>, vector<4x16x16xf32> -> vector<4x16x16xf32>
    %c0_28 = arith.constant 0 : index
    %c1 = arith.constant 1 : index
    %c0_29 = arith.constant 0 : index
    %c0_30 = arith.constant 0 : index
    %49 = vector.load %arg2[%c0_28, %c1, %c0_29, %c0_30] : memref<4x4x16x16xbf16, #tpu.memory_space<vmem>>, vector<4x1x16x16xbf16>
    %50 = vector.shape_cast %49 : vector<4x1x16x16xbf16> to vector<4x16x16xbf16>
    %51 = arith.extf %50 : vector<4x16x16xbf16> to vector<4x16x16xf32>
    %52 = arith.addf %48, %51 : vector<4x16x16xf32>
    %cst_31 = arith.constant dense<0xFF800000> : vector<4x16xf32>
    %53 = vector.multi_reduction <maximumf>, %52, %cst_31 [2] : vector<4x16x16xf32> to vector<4x16xf32>
    %54 = vector.shape_cast %53 : vector<4x16xf32> to vector<4x16x1xf32>
    %55 = vector.broadcast %54 : vector<4x16x1xf32> to vector<4x16x16xf32>
    %56 = arith.subf %52, %55 : vector<4x16x16xf32>
    %57 = math.exp %56 : vector<4x16x16xf32>
    %cst_32 = arith.constant dense<0.000000e+00> : vector<4x16xf32>
    %58 = vector.multi_reduction <add>, %57, %cst_32 [2] : vector<4x16x16xf32> to vector<4x16xf32>
    %59 = vector.shape_cast %58 : vector<4x16xf32> to vector<4x16x1xf32>
    %60 = tpu.reciprocal %59 {approx = true} : vector<4x16x1xf32> -> vector<4x16x1xf32>
    %61 = vector.broadcast %60 : vector<4x16x1xf32> to vector<4x16x16xf32>
    %62 = arith.mulf %57, %61 : vector<4x16x16xf32>
    %63 = arith.truncf %62 : vector<4x16x16xf32> to vector<4x16x16xbf16>
    %cst_33 = arith.constant dense<0.000000e+00> : vector<4x16x32xf32>
    %64 = tpu.matmul %63, %47, %cst_33 {dimension_numbers = #tpu.dot_dimension_numbers<[2], [1], [1], [2], [0, 0, 0, 1, 1, 2], [0], [0]>} : vector<4x16x16xbf16>, vector<4x16x32xbf16>, vector<4x16x32xf32> -> vector<4x16x32xf32>
    %c0_34 = arith.constant 0 : index
    %c0_35 = arith.constant 0 : index
    %c32 = arith.constant 32 : index
    %65 = vector.load %arg20[%c0_34, %c0_35, %c32] : memref<4x16x128xf32, #tpu.memory_space<vmem>>, vector<4x16x32xf32>
    tpu.vector_store %arg20[%c0_34, %c0_35, %c32], %64 {strides = array<i32>} : memref<4x16x128xf32, #tpu.memory_space<vmem>>, vector<4x16x32xf32>,
    %66 = vector.extract_strided_slice %19 {offsets = [0, 0, 64], sizes = [4, 16, 32], strides = [1, 1, 1]} : vector<4x16x128xbf16> to vector<4x16x32xbf16>
    %67 = vector.extract_strided_slice %21 {offsets = [0, 0, 64], sizes = [4, 16, 32], strides = [1, 1, 1]} : vector<4x16x128xbf16> to vector<4x16x32xbf16>
    %68 = vector.extract_strided_slice %23 {offsets = [0, 0, 64], sizes = [4, 16, 32], strides = [1, 1, 1]} : vector<4x16x128xbf16> to vector<4x16x32xbf16>
    %cst_36 = arith.constant dense<0.000000e+00> : vector<4x16x16xf32>
    %69 = tpu.matmul %66, %67, %cst_36 {dimension_numbers = #tpu.dot_dimension_numbers<[2], [2], [1], [1], [0, 0, 0, 1, 1, 1], [0], [0]>} : vector<4x16x32xbf16>, vector<4x16x32xbf16>, vector<4x16x16xf32> -> vector<4x16x16xf32>
    %c0_37 = arith.constant 0 : index
    %c2 = arith.constant 2 : index
    %c0_38 = arith.constant 0 : index
    %c0_39 = arith.constant 0 : index
    %70 = vector.load %arg2[%c0_37, %c2, %c0_38, %c0_39] : memref<4x4x16x16xbf16, #tpu.memory_space<vmem>>, vector<4x1x16x16xbf16>
    %71 = vector.shape_cast %70 : vector<4x1x16x16xbf16> to vector<4x16x16xbf16>
    %72 = arith.extf %71 : vector<4x16x16xbf16> to vector<4x16x16xf32>
    %73 = arith.addf %69, %72 : vector<4x16x16xf32>
    %cst_40 = arith.constant dense<0xFF800000> : vector<4x16xf32>
    %74 = vector.multi_reduction <maximumf>, %73, %cst_40 [2] : vector<4x16x16xf32> to vector<4x16xf32>
    %75 = vector.shape_cast %74 : vector<4x16xf32> to vector<4x16x1xf32>
    %76 = vector.broadcast %75 : vector<4x16x1xf32> to vector<4x16x16xf32>
    %77 = arith.subf %73, %76 : vector<4x16x16xf32>
    %78 = math.exp %77 : vector<4x16x16xf32>
    %cst_41 = arith.constant dense<0.000000e+00> : vector<4x16xf32>
    %79 = vector.multi_reduction <add>, %78, %cst_41 [2] : vector<4x16x16xf32> to vector<4x16xf32>
    %80 = vector.shape_cast %79 : vector<4x16xf32> to vector<4x16x1xf32>
    %81 = tpu.reciprocal %80 {approx = true} : vector<4x16x1xf32> -> vector<4x16x1xf32>
    %82 = vector.broadcast %81 : vector<4x16x1xf32> to vector<4x16x16xf32>
    %83 = arith.mulf %78, %82 : vector<4x16x16xf32>
    %84 = arith.truncf %83 : vector<4x16x16xf32> to vector<4x16x16xbf16>
    %cst_42 = arith.constant dense<0.000000e+00> : vector<4x16x32xf32>
    %85 = tpu.matmul %84, %68, %cst_42 {dimension_numbers = #tpu.dot_dimension_numbers<[2], [1], [1], [2], [0, 0, 0, 1, 1, 2], [0], [0]>} : vector<4x16x16xbf16>, vector<4x16x32xbf16>, vector<4x16x32xf32> -> vector<4x16x32xf32>
    %c0_43 = arith.constant 0 : index
    %c0_44 = arith.constant 0 : index
    %c64 = arith.constant 64 : index
    %86 = vector.load %arg20[%c0_43, %c0_44, %c64] : memref<4x16x128xf32, #tpu.memory_space<vmem>>, vector<4x16x32xf32>
    tpu.vector_store %arg20[%c0_43, %c0_44, %c64], %85 {strides = array<i32>} : memref<4x16x128xf32, #tpu.memory_space<vmem>>, vector<4x16x32xf32>,
    %87 = vector.extract_strided_slice %19 {offsets = [0, 0, 96], sizes = [4, 16, 32], strides = [1, 1, 1]} : vector<4x16x128xbf16> to vector<4x16x32xbf16>
    %88 = vector.extract_strided_slice %21 {offsets = [0, 0, 96], sizes = [4, 16, 32], strides = [1, 1, 1]} : vector<4x16x128xbf16> to vector<4x16x32xbf16>
    %89 = vector.extract_strided_slice %23 {offsets = [0, 0, 96], sizes = [4, 16, 32], strides = [1, 1, 1]} : vector<4x16x128xbf16> to vector<4x16x32xbf16>
    %cst_45 = arith.constant dense<0.000000e+00> : vector<4x16x16xf32>
    %90 = tpu.matmul %87, %88, %cst_45 {dimension_numbers = #tpu.dot_dimension_numbers<[2], [2], [1], [1], [0, 0, 0, 1, 1, 1], [0], [0]>} : vector<4x16x32xbf16>, vector<4x16x32xbf16>, vector<4x16x16xf32> -> vector<4x16x16xf32>
    %c0_46 = arith.constant 0 : index
    %c3 = arith.constant 3 : index
    %c0_47 = arith.constant 0 : index
    %c0_48 = arith.constant 0 : index
    %91 = vector.load %arg2[%c0_46, %c3, %c0_47, %c0_48] : memref<4x4x16x16xbf16, #tpu.memory_space<vmem>>, vector<4x1x16x16xbf16>
    %92 = vector.shape_cast %91 : vector<4x1x16x16xbf16> to vector<4x16x16xbf16>
    %93 = arith.extf %92 : vector<4x16x16xbf16> to vector<4x16x16xf32>
    %94 = arith.addf %90, %93 : vector<4x16x16xf32>
    %cst_49 = arith.constant dense<0xFF800000> : vector<4x16xf32>
    %95 = vector.multi_reduction <maximumf>, %94, %cst_49 [2] : vector<4x16x16xf32> to vector<4x16xf32>
    %96 = vector.shape_cast %95 : vector<4x16xf32> to vector<4x16x1xf32>
    %97 = vector.broadcast %96 : vector<4x16x1xf32> to vector<4x16x16xf32>
    %98 = arith.subf %94, %97 : vector<4x16x16xf32>
    %99 = math.exp %98 : vector<4x16x16xf32>
    %cst_50 = arith.constant dense<0.000000e+00> : vector<4x16xf32>
    %100 = vector.multi_reduction <add>, %99, %cst_50 [2] : vector<4x16x16xf32> to vector<4x16xf32>
    %101 = vector.shape_cast %100 : vector<4x16xf32> to vector<4x16x1xf32>
    %102 = tpu.reciprocal %101 {approx = true} : vector<4x16x1xf32> -> vector<4x16x1xf32>
    %103 = vector.broadcast %102 : vector<4x16x1xf32> to vector<4x16x16xf32>
    %104 = arith.mulf %99, %103 : vector<4x16x16xf32>
    %105 = arith.truncf %104 : vector<4x16x16xf32> to vector<4x16x16xbf16>
    %cst_51 = arith.constant dense<0.000000e+00> : vector<4x16x32xf32>
    %106 = tpu.matmul %105, %89, %cst_51 {dimension_numbers = #tpu.dot_dimension_numbers<[2], [1], [1], [2], [0, 0, 0, 1, 1, 2], [0], [0]>} : vector<4x16x16xbf16>, vector<4x16x32xbf16>, vector<4x16x32xf32> -> vector<4x16x32xf32>
    %c0_52 = arith.constant 0 : index
    %c0_53 = arith.constant 0 : index
    %c96 = arith.constant 96 : index
    %107 = vector.load %arg20[%c0_52, %c0_53, %c96] : memref<4x16x128xf32, #tpu.memory_space<vmem>>, vector<4x16x32xf32>
    tpu.vector_store %arg20[%c0_52, %c0_53, %c96], %106 {strides = array<i32>} : memref<4x16x128xf32, #tpu.memory_space<vmem>>, vector<4x16x32xf32>,
    %c0_54 = arith.constant 0 : index
    %c0_55 = arith.constant 0 : index
    %c0_56 = arith.constant 0 : index
    %108 = vector.load %arg20[%c0_54, %c0_55, %c0_56] : memref<4x16x128xf32, #tpu.memory_space<vmem>>, vector<4x16x128xf32>
    %109 = vector.shape_cast %108 : vector<4x16x128xf32> to vector<64x128xf32>
    %110 = arith.truncf %109 : vector<64x128xf32> to vector<64x128xbf16>
    %c0_57 = arith.constant 0 : index
    %c0_58 = arith.constant 0 : index
    %111 = vector.load %arg9[%c0_57, %c0_58] : memref<128x128xbf16, #tpu.memory_space<vmem>>, vector<128x128xbf16>
    %cst_59 = arith.constant dense<0.000000e+00> : vector<64x128xf32>
    %112 = tpu.matmul %110, %111, %cst_59 {dimension_numbers = #tpu.dot_dimension_numbers<[1], [0], [0], [1], [0, 0, 1, 1], [], []>} : vector<64x128xbf16>, vector<128x128xbf16>, vector<64x128xf32> -> vector<64x128xf32>
    %c0_60 = arith.constant 0 : index
    %c0_61 = arith.constant 0 : index
    %113 = vector.load %arg10[%c0_60, %c0_61] : memref<1x128xf32, #tpu.memory_space<vmem>>, vector<1x128xf32>
    %114 = vector.broadcast %113 : vector<1x128xf32> to vector<64x128xf32>
    %115 = arith.addf %112, %114 : vector<64x128xf32>
    %116 = vector.shape_cast %115 : vector<64x128xf32> to vector<4x16x128xf32>
    %117 = arith.addf %0, %116 : vector<4x16x128xf32>
    %cst_62 = arith.constant dense<0.000000e+00> : vector<4x16xf32>
    %118 = vector.multi_reduction <add>, %117, %cst_62 [2] : vector<4x16x128xf32> to vector<4x16xf32>
    %119 = vector.shape_cast %118 : vector<4x16xf32> to vector<4x16x1xf32>
    %cst_63 = arith.constant 1.280000e+02 : f32
    %120 = vector.broadcast %cst_63 : f32 to vector<4x16x1xf32>
    %121 = arith.divf %119, %120 : vector<4x16x1xf32>
    %122 = vector.broadcast %121 : vector<4x16x1xf32> to vector<4x16x128xf32>
    %123 = arith.subf %117, %122 : vector<4x16x128xf32>
    %124 = arith.mulf %123, %123 : vector<4x16x128xf32>
    %cst_64 = arith.constant dense<0.000000e+00> : vector<4x16xf32>
    %125 = vector.multi_reduction <add>, %124, %cst_64 [2] : vector<4x16x128xf32> to vector<4x16xf32>
    %126 = vector.shape_cast %125 : vector<4x16xf32> to vector<4x16x1xf32>
    %cst_65 = arith.constant 1.280000e+02 : f32
    %127 = vector.broadcast %cst_65 : f32 to vector<4x16x1xf32>
    %128 = arith.divf %126, %127 : vector<4x16x1xf32>
    %129 = vector.broadcast %121 : vector<4x16x1xf32> to vector<4x16x128xf32>
    %130 = arith.subf %117, %129 : vector<4x16x128xf32>
    %cst_66 = arith.constant 9.99999974E-6 : f32
    %131 = vector.broadcast %cst_66 : f32 to vector<4x16x1xf32>
    %132 = arith.addf %128, %131 : vector<4x16x1xf32>
    %133 = math.rsqrt %132 : vector<4x16x1xf32>
    %134 = vector.broadcast %133 : vector<4x16x1xf32> to vector<4x16x128xf32>
    %135 = arith.mulf %130, %134 : vector<4x16x128xf32>
    %c0_67 = arith.constant 0 : index
    %c0_68 = arith.constant 0 : index
    %136 = vector.load %arg15[%c0_67, %c0_68] : memref<1x128xf32, #tpu.memory_space<vmem>>, vector<1x128xf32>
    %137 = vector.shape_cast %136 : vector<1x128xf32> to vector<1x1x128xf32>
    %138 = vector.broadcast %137 : vector<1x1x128xf32> to vector<4x16x128xf32>
    %139 = arith.mulf %135, %138 : vector<4x16x128xf32>
    %c0_69 = arith.constant 0 : index
    %c0_70 = arith.constant 0 : index
    %140 = vector.load %arg16[%c0_69, %c0_70] : memref<1x128xf32, #tpu.memory_space<vmem>>, vector<1x128xf32>
    %141 = vector.shape_cast %140 : vector<1x128xf32> to vector<1x1x128xf32>
    %142 = vector.broadcast %141 : vector<1x1x128xf32> to vector<4x16x128xf32>
    %143 = arith.addf %139, %142 : vector<4x16x128xf32>
    %144 = vector.shape_cast %143 : vector<4x16x128xf32> to vector<64x128xf32>
    %145 = arith.truncf %144 : vector<64x128xf32> to vector<64x128xbf16>
    %c0_71 = arith.constant 0 : index
    %c0_72 = arith.constant 0 : index
    %146 = vector.load %arg11[%c0_71, %c0_72] : memref<128x256xbf16, #tpu.memory_space<vmem>>, vector<128x256xbf16>
    %cst_73 = arith.constant dense<0.000000e+00> : vector<64x256xf32>
    %147 = tpu.matmul %145, %146, %cst_73 {dimension_numbers = #tpu.dot_dimension_numbers<[1], [0], [0], [1], [0, 0, 1, 1], [], []>} : vector<64x128xbf16>, vector<128x256xbf16>, vector<64x256xf32> -> vector<64x256xf32>
    %c0_74 = arith.constant 0 : index
    %c0_75 = arith.constant 0 : index
    %148 = vector.load %arg12[%c0_74, %c0_75] : memref<1x256xf32, #tpu.memory_space<vmem>>, vector<1x256xf32>
    %149 = vector.broadcast %148 : vector<1x256xf32> to vector<64x256xf32>
    %150 = arith.addf %147, %149 : vector<64x256xf32>
    %cst_76 = arith.constant 0.000000e+00 : f32
    %151 = vector.broadcast %cst_76 : f32 to vector<64x256xf32>
    %152 = arith.maximumf %150, %151 : vector<64x256xf32>
    %153 = arith.truncf %152 : vector<64x256xf32> to vector<64x256xbf16>
    %c0_77 = arith.constant 0 : index
    %c0_78 = arith.constant 0 : index
    %154 = vector.load %arg13[%c0_77, %c0_78] : memref<256x128xbf16, #tpu.memory_space<vmem>>, vector<256x128xbf16>
    %cst_79 = arith.constant dense<0.000000e+00> : vector<64x128xf32>
    %155 = tpu.matmul %153, %154, %cst_79 {dimension_numbers = #tpu.dot_dimension_numbers<[1], [0], [0], [1], [0, 0, 1, 1], [], []>} : vector<64x256xbf16>, vector<256x128xbf16>, vector<64x128xf32> -> vector<64x128xf32>
    %c0_80 = arith.constant 0 : index
    %c0_81 = arith.constant 0 : index
    %156 = vector.load %arg14[%c0_80, %c0_81] : memref<1x128xf32, #tpu.memory_space<vmem>>, vector<1x128xf32>
    %157 = vector.broadcast %156 : vector<1x128xf32> to vector<64x128xf32>
    %158 = arith.addf %155, %157 : vector<64x128xf32>
    %159 = vector.shape_cast %158 : vector<64x128xf32> to vector<4x16x128xf32>
    %cst_82 = arith.constant dense<0.000000e+00> : vector<4x16xf32>
    %160 = vector.multi_reduction <add>, %159, %cst_82 [2] : vector<4x16x128xf32> to vector<4x16xf32>
    %161 = vector.shape_cast %160 : vector<4x16xf32> to vector<4x16x1xf32>
    %cst_83 = arith.constant 1.280000e+02 : f32
    %162 = vector.broadcast %cst_83 : f32 to vector<4x16x1xf32>
    %163 = arith.divf %161, %162 : vector<4x16x1xf32>
    %164 = vector.broadcast %163 : vector<4x16x1xf32> to vector<4x16x128xf32>
    %165 = arith.subf %159, %164 : vector<4x16x128xf32>
    %166 = arith.mulf %165, %165 : vector<4x16x128xf32>
    %cst_84 = arith.constant dense<0.000000e+00> : vector<4x16xf32>
    %167 = vector.multi_reduction <add>, %166, %cst_84 [2] : vector<4x16x128xf32> to vector<4x16xf32>
    %168 = vector.shape_cast %167 : vector<4x16xf32> to vector<4x16x1xf32>
    %cst_85 = arith.constant 1.280000e+02 : f32
    %169 = vector.broadcast %cst_85 : f32 to vector<4x16x1xf32>
    %170 = arith.divf %168, %169 : vector<4x16x1xf32>
    %171 = vector.broadcast %163 : vector<4x16x1xf32> to vector<4x16x128xf32>
    %172 = arith.subf %159, %171 : vector<4x16x128xf32>
    %cst_86 = arith.constant 9.99999974E-6 : f32
    %173 = vector.broadcast %cst_86 : f32 to vector<4x16x1xf32>
    %174 = arith.addf %170, %173 : vector<4x16x1xf32>
    %175 = math.rsqrt %174 : vector<4x16x1xf32>
    %176 = vector.broadcast %175 : vector<4x16x1xf32> to vector<4x16x128xf32>
    %177 = arith.mulf %172, %176 : vector<4x16x128xf32>
    %c0_87 = arith.constant 0 : index
    %c0_88 = arith.constant 0 : index
    %178 = vector.load %arg17[%c0_87, %c0_88] : memref<1x128xf32, #tpu.memory_space<vmem>>, vector<1x128xf32>
    %179 = vector.shape_cast %178 : vector<1x128xf32> to vector<1x1x128xf32>
    %180 = vector.broadcast %179 : vector<1x1x128xf32> to vector<4x16x128xf32>
    %181 = arith.mulf %177, %180 : vector<4x16x128xf32>
    %c0_89 = arith.constant 0 : index
    %c0_90 = arith.constant 0 : index
    %182 = vector.load %arg18[%c0_89, %c0_90] : memref<1x128xf32, #tpu.memory_space<vmem>>, vector<1x128xf32>
    %183 = vector.shape_cast %182 : vector<1x128xf32> to vector<1x1x128xf32>
    %184 = vector.broadcast %183 : vector<1x1x128xf32> to vector<4x16x128xf32>
    %185 = arith.addf %181, %184 : vector<4x16x128xf32>
    %c0_91 = arith.constant 0 : index
    %c0_92 = arith.constant 0 : index
    %c0_93 = arith.constant 0 : index
    %186 = vector.load %arg19[%c0_91, %c0_92, %c0_93] : memref<4x16x128xf32, #tpu.memory_space<vmem>>, vector<4x16x128xf32>
    tpu.vector_store %arg19[%c0_91, %c0_92, %c0_93], %185 {strides = array<i32>} : memref<4x16x128xf32, #tpu.memory_space<vmem>>, vector<4x16x128xf32>,
    return
  }
  func.func @transform_0(%arg0: i32) -> (i32, i32, i32) {
    %c0_i32 = arith.constant 0 : i32
    %c0_i32_0 = arith.constant 0 : i32
    %c0_i32_1 = arith.constant 0 : i32
    return %arg0, %c0_i32, %c0_i32_0 : i32, i32, i32
  }
  func.func @transform_1(%arg0: i32) -> (i32, i32, i32, i32) {
    %c0_i32 = arith.constant 0 : i32
    %c0_i32_0 = arith.constant 0 : i32
    %c0_i32_1 = arith.constant 0 : i32
    %c0_i32_2 = arith.constant 0 : i32
    return %arg0, %c0_i32, %c0_i32_0, %c0_i32_1 : i32, i32, i32, i32
  }
  func.func @transform_2(%arg0: i32) -> (i32, i32) {
    %c0_i32 = arith.constant 0 : i32
    %c0_i32_0 = arith.constant 0 : i32
    %c0_i32_1 = arith.constant 0 : i32
    return %c0_i32, %c0_i32_0 : i32, i32
  }
  func.func @transform_3(%arg0: i32) -> (i32, i32) {
    %c0_i32 = arith.constant 0 : i32
    %c0_i32_0 = arith.constant 0 : i32
    %c0_i32_1 = arith.constant 0 : i32
    return %c0_i32, %c0_i32_0 : i32, i32
  }
  func.func @transform_4(%arg0: i32) -> (i32, i32) {
    %c0_i32 = arith.constant 0 : i32
    %c0_i32_0 = arith.constant 0 : i32
    %c0_i32_1 = arith.constant 0 : i32
    return %c0_i32, %c0_i32_0 : i32, i32
  }
  func.func @transform_5(%arg0: i32) -> (i32, i32) {
    %c0_i32 = arith.constant 0 : i32
    %c0_i32_0 = arith.constant 0 : i32
    %c0_i32_1 = arith.constant 0 : i32
    return %c0_i32, %c0_i32_0 : i32, i32
  }
  func.func @transform_6(%arg0: i32) -> (i32, i32) {
    %c0_i32 = arith.constant 0 : i32
    %c0_i32_0 = arith.constant 0 : i32
    %c0_i32_1 = arith.constant 0 : i32
    return %c0_i32, %c0_i32_0 : i32, i32
  }
  func.func @transform_7(%arg0: i32) -> (i32, i32) {
    %c0_i32 = arith.constant 0 : i32
    %c0_i32_0 = arith.constant 0 : i32
    %c0_i32_1 = arith.constant 0 : i32
    return %c0_i32, %c0_i32_0 : i32, i32
  }
  func.func @transform_8(%arg0: i32) -> (i32, i32) {
    %c0_i32 = arith.constant 0 : i32
    %c0_i32_0 = arith.constant 0 : i32
    %c0_i32_1 = arith.constant 0 : i32
    return %c0_i32, %c0_i32_0 : i32, i32
  }
  func.func @transform_9(%arg0: i32) -> (i32, i32) {
    %c0_i32 = arith.constant 0 : i32
    %c0_i32_0 = arith.constant 0 : i32
    %c0_i32_1 = arith.constant 0 : i32
    return %c0_i32, %c0_i32_0 : i32, i32
  }
  func.func @transform_10(%arg0: i32) -> (i32, i32) {
    %c0_i32 = arith.constant 0 : i32
    %c0_i32_0 = arith.constant 0 : i32
    %c0_i32_1 = arith.constant 0 : i32
    return %c0_i32, %c0_i32_0 : i32, i32
  }
  func.func @transform_11(%arg0: i32) -> (i32, i32) {
    %c0_i32 = arith.constant 0 : i32
    %c0_i32_0 = arith.constant 0 : i32
    %c0_i32_1 = arith.constant 0 : i32
    return %c0_i32, %c0_i32_0 : i32, i32
  }
  func.func @transform_12(%arg0: i32) -> (i32, i32) {
    %c0_i32 = arith.constant 0 : i32
    %c0_i32_0 = arith.constant 0 : i32
    %c0_i32_1 = arith.constant 0 : i32
    return %c0_i32, %c0_i32_0 : i32, i32
  }
  func.func @transform_13(%arg0: i32) -> (i32, i32) {
    %c0_i32 = arith.constant 0 : i32
    %c0_i32_0 = arith.constant 0 : i32
    %c0_i32_1 = arith.constant 0 : i32
    return %c0_i32, %c0_i32_0 : i32, i32
  }
  func.func @transform_14(%arg0: i32) -> (i32, i32) {
    %c0_i32 = arith.constant 0 : i32
    %c0_i32_0 = arith.constant 0 : i32
    %c0_i32_1 = arith.constant 0 : i32
    return %c0_i32, %c0_i32_0 : i32, i32
  }
  func.func @transform_15(%arg0: i32) -> (i32, i32) {
    %c0_i32 = arith.constant 0 : i32
    %c0_i32_0 = arith.constant 0 : i32
    %c0_i32_1 = arith.constant 0 : i32
    return %c0_i32, %c0_i32_0 : i32, i32
  }
  func.func @transform_16(%arg0: i32) -> (i32, i32) {
    %c0_i32 = arith.constant 0 : i32
    %c0_i32_0 = arith.constant 0 : i32
    %c0_i32_1 = arith.constant 0 : i32
    return %c0_i32, %c0_i32_0 : i32, i32
  }
  func.func @transform_17(%arg0: i32) -> (i32, i32) {
    %c0_i32 = arith.constant 0 : i32
    %c0_i32_0 = arith.constant 0 : i32
    %c0_i32_1 = arith.constant 0 : i32
    return %c0_i32, %c0_i32_0 : i32, i32
  }
  func.func @transform_18(%arg0: i32) -> (i32, i32, i32) {
    %c0_i32 = arith.constant 0 : i32
    %c0_i32_0 = arith.constant 0 : i32
    %c0_i32_1 = arith.constant 0 : i32
    return %arg0, %c0_i32, %c0_i32_0 : i32, i32, i32
  }
}

</mosaic_0001>

<bundles_post_ra>
// kernel: graphormer_layer.1
= control target key start
LH: loop header
LB: loop body
LE: loop exit
PB: predicated region body
PF: predicated region fallthrough
CT: control target
= control target key end

     0   :  { %s5447_s0 = inlined_call_operand.vmem [shape: f32[4,16,128], index: 0, kind: input, shape index: {}]   ;;  %s5448_s1 = inlined_call_operand.vmem [shape: bf16[4,4,16,16], index: 1, kind: input, shape index: {}]   ;;  %s5449_s2 = inlined_call_operand.vmem [shape: bf16[128,128], index: 2, kind: input, shape index: {}]   ;;  %s5450_s3 = inlined_call_operand.vmem [shape: f32[1,128], index: 3, kind: input, shape index: {}]   ;;  %s5451_s4 = inlined_call_operand.vmem [shape: bf16[128,128], index: 4, kind: input, shape index: {}]   ;;  %s5452_s5 = inlined_call_operand.vmem [shape: f32[1,128], index: 5, kind: input, shape index: {}]   ;;  %s5453_s6 = inlined_call_operand.vmem [shape: bf16[128,128], index: 6, kind: input, shape index: {}]   ;;  %s5454_s7 = inlined_call_operand.vmem [shape: f32[1,128], index: 7, kind: input, shape index: {}]   ;;  %s5455_s8 = inlined_call_operand.vmem [shape: bf16[128,128], index: 8, kind: input, shape index: {}]   ;;  %s5456_s9 = inlined_call_operand.vmem [shape: f32[1,128], index: 9, kind: input, shape index: {}]   ;;  %s5457_s10 = inlined_call_operand.vmem [shape: bf16[128,256], index: 10, kind: input, shape index: {}]   ;;  %s5458_s11 = inlined_call_operand.vmem [shape: f32[1,256], index: 11, kind: input, shape index: {}]   ;;  %s5459_s12 = inlined_call_operand.vmem [shape: bf16[256,128], index: 12, kind: input, shape index: {}]   ;;  %s5460_s13 = inlined_call_operand.vmem [shape: f32[1,128], index: 13, kind: input, shape index: {}]   ;;  %s5461_s14 = inlined_call_operand.vmem [shape: f32[1,128], index: 14, kind: input, shape index: {}]   ;;  %s5462_s15 = inlined_call_operand.vmem [shape: f32[1,128], index: 15, kind: input, shape index: {}]   ;;  %s5463_s16 = inlined_call_operand.vmem [shape: f32[1,128], index: 16, kind: input, shape index: {}]   ;;  %s5464_s17 = inlined_call_operand.vmem [shape: f32[1,128], index: 17, kind: input, shape index: {}]   ;;  %s5465_s18 = inlined_call_operand.hbm [shape: f32[4,16,128], index: 18, kind: output, shape index: {}]  }
   0x1   :  { %5469 = sst [smem:[#allocation6_spill]] %s5447_s0 }
   0x2   :  { %5470 = sst [smem:[#allocation7_spill]] %s5448_s1 }
   0x3   :  { %5471 = sst [smem:[#allocation8_spill]] %s5449_s2 }
   0x4   :  { %v4112_v0 = vld [vmem:[%s5451_s4] sm:$0xff]   ;;  %v4113_v1 = vld [vmem:[%s5451_s4 + $0x8] sm:$0xff]   ;;  %s5472_s1 = sld [smem:[#allocation8_spill]]  ;;  %v4115_v3 = vld [vmem:[%s5451_s4 + $0x10] sm:$0xff]   ;;  %s5473_s22 = sld [smem:[#allocation6_spill]] }
   0x5   :  { %3823 = vmatprep.subr.bf16.mxu1 %v4112_v0  ;;  %v4117_v6 = vld [vmem:[%s5451_s4 + $0x18] sm:$0xff]   ;;  %v4119_v8 = vld [vmem:[%s5451_s4 + $0x20] sm:$0xff]   ;;  %v4121_v13 = vld [vmem:[%s5451_s4 + $0x28] sm:$0xff]  }
   0x6   :  { %3824 = vmatpush3.bf16.msra.mxu1 %v4112_v0  ;;  %v4123_v14 = vld [vmem:[%s5451_s4 + $0x30] sm:$0xff]   ;;  %v4125_v17 = vld [vmem:[%s5451_s4 + $0x38] sm:$0xff]  }
   0x7   :  { %3825 = vmatprep.subr.bf16.mxu1 %v4113_v1 }
   0xa   :  { %v4114_v2 = vld [vmem:[%s5472_s1] sm:$0xff]   ;;  %v4116_v4 = vld [vmem:[%s5472_s1 + $0x8] sm:$0xff]   ;;  %v4118_v5 = vld [vmem:[%s5472_s1 + $0x10] sm:$0xff]   ;;  %3826 = vmatpush3.bf16.msra.mxu1 %v4113_v1 }
   0xb   :  { %3799 = vmatprep.subr.bf16.mxu0 %v4114_v2  ;;  %3827 = vmatprep.subr.bf16.mxu1 %v4115_v3  ;;  %v4120_v7 = vld [vmem:[%s5472_s1 + $0x18] sm:$0xff]   ;;  %v4122_v9 = vld [vmem:[%s5472_s1 + $0x20] sm:$0xff]   ;;  %v62_v11 = vld [vmem:[%s5473_s22 + $0x8] sm:$0xff] }
   0xc   :  { %3800 = vmatpush3.bf16.msra.mxu0 %v4114_v2  ;;  %v61_v10 = vld [vmem:[%s5473_s22] sm:$0xff]  ;;  %v4124_v15 = vld [vmem:[%s5472_s1 + $0x28] sm:$0xff]   ;;  %v4126_v16 = vld [vmem:[%s5472_s1 + $0x30] sm:$0xff]  }
   0xd   :  { %3801 = vmatprep.subr.bf16.mxu0 %v4116_v4  ;;  %v69_v12 = vpack.c.bf16 %v62_v11, %v61_v10  ;;  %v4127_v18 = vld [vmem:[%s5472_s1 + $0x38] sm:$0xff]   ;;  %v63_v19 = vld [vmem:[%s5473_s22 + $0x10] sm:$0xff]  ;;  %v65_v21 = vld [vmem:[%s5473_s22 + $0x20] sm:$0xff] }
   0xe   :  { %3828 = vmatpush3.bf16.msra.mxu1 %v4115_v3  ;;  %v64_v20 = vld [vmem:[%s5473_s22 + $0x18] sm:$0xff]  ;;  %v66_v22 = vld [vmem:[%s5473_s22 + $0x28] sm:$0xff]  ;;  %v67_v25 = vld [vmem:[%s5473_s22 + $0x30] sm:$0xff] }
   0xf   :  { %3829 = vmatprep.subr.bf16.mxu1 %v4117_v6  ;;  %3839 = vmatprep.mubr.bf16.mxu1 %v69_v12  ;;  %v4546_v23 = vpack.c.bf16 %v64_v20, %v63_v19  ;;  %v4548_v24 = vpack.c.bf16 %v66_v22, %v65_v21  ;;  %v68_v26 = vld [vmem:[%s5473_s22 + $0x38] sm:$0xff] }
  0x10   :  { %3802 = vmatpush3.bf16.msra.mxu0 %v4116_v4  ;;  %3815 = vmatprep.mubr.bf16.mxu0 %v69_v12  ;;  %v4560_v27 = vpack.c.bf16 %v68_v26, %v67_v25 }
  0x11   :  { %3803 = vmatprep.subr.bf16.mxu0 %v4118_v5 }
  0x12   :  { %3830 = vmatpush3.bf16.msra.mxu1 %v4117_v6 }
  0x13   :  { %3831 = vmatprep.subr.bf16.mxu1 %v4119_v8 }
  0x14   :  { %3804 = vmatpush3.bf16.msra.mxu0 %v4118_v5 }
  0x15   :  { %3805 = vmatprep.subr.bf16.mxu0 %v4120_v7 }
  0x16   :  { %3832 = vmatpush3.bf16.msra.mxu1 %v4119_v8 }
  0x17   :  { %3833 = vmatprep.subr.bf16.mxu1 %v4121_v13 }
  0x18   :  { %3806 = vmatpush3.bf16.msra.mxu0 %v4120_v7 }
  0x19   :  { %3807 = vmatprep.subr.bf16.mxu0 %v4122_v9 }
  0x1a   :  { %3834 = vmatpush3.bf16.msra.mxu1 %v4121_v13 }
  0x1b   :  { %3835 = vmatprep.subr.bf16.mxu1 %v4123_v14 }
  0x1c   :  { %3808 = vmatpush3.bf16.msra.mxu0 %v4122_v9 }
  0x1d   :  { %3809 = vmatprep.subr.bf16.mxu0 %v4124_v15 }
  0x1e   :  { %3836 = vmatpush3.bf16.msra.mxu1 %v4123_v14 }
  0x1f   :  { %3837 = vmatprep.subr.bf16.mxu1 %v4125_v17 }
  0x20   :  { %3810 = vmatpush3.bf16.msra.mxu0 %v4124_v15 }
  0x21   :  { %3811 = vmatprep.subr.bf16.mxu0 %v4126_v16 }
  0x22   :  { %3838 = vmatpush3.bf16.msra.mxu1 %v4125_v17 }
  0x24   :  { %3812 = vmatpush3.bf16.msra.mxu0 %v4126_v16 }
  0x25   :  { %3813 = vmatprep.subr.bf16.mxu0 %v4127_v18  ;;  %3840 = vmatmul.mubr.bf16.vlgmr.msra.gmra.mrb[0].mxu1 %v4546_v23 }
  0x26   :  { %3843 = vmatprep.mubr.bf16.mxu1 %v4548_v24 }
  0x28   :  { %3814 = vmatpush3.bf16.msra.mxu0 %v4127_v18 }
  0x2b   :  { %3816 = vmatmul.mubr.bf16.vlgmr.msra.gmra.mrb[0].mxu0 %v4546_v23 }
  0x2c   :  { %3819 = vmatprep.mubr.bf16.mxu0 %v4548_v24 }
  0x2d   :  { %3844 = vmatmul.mubr.bf16.gmra.mrb[4].mxu1 %v4560_v27 }
  0x33   :  { %3820 = vmatmul.mubr.bf16.gmra.mrb[4].mxu0 %v4560_v27 }
  0x34   :  { %3863 = vmatprep.mubr.bf16.mxu0 %v69_v12 }
  0x35   :  { %23 = vsyncpa [#allocation4], 0  ;;  %v4376_v28 = vmov 0.0   ;;  %vm4377_vm0 = vmmov 0   ;;  %v3448_v30 = vld [vmem:[%s5452_s5] ss:$0 sm:$0xff] }
  0x36   :  { %3871 = vmatprep.subr.bf16.mxu1 %v4376_v28  ;;  %3873 = vmatprep.mubr.msk.bf16.mxu1 %vm4377_vm0, %v4376_v28  ;;  %v3439_v31 = vld [vmem:[%s5450_s3] ss:$0 sm:$0xff]  ;;  %vm509_vm1 = vcmask 261120   ;;  %v4129_v12 = vld [vmem:[%s5453_s6 + $0x8] sm:$0xff]   ;;  %v4130_v13 = vld [vmem:[%s5453_s6 + $0x10] sm:$0xff]   ;;  %s5474_s5 = sld [smem:[#allocation7_spill]] }
  0x37   :  { %v4128_v11 = vld [vmem:[%s5453_s6] sm:$0xff]   ;;  %v4131_v14 = vld [vmem:[%s5453_s6 + $0x18] sm:$0xff]   ;;  %v4133_v16 = vld [vmem:[%s5453_s6 + $0x28] sm:$0xff]   ;;  %vm698_vm2 = vcmask 130048   ;;  %s4378_s1 = smov 96   ;;  %s4379_s3 = smov 64  }
  0x38   :  { %3847 = vmatprep.subr.bf16.mxu0 %v4128_v11  ;;  %v4132_v15 = vld [vmem:[%s5453_s6 + $0x20] sm:$0xff]   ;;  %v4134_v17 = vld [vmem:[%s5453_s6 + $0x30] sm:$0xff]   ;;  %v4135_v18 = vld [vmem:[%s5453_s6 + $0x38] sm:$0xff]   ;;  %vm1520_vm3 = vcmask 523520   ;;  %vm2062_vm4 = vcmask 785920   ;;  %vm2604_vm5 = vcmask 1048320  }
  0x39   :  { %3848 = vmatpush3.bf16.msra.mxu0 %v4128_v11 }
  0x3a   :  { %3849 = vmatprep.subr.bf16.mxu0 %v4129_v12 }
  0x3c   :  { %v3569_v19 = vld [vmem:[%s5474_s5] sm:$0xff]  }
  0x3d   :  { %3850 = vmatpush3.bf16.msra.mxu0 %v4129_v12  ;;  %v3570_v20 = vunpack.c.l.bf16 %v3569_v19  ;;  %v3571_v21 = vunpack.c.h.bf16 %v3569_v19 }
  0x3e   :  { %3851 = vmatprep.subr.bf16.mxu0 %v4130_v13 }
  0x41   :  { %3852 = vmatpush3.bf16.msra.mxu0 %v4130_v13 }
  0x42   :  { %3853 = vmatprep.subr.bf16.mxu0 %v4131_v14 }
  0x45   :  { %3854 = vmatpush3.bf16.msra.mxu0 %v4131_v14 }
  0x46   :  { %3855 = vmatprep.subr.bf16.mxu0 %v4132_v15 }
  0x49   :  { %3856 = vmatpush3.bf16.msra.mxu0 %v4132_v15 }
  0x4a   :  { %3857 = vmatprep.subr.bf16.mxu0 %v4133_v16 }
  0x4d   :  { %3858 = vmatpush3.bf16.msra.mxu0 %v4133_v16 }
  0x4e   :  { %3859 = vmatprep.subr.bf16.mxu0 %v4134_v17 }
  0x51   :  { %3860 = vmatpush3.bf16.msra.mxu0 %v4134_v17 }
  0x52   :  { %3861 = vmatprep.subr.bf16.mxu0 %v4135_v18 }
  0x55   :  { %3862 = vmatpush3.bf16.msra.mxu0 %v4135_v18 }
  0x56   :  { %3895 = vmatprep.subr.bf16.mxu0 %v4376_v28 }
  0x58   :  { %3864 = vmatmul.mubr.bf16.vlgmr.msra.gmra.mrb[8].mxu0 %v4546_v23  ;;  %v3632_v23 = vld [vmem:[%s5474_s5 + $0x20] sm:$0xff]  }
  0x59   :  { %3867 = vmatprep.mubr.bf16.mxu0 %v4548_v24 }
  0x60   :  { %3868 = vmatmul.mubr.bf16.gmra.mrb[12].mxu0 %v4560_v27 }
  0x61   :  { %3897 = vmatprep.mubr.msk.bf16.mxu0 %vm4377_vm0, %v4376_v28 }
  0xf8   :  { %v3841_v29 = vpop.f32.mrb[0].mxu1 }
  0xf9   :  { %v314_v32 = vpop.f32.mrb[1].mxu1  ;;  %v323_v35 = vadd.f32 %v3841_v29, %v3448_v30 }
  0xfa   :  { %v3842_v33 = vpop.f32.mrb[2].mxu1  ;;  %v315_v40 = vadd.f32 %v3448_v30, %v314_v32 }
  0xfb   :  { %v326_v36 = vadd.f32 %v3842_v33, %v3448_v30  ;;  %v317_v37 = vpop.f32.mrb[3].mxu1  ;;  %v3575_v33 = vunpack.c.h.bf16 %v3632_v23 }
  0xfc   :  { %v318_v41 = vadd.f32 %v3448_v30, %v317_v37 }
  0xfd   :  { %v4573_v44 = vpack.c.bf16 %v326_v36, %v323_v35 }
  0xfe   :  { %v3817_v34 = vpop.f32.mrb[0].mxu0  ;;  %v4575_v47 = vpack.c.bf16 %v318_v41, %v315_v40 }
  0xff   :  { %v187_v38 = vadd.f32 %v3817_v34, %v3439_v31  ;;  %v178_v39 = vpop.f32.mrb[1].mxu0  ;;  %v561_v7 = vsel %vm509_vm1, %v4573_v44, 0 }
 0x100   :  { %v179_v42 = vadd.f32 %v3439_v31, %v178_v39  ;;  %v3818_v43 = vpop.f32.mrb[2].mxu0  ;;  %v514_v50 = vsel %vm509_vm1, %v4575_v47, 0  ;;  %v3845_v52 = vpop.f32.mrb[4].mxu1 }
 0x101   :  { %v190_v45 = vadd.f32 %v3818_v43, %v3439_v31  ;;  %v181_v46 = vpop.f32.mrb[3].mxu0  ;;  %3872 = vmatpush3.bf16.xpose.msra.mxu1 %v514_v50  ;;  %v339_v53 = vadd.f32 %v3845_v52, %v3448_v30  ;;  %v330_v54 = vpop.f32.mrb[5].mxu1 }
 0x102   :  { %v182_v48 = vadd.f32 %v3439_v31, %v181_v46  ;;  %3877 = vmatprep.subr.bf16.mxu1 %v4376_v28  ;;  %v331_v55 = vadd.f32 %v3448_v30, %v330_v54  ;;  %v3846_v56 = vpop.f32.mrb[6].mxu1 }
 0x103   :  { %v4577_v49 = vpack.c.bf16 %v190_v45, %v187_v38  ;;  %v342_v58 = vadd.f32 %v3846_v56, %v3448_v30  ;;  %v333_v59 = vpop.f32.mrb[7].mxu1  ;;  %v3633_v38 = vld [vmem:[%s5474_s5 + $0x40] sm:$0xff]  }
 0x104   :  { %v4581_v51 = vpack.c.bf16 %v182_v48, %v179_v42  ;;  %v334_v62 = vadd.f32 %v3448_v30, %v333_v59  ;;  %v3578_v42 = vunpack.c.l.bf16 %v3633_v38  ;;  %v3579_v45 = vunpack.c.h.bf16 %v3633_v38 }
 0x105   :  { %v4584_v1 = vpack.c.bf16 %v342_v58, %v339_v53  ;;  %v3634_v53 = vld [vmem:[%s5474_s5 + $0x60] sm:$0xff]  }
 0x106   :  { %v3821_v57 = vpop.f32.mrb[4].mxu0  ;;  %v4586_v4 = vpack.c.bf16 %v334_v62, %v331_v55  ;;  %v3582_v58 = vunpack.c.l.bf16 %v3634_v53  ;;  %v3583_v59 = vunpack.c.h.bf16 %v3634_v53 }
 0x107   :  { %v203_v60 = vadd.f32 %v3821_v57, %v3439_v31  ;;  %v194_v61 = vpop.f32.mrb[5].mxu0  ;;  %v655_v10 = vsel %vm509_vm1, %v4584_v1, 0 }
 0x108   :  { %v195_v63 = vadd.f32 %v3439_v31, %v194_v61  ;;  %v3822_v0 = vpop.f32.mrb[6].mxu0  ;;  %3874 = vmatmul.mubr.msk.bf16.vlgmr.msra.gmra.mrb[8].mxu1 %vm509_vm1, %v4581_v51  ;;  %v608_v9 = vsel %vm509_vm1, %v4586_v4, 0 }
 0x109   :  { %v206_v2 = vadd.f32 %v3822_v0, %v3439_v31  ;;  %v197_v3 = vpop.f32.mrb[7].mxu0  ;;  %3878 = vmatpush3.bf16.xpose.msra.mxu1 %v561_v7  ;;  %3879 = vmatprep.mubr.msk.bf16.mxu1 %vm4377_vm0, %v4376_v28 }
 0x10a   :  { %v198_v5 = vadd.f32 %v3439_v31, %v197_v3  ;;  %3883 = vmatprep.subr.bf16.mxu1 %v4376_v28  ;;  %v3574_v31 = vunpack.c.l.bf16 %v3632_v23 }
 0x10b   :  { %v4588_v6 = vpack.c.bf16 %v206_v2, %v203_v60 }
 0x10c   :  { %v4594_v8 = vpack.c.bf16 %v198_v5, %v195_v63 }
 0x110   :  { %3880 = vmatmul.mubr.msk.bf16.vlgmr.msra.gmra.mrb[12].mxu1 %vm509_vm1, %v4577_v49 }
 0x111   :  { %3884 = vmatpush3.bf16.xpose.msra.mxu1 %v608_v9  ;;  %3885 = vmatprep.mubr.msk.bf16.mxu1 %vm4377_vm0, %v4376_v28 }
 0x112   :  { %3889 = vmatprep.subr.bf16.mxu1 %v4376_v28 }
 0x118   :  { %3886 = vmatmul.mubr.msk.bf16.vlgmr.msra.gmra.mrb[16].mxu1 %vm509_vm1, %v4594_v8 }
 0x119   :  { %3890 = vmatpush3.bf16.xpose.msra.mxu1 %v655_v10  ;;  %3891 = vmatprep.mubr.msk.bf16.mxu1 %vm4377_vm0, %v4376_v28 }
 0x11a   :  { %3901 = vmatprep.subr.bf16.mxu1 %v4376_v28 }
 0x120   :  { %3892 = vmatmul.mubr.msk.bf16.vlgmr.msra.gmra.mrb[20].mxu1 %vm509_vm1, %v4588_v6 }
 0x121   :  { %3903 = vmatprep.mubr.msk.bf16.mxu1 %vm4377_vm0, %v4376_v28 }
 0x1db   :  { %v550_v22 = vpop.f32.mrb[8].mxu1 }
 0x1dc   :  { %v551_v25 = vadd.f32 %v3570_v20, %v550_v22  ;;  %v3875_v26 = vpop.f32.mrb[9].mxu1 }
 0x1dd   :  { %v553_v29 = vpop.f32.mrb[10].mxu1 }
 0x1de   :  { %v699_v24 = vsel %vm698_vm2, %v551_v25, -inf  ;;  %v554_v27 = vadd.f32 %v3571_v21, %v553_v29  ;;  %v3876_v30 = vpop.f32.mrb[11].mxu1 }
 0x1df   :  { %700 = vmax.xlane.f32.xlu0 %v699_v24 }
 0x1e0   :  { %v702_v32 = vsel %vm698_vm2, %v554_v27, -inf }
 0x1e3   :  { %703 = vmax.xlane.f32.xlu0 %v702_v32  ;;  %v597_v34 = vpop.f32.mrb[12].mxu1 }
 0x1e4   :  { %v598_v35 = vadd.f32 %v3574_v31, %v597_v34  ;;  %v3881_v36 = vpop.f32.mrb[13].mxu1 }
 0x1e5   :  { %v600_v37 = vpop.f32.mrb[14].mxu1 }
 0x1e6   :  { %v601_v39 = vadd.f32 %v3575_v33, %v600_v37  ;;  %v3882_v40 = vpop.f32.mrb[15].mxu1  ;;  %v705_v41 = vsel %vm698_vm2, %v598_v35, -inf }
 0x1e7   :  { %706 = vmax.xlane.f32.xlu1 %v705_v41 }
 0x1e8   :  { %v708_v43 = vsel %vm698_vm2, %v601_v39, -inf }
 0x1eb   :  { %709 = vmax.xlane.f32.xlu1 %v708_v43  ;;  %v644_v46 = vpop.f32.mrb[16].mxu1  ;;  %v3865_v43 = vpop.f32.mrb[8].mxu0 }
 0x1ec   :  { %v645_v48 = vadd.f32 %v3578_v42, %v644_v46  ;;  %v3887_v50 = vpop.f32.mrb[17].mxu1  ;;  %v450_v46 = vpop.f32.mrb[9].mxu0 }
 0x1ed   :  { %v647_v52 = vpop.f32.mrb[18].mxu1  ;;  %v3457_v50 = vld [vmem:[%s5454_s7] ss:$0 sm:$0xff]  ;;  %s4380_s7 = smov 32  }
 0x1ee   :  { %v648_v54 = vadd.f32 %v3579_v45, %v647_v52  ;;  %v711_v55 = vsel %vm698_vm2, %v645_v48, -inf  ;;  %v3888_v56 = vpop.f32.mrb[19].mxu1  ;;  %v451_v53 = vadd.f32 %v3457_v50, %v450_v46 }
 0x1ef   :  { %712 = vmax.xlane.f32.xlu0 %v711_v55 }
 0x1f0   :  { %v714_v57 = vsel %vm698_vm2, %v648_v54, -inf }
 0x1f1   :  { %715 = vmax.xlane.f32.xlu1 %v714_v57 }
 0x1f3   :  { %v691_v60 = vpop.f32.mrb[20].mxu1 }
 0x1f4   :  { %v692_v61 = vadd.f32 %v3582_v58, %v691_v60  ;;  %v3893_v62 = vpop.f32.mrb[21].mxu1 }
 0x1f5   :  { %v694_v63 = vpop.f32.mrb[22].mxu1 }
 0x1f6   :  { %v4665_v0 = vadd.f32 %v3583_v59, %v694_v63  ;;  %v3894_v2 = vpop.f32.mrb[23].mxu1  ;;  %v717_v3 = vsel %vm698_vm2, %v692_v61, -inf  ;;  %v459_v59 = vadd.f32 %v3865_v43, %v3457_v50 }
 0x1f7   :  { %718 = vmax.xlane.f32.xlu0 %v717_v3 }
 0x1f8   :  { %v720_v5 = vsel %vm698_vm2, %v4665_v0, -inf }
 0x1f9   :  { %721 = vmax.xlane.f32.xlu1 %v720_v5 }
 0x26c   :  { %v701_v7 = vpop.xlane.xlu0 %700 }
 0x26d   :  { %v723_v9 = vsub.f32 %v551_v25, %v701_v7 }
 0x26f   :  { %v731_v10 = vmul.f32 1.442695, %v723_v9 }
 0x270   :  { %v704_v11 = vpop.xlane.xlu0 %703 }
 0x271   :  { %4184 = vpow2.f32 %v731_v10  ;;  %v724_v12 = vsub.f32 %v554_v27, %v704_v11 }
 0x273   :  { %v733_v13 = vmul.f32 1.442695, %v724_v12 }
 0x274   :  { %v707_v14 = vpop.xlane.xlu1 %706 }
 0x275   :  { %4186 = vpow2.f32 %v733_v13  ;;  %v725_v15 = vsub.f32 %v598_v35, %v707_v14 }
 0x277   :  { %v735_v16 = vmul.f32 1.442695, %v725_v15 }
 0x278   :  { %v710_v17 = vpop.xlane.xlu1 %709 }
 0x279   :  { %4188 = vpow2.f32 %v735_v16  ;;  %v726_v18 = vsub.f32 %v601_v39, %v710_v17 }
 0x27b   :  { %v4670_v19 = vpop.eup %4184  ;;  %v737_v20 = vmul.f32 1.442695, %v726_v18 }
 0x27c   :  { %v713_v21 = vpop.xlane.xlu0 %712  ;;  %v747_v22 = vsel %vm698_vm2, %v4670_v19, 0.0 }
 0x27d   :  { %4190 = vpow2.f32 %v737_v20  ;;  %v727_v25 = vsub.f32 %v645_v48, %v713_v21  ;;  %748 = vadd.xlane.f32.xlu0 %v747_v22  ;;  %v3866_v48 = vpop.f32.mrb[10].mxu0 }
 0x27e   :  { %v716_v26 = vpop.xlane.xlu1 %715  ;;  %v453_v52 = vpop.f32.mrb[11].mxu0  ;;  %v462_v60 = vadd.f32 %v3866_v48, %v3457_v50 }
 0x27f   :  { %v4674_v29 = vpop.eup %4186  ;;  %v739_v23 = vmul.f32 1.442695, %v727_v25  ;;  %v728_v24 = vsub.f32 %v648_v54, %v716_v26  ;;  %v454_v54 = vadd.f32 %v3457_v50, %v453_v52  ;;  %v3869_v56 = vpop.f32.mrb[12].mxu0 }
 0x280   :  { %v750_v27 = vsel %vm698_vm2, %v4674_v29, 0.0  ;;  %v466_v57 = vpop.f32.mrb[13].mxu0  ;;  %v4707_v2 = vpack.c.bf16 %v462_v60, %v459_v59  ;;  %v475_v5 = vadd.f32 %v3869_v56, %v3457_v50 }
 0x281   :  { %4192 = vpow2.f32 %v739_v23  ;;  %v741_v30 = vmul.f32 1.442695, %v728_v24  ;;  %751 = vadd.xlane.f32.xlu1 %v750_v27  ;;  %v4701_v55 = vpack.c.bf16 %v454_v54, %v451_v53  ;;  %v3870_v58 = vpop.f32.mrb[14].mxu0  ;;  %v467_v62 = vadd.f32 %v3457_v50, %v466_v57 }
 0x282   :  { %3902 = vmatpush3.bf16.msra.mxu1 %v4707_v2  ;;  %v478_v7 = vadd.f32 %v3870_v58, %v3457_v50 }
 0x283   :  { %v4678_v31 = vpop.eup %4188  ;;  %4194 = vpow2.f32 %v741_v30  ;;  %3896 = vmatpush3.bf16.msra.mxu0 %v4701_v55  ;;  %3913 = vmatprep.subr.bf16.mxu1 %v4376_v28 }
 0x284   :  { %v719_v32 = vpop.xlane.xlu0 %718  ;;  %v753_v33 = vsel %vm698_vm2, %v4678_v31, 0.0  ;;  %3907 = vmatprep.subr.bf16.mxu0 %v4376_v28  ;;  %v4715_v9 = vpack.c.bf16 %v478_v7, %v475_v5 }
 0x285   :  { %v729_v34 = vsub.f32 %v692_v61, %v719_v32  ;;  %754 = vadd.xlane.f32.xlu0 %v753_v33  ;;  %v469_v61 = vpop.f32.mrb[15].mxu0 }
 0x286   :  { %v470_v63 = vadd.f32 %v3457_v50, %v469_v61  ;;  %v722_v10 = vpop.xlane.xlu1 %721 }
 0x287   :  { %v4682_v35 = vpop.eup %4190  ;;  %v743_v36 = vmul.f32 1.442695, %v729_v34  ;;  %v730_v11 = vsub.f32 %v4665_v0, %v722_v10 }
 0x288   :  { %v756_v37 = vsel %vm698_vm2, %v4682_v35, 0.0  ;;  %v4709_v3 = vpack.c.bf16 %v470_v63, %v467_v62 }
 0x289   :  { %4196 = vpow2.f32 %v743_v36  ;;  %757 = vadd.xlane.f32.xlu1 %v756_v37  ;;  %v745_v12 = vmul.f32 1.442695, %v730_v11 }
 0x28b   :  { %v4686_v38 = vpop.eup %4192  ;;  %4198 = vpow2.f32 %v745_v12 }
 0x28c   :  { %v759_v39 = vsel %vm698_vm2, %v4686_v38, 0.0 }
 0x28d   :  { %v4690_v40 = vpop.eup %4194  ;;  %760 = vadd.xlane.f32.xlu0 %v759_v39 }
 0x28e   :  { %v762_v41 = vsel %vm698_vm2, %v4690_v40, 0.0 }
 0x28f   :  { %763 = vadd.xlane.f32.xlu1 %v762_v41 }
 0x293   :  { %v4694_v42 = vpop.eup %4196 }
 0x294   :  { %v765_v45 = vsel %vm698_vm2, %v4694_v42, 0.0 }
 0x295   :  { %766 = vadd.xlane.f32.xlu0 %v765_v45  ;;  %v4724_v13 = vpop.eup %4198 }
 0x296   :  { %v768_v14 = vsel %vm698_vm2, %v4724_v13, 0.0 }
 0x2a0   :  { %1049 = vrot.lane.b32.xlu1 %v4573_v44, %s4378_s1 }
 0x2a4   :  { %993 = vrot.lane.b32.xlu1 %v4581_v51, %s4378_s1 }
 0x2ab   :  { %996 = vrot.lane.b32.xlu0 %v4575_v47, %s4378_s1 }
 0x2af   :  { %1046 = vrot.lane.b32.xlu0 %v4577_v49, %s4378_s1 }
 0x2b3   :  { %1099 = vrot.lane.b32.xlu0 %v4594_v8, %s4378_s1 }
 0x2c8   :  { %769 = vadd.xlane.f32.xlu1 %v768_v14 }
 0x2d9   :  { %1102 = vrot.lane.b32.xlu1 %v4586_v4, %s4378_s1 }
 0x2dd   :  { %1155 = vrot.lane.b32.xlu1 %v4584_v1, %s4378_s1 }
 0x2e1   :  { %1152 = vrot.lane.b32.xlu1 %v4588_v6, %s4378_s1 }
 0x30a   :  { %v749_v0 = vpop.xlane.xlu0 %748 }
 0x30b   :  { %4200 = vrcp.f32 %v749_v0  ;;  %v3635_v0 = vld [vmem:[%s5474_s5 + $0x8] sm:$0xff]  }
 0x30e   :  { %v752_v15 = vpop.xlane.xlu1 %751 }
 0x30f   :  { %4202 = vrcp.f32 %v752_v15 }
 0x312   :  { %v755_v16 = vpop.xlane.xlu0 %754 }
 0x313   :  { %4204 = vrcp.f32 %v755_v16  ;;  %v3586_v16 = vunpack.c.l.bf16 %v3635_v0 }
 0x315   :  { %v4201_v18 = vpop.eup %4200 }
 0x316   :  { %v758_v17 = vpop.xlane.xlu1 %757  ;;  %v779_v21 = vmul.f32 %v4201_v18, %v4670_v19 }
 0x317   :  { %4206 = vrcp.f32 %v758_v17  ;;  %v3587_v17 = vunpack.c.h.bf16 %v3635_v0 }
 0x319   :  { %v4203_v20 = vpop.eup %4202 }
 0x31a   :  { %v780_v22 = vmul.f32 %v4203_v20, %v4674_v29  ;;  %v761_v25 = vpop.xlane.xlu0 %760 }
 0x31b   :  { %4208 = vrcp.f32 %v761_v25 }
 0x31c   :  { %v787_v26 = vpack.c.bf16 %v780_v22, %v779_v21  ;;  %v764_v23 = vpop.xlane.xlu1 %763 }
 0x31d   :  { %4210 = vrcp.f32 %v764_v23  ;;  %v4205_v24 = vpop.eup %4204 }
 0x31e   :  { %3898 = vmatmul.mubr.msk.bf16.vlgmr.msra.gmra.mrb[16].mxu0 %vm698_vm2, %v787_v26  ;;  %v781_v19 = vmul.f32 %v4205_v24, %v4678_v31 }
 0x31f   :  { %3908 = vmatpush3.bf16.msra.mxu0 %v4709_v3  ;;  %3909 = vmatprep.mubr.msk.bf16.mxu0 %vm4377_vm0, %v4376_v28 }
 0x320   :  { %3919 = vmatprep.subr.bf16.mxu0 %v4376_v28  ;;  %v1050_v41 = vpop.permute.xlu1 %1049 }
 0x321   :  { %v4207_v27 = vpop.eup %4206  ;;  %v1055_v57 = vsel %vm509_vm1, %v1050_v41, 0 }
 0x322   :  { %v782_v29 = vmul.f32 %v4207_v27, %v4682_v35  ;;  %v767_v30 = vpop.xlane.xlu0 %766  ;;  %v3637_v27 = vld [vmem:[%s5474_s5 + $0x48] sm:$0xff]  }
 0x323   :  { %4212 = vrcp.f32 %v767_v30 }
 0x324   :  { %v788_v32 = vpack.c.bf16 %v782_v29, %v781_v19  ;;  %v994_v43 = vpop.permute.xlu1 %993  ;;  %v3595_v19 = vunpack.c.h.bf16 %v3637_v27 }
 0x325   :  { %v4209_v33 = vpop.eup %4208 }
 0x326   :  { %3904 = vmatmul.mubr.msk.bf16.vlgmr.msra.gmra.mrb[24].mxu1 %vm698_vm2, %v788_v32  ;;  %v783_v36 = vmul.f32 %v4209_v33, %v4686_v38  ;;  %v997_v31 = vpop.permute.xlu0 %996 }
 0x327   :  { %v4211_v34 = vpop.eup %4210  ;;  %3914 = vmatpush3.bf16.msra.mxu1 %v4715_v9  ;;  %3915 = vmatprep.mubr.msk.bf16.mxu1 %vm4377_vm0, %v4376_v28  ;;  %v1002_v35 = vsel %vm509_vm1, %v997_v31, 0 }
 0x328   :  { %v784_v37 = vmul.f32 %v4211_v34, %v4690_v40  ;;  %3925 = vmatprep.subr.bf16.mxu1 %v4376_v28 }
 0x32a   :  { %v789_v39 = vpack.c.bf16 %v784_v37, %v783_v36  ;;  %v1047_v46 = vpop.permute.xlu0 %1046 }
 0x32c   :  { %3910 = vmatmul.mubr.msk.bf16.vlgmr.msra.gmra.mrb[20].mxu0 %vm698_vm2, %v789_v39 }
 0x32d   :  { %3920 = vmatpush3.bf16.xpose.msra.mxu0 %v1002_v35  ;;  %3921 = vmatprep.mubr.msk.bf16.mxu0 %vm4377_vm0, %v4376_v28  ;;  %v4213_v48 = vpop.eup %4212  ;;  %v3636_v35 = vld [vmem:[%s5474_s5 + $0x28] sm:$0xff]  }
 0x32e   :  { %3931 = vmatprep.subr.bf16.mxu0 %v4376_v28  ;;  %v785_v52 = vmul.f32 %v4213_v48, %v4694_v42  ;;  %v1100_v53 = vpop.permute.xlu0 %1099 }
 0x334   :  { %3922 = vmatmul.mubr.msk.bf16.vlgmr.msra.gmra.mrb[24].mxu0 %vm509_vm1, %v994_v43  ;;  %v3590_v43 = vunpack.c.l.bf16 %v3636_v35 }
 0x335   :  { %3933 = vmatprep.mubr.msk.bf16.mxu0 %vm4377_vm0, %v4376_v28 }
 0x355   :  { %v770_v38 = vpop.xlane.xlu1 %769 }
 0x356   :  { %4214 = vrcp.f32 %v770_v38  ;;  %v3591_v38 = vunpack.c.h.bf16 %v3636_v35 }
 0x359   :  { %v1103_v40 = vpop.permute.xlu1 %1102 }
 0x35a   :  { %v1108_v45 = vsel %vm509_vm1, %v1103_v40, 0 }
 0x35b   :  { %3932 = vmatpush3.bf16.xpose.msra.mxu0 %v1108_v45 }
 0x35c   :  { %3943 = vmatprep.subr.bf16.mxu0 %v4376_v28 }
 0x35d   :  { %v1156_v42 = vpop.permute.xlu1 %1155 }
 0x35e   :  { %v1161_v58 = vsel %vm509_vm1, %v1156_v42, 0 }
 0x360   :  { %v4215_v50 = vpop.eup %4214 }
 0x361   :  { %v786_v54 = vmul.f32 %v4215_v50, %v4724_v13  ;;  %v1153_v59 = vpop.permute.xlu1 %1152  ;;  %v3594_v50 = vunpack.c.l.bf16 %v3637_v27 }
 0x362   :  { %3934 = vmatmul.mubr.msk.bf16.vlgmr.msra.gmra.mrb[28].mxu0 %vm509_vm1, %v1100_v53 }
 0x363   :  { %v790_v56 = vpack.c.bf16 %v786_v54, %v785_v52  ;;  %3945 = vmatprep.mubr.msk.bf16.mxu0 %vm4377_vm0, %v4376_v28 }
 0x365   :  { %3916 = vmatmul.mubr.msk.bf16.vlgmr.msra.gmra.mrb[28].mxu1 %vm698_vm2, %v790_v56  ;;  %v3638_v56 = vld [vmem:[%s5474_s5 + $0x68] sm:$0xff]  }
 0x366   :  { %3926 = vmatpush3.bf16.xpose.msra.mxu1 %v1055_v57  ;;  %3927 = vmatprep.mubr.msk.bf16.mxu1 %vm4377_vm0, %v4376_v28 }
 0x367   :  { %3937 = vmatprep.subr.bf16.mxu1 %v4376_v28 }
 0x36d   :  { %3928 = vmatmul.mubr.msk.bf16.vlgmr.msra.gmra.mrb[32].mxu1 %vm509_vm1, %v1047_v46 }
 0x36e   :  { %3938 = vmatpush3.bf16.xpose.msra.mxu1 %v1161_v58  ;;  %3939 = vmatprep.mubr.msk.bf16.mxu1 %vm4377_vm0, %v4376_v28  ;;  %v3598_v58 = vunpack.c.l.bf16 %v3638_v56 }
 0x36f   :  { %3949 = vmatprep.subr.bf16.mxu1 %v4376_v28 }
 0x375   :  { %3940 = vmatmul.mubr.msk.bf16.vlgmr.msra.gmra.mrb[36].mxu1 %vm509_vm1, %v1153_v59 }
 0x376   :  { %3951 = vmatprep.mubr.msk.bf16.mxu1 %vm4377_vm0, %v4376_v28 }
 0x3f1   :  { %v828_v60 = vpop.f32.mrb[16].mxu0 }
 0x3f2   :  { %967 = vst.msk [vmem:[#allocation2] sm:$0xff] %vm509_vm1, %v828_v60  ;;  %v3899_v61 = vpop.f32.mrb[17].mxu0 }
 0x3f3   :  { %v831_v62 = vpop.f32.mrb[18].mxu0 }
 0x3f4   :  { %968 = vst.msk [vmem:[#allocation2 + $0x8] sm:$0xff] %vm509_vm1, %v831_v62  ;;  %v3900_v63 = vpop.f32.mrb[19].mxu0 }
 0x3f9   :  { %v872_v5 = vpop.f32.mrb[24].mxu1 }
 0x3fa   :  { %969 = vst.msk [vmem:[#allocation2 + $0x10] sm:$0xff] %vm509_vm1, %v872_v5  ;;  %v3905_v7 = vpop.f32.mrb[25].mxu1 }
 0x3fb   :  { %v875_v10 = vpop.f32.mrb[26].mxu1 }
 0x3fc   :  { %970 = vst.msk [vmem:[#allocation2 + $0x18] sm:$0xff] %vm509_vm1, %v875_v10  ;;  %v3906_v11 = vpop.f32.mrb[27].mxu1  ;;  %v3599_v10 = vunpack.c.h.bf16 %v3638_v56 }
 0x3ff   :  { %v916_v12 = vpop.f32.mrb[20].mxu0 }
 0x400   :  { %971 = vst.msk [vmem:[#allocation2 + $0x20] sm:$0xff] %vm509_vm1, %v916_v12  ;;  %v3911_v13 = vpop.f32.mrb[21].mxu0 }
 0x401   :  { %v919_v14 = vpop.f32.mrb[22].mxu0 }
 0x402   :  { %972 = vst.msk [vmem:[#allocation2 + $0x28] sm:$0xff] %vm509_vm1, %v919_v14  ;;  %v3912_v15 = vpop.f32.mrb[23].mxu0 }
 0x407   :  { %v1038_v18 = vpop.f32.mrb[24].mxu0 }
 0x408   :  { %v1039_v20 = vadd.f32 %v3586_v16, %v1038_v18  ;;  %v3923_v21 = vpop.f32.mrb[25].mxu0 }
 0x409   :  { %v1041_v22 = vpop.f32.mrb[26].mxu0 }
 0x40a   :  { %v1042_v25 = vadd.f32 %v3587_v17, %v1041_v22  ;;  %v3924_v26 = vpop.f32.mrb[27].mxu0  ;;  %v1204_v23 = vsel %vm698_vm2, %v1039_v20, -inf }
 0x40b   :  { %1205 = vmax.xlane.f32.xlu0 %v1204_v23 }
 0x40c   :  { %v1207_v24 = vsel %vm698_vm2, %v1042_v25, -inf }
 0x40d   :  { %1208 = vmax.xlane.f32.xlu1 %v1207_v24 }
 0x435   :  { %v1144_v29 = vpop.f32.mrb[28].mxu0 }
 0x436   :  { %v3935_v30 = vpop.f32.mrb[29].mxu0  ;;  %v1145_v57 = vadd.f32 %v3594_v50, %v1144_v29 }
 0x437   :  { %v1147_v32 = vpop.f32.mrb[30].mxu0 }
 0x438   :  { %v4792_v33 = vadd.f32 %v3595_v19, %v1147_v32  ;;  %v960_v34 = vpop.f32.mrb[28].mxu1  ;;  %v3936_v36 = vpop.f32.mrb[31].mxu0  ;;  %v1216_v5 = vsel %vm698_vm2, %v1145_v57, -inf }
 0x439   :  { %973 = vst.msk [vmem:[#allocation2 + $0x30] sm:$0xff] %vm509_vm1, %v960_v34  ;;  %v3917_v37 = vpop.f32.mrb[29].mxu1 }
 0x43a   :  { %v963_v31 = vpop.f32.mrb[30].mxu1  ;;  %v1219_v39 = vsel %vm698_vm2, %v4792_v33, -inf }
 0x43b   :  { %974 = vst.msk [vmem:[#allocation2 + $0x38] sm:$0xff] %vm509_vm1, %v963_v31  ;;  %1220 = vmax.xlane.f32.xlu1 %v1219_v39  ;;  %v3918_v41 = vpop.f32.mrb[31].mxu1 }
 0x440   :  { %v1091_v40 = vpop.f32.mrb[32].mxu1 }
 0x441   :  { %v1092_v45 = vadd.f32 %v3590_v43, %v1091_v40  ;;  %v3929_v46 = vpop.f32.mrb[33].mxu1 }
 0x442   :  { %v1094_v48 = vpop.f32.mrb[34].mxu1 }
 0x443   :  { %v1095_v52 = vadd.f32 %v3591_v38, %v1094_v48  ;;  %v3930_v53 = vpop.f32.mrb[35].mxu1  ;;  %v1210_v54 = vsel %vm698_vm2, %v1092_v45, -inf }
 0x444   :  { %1211 = vmax.xlane.f32.xlu0 %v1210_v54 }
 0x445   :  { %v1213_v42 = vsel %vm698_vm2, %v1095_v52, -inf }
 0x448   :  { %1214 = vmax.xlane.f32.xlu0 %v1213_v42  ;;  %v1197_v59 = vpop.f32.mrb[36].mxu1 }
 0x449   :  { %v3941_v60 = vpop.f32.mrb[37].mxu1  ;;  %v1198_v62 = vadd.f32 %v3598_v58, %v1197_v59 }
 0x44a   :  { %v1200_v61 = vpop.f32.mrb[38].mxu1 }
 0x44b   :  { %v3942_v63 = vpop.f32.mrb[39].mxu1  ;;  %v1222_v7 = vsel %vm698_vm2, %v1198_v62, -inf  ;;  %v4814_v11 = vadd.f32 %v3599_v10, %v1200_v61 }
 0x44c   :  { %1345 = vrot.lane.b32.xlu1 %v4707_v2, %s4378_s1  ;;  %1217 = vmax.xlane.f32.xlu0 %v1216_v5 }
 0x44d   :  { %v1225_v12 = vsel %vm698_vm2, %v4814_v11, -inf }
 0x450   :  { %1393 = vrot.lane.b32.xlu1 %v4709_v3, %s4378_s1  ;;  %1223 = vmax.xlane.f32.xlu0 %v1222_v7 }
 0x466   :  { %1297 = vrot.lane.b32.xlu0 %v4701_v55, %s4378_s1 }
 0x474   :  { %1226 = vmax.xlane.f32.xlu1 %v1225_v12 }
 0x485   :  { %1441 = vrot.lane.b32.xlu1 %v4715_v9, %s4378_s1 }
 0x498   :  { %v1206_v13 = vpop.xlane.xlu0 %1205 }
 0x499   :  { %v1228_v14 = vsub.f32 %v1039_v20, %v1206_v13 }
 0x49a   :  { %v1209_v0 = vpop.xlane.xlu1 %1208 }
 0x49b   :  { %v1236_v15 = vmul.f32 1.442695, %v1228_v14  ;;  %v1229_v16 = vsub.f32 %v1042_v25, %v1209_v0 }
 0x49d   :  { %4216 = vpow2.f32 %v1236_v15  ;;  %v1238_v17 = vmul.f32 1.442695, %v1229_v16 }
 0x49f   :  { %4218 = vpow2.f32 %v1238_v17 }
 0x4a7   :  { %v4820_v18 = vpop.eup %4216 }
 0x4a8   :  { %v1252_v21 = vsel %vm698_vm2, %v4820_v18, 0.0 }
 0x4a9   :  { %v4824_v22 = vpop.eup %4218  ;;  %1253 = vadd.xlane.f32.xlu0 %v1252_v21 }
 0x4aa   :  { %v1255_v26 = vsel %vm698_vm2, %v4824_v22, 0.0 }
 0x4ab   :  { %1256 = vadd.xlane.f32.xlu1 %v1255_v26 }
 0x4c8   :  { %v1221_v23 = vpop.xlane.xlu1 %1220 }
 0x4c9   :  { %v1233_v27 = vsub.f32 %v4792_v33, %v1221_v23 }
 0x4cb   :  { %v1246_v32 = vmul.f32 1.442695, %v1233_v27 }
 0x4cc   :  { %v1346_v20 = vpop.permute.xlu1 %1345 }
 0x4cd   :  { %3950 = vmatpush3.bf16.msra.mxu1 %v1346_v20 }
 0x4ce   :  { %3961 = vmatprep.subr.bf16.mxu1 %v4376_v28 }
 0x4d0   :  { %v1394_v56 = vpop.permute.xlu1 %1393 }
 0x4d1   :  { %v1212_v25 = vpop.xlane.xlu0 %1211 }
 0x4d2   :  { %v1230_v24 = vsub.f32 %v1092_v45, %v1212_v25 }
 0x4d4   :  { %v1240_v19 = vmul.f32 1.442695, %v1230_v24 }
 0x4d5   :  { %v1215_v29 = vpop.xlane.xlu0 %1214 }
 0x4d6   :  { %4220 = vpow2.f32 %v1240_v19  ;;  %v1231_v30 = vsub.f32 %v1095_v52, %v1215_v29 }
 0x4d8   :  { %v1242_v34 = vmul.f32 1.442695, %v1231_v30 }
 0x4d9   :  { %v1218_v36 = vpop.xlane.xlu0 %1217 }
 0x4da   :  { %4222 = vpow2.f32 %v1242_v34  ;;  %v1232_v37 = vsub.f32 %v1145_v57, %v1218_v36 }
 0x4db   :  { %4224 = vpow2.f32 %v1246_v32 }
 0x4dc   :  { %v1244_v31 = vmul.f32 1.442695, %v1232_v37 }
 0x4dd   :  { %v1224_v39 = vpop.xlane.xlu0 %1223 }
 0x4de   :  { %4226 = vpow2.f32 %v1244_v31  ;;  %v1234_v35 = vsub.f32 %v1198_v62, %v1224_v39 }
 0x4e0   :  { %v4221_v41 = vpop.eup %4220  ;;  %v1248_v43 = vmul.f32 1.442695, %v1234_v35 }
 0x4e1   :  { %v1298_v38 = vpop.permute.xlu0 %1297  ;;  %v1258_v40 = vsel %vm698_vm2, %v4221_v41, 0.0 }
 0x4e2   :  { %4228 = vpow2.f32 %v1248_v43  ;;  %1259 = vadd.xlane.f32.xlu0 %v1258_v40  ;;  %3944 = vmatpush3.bf16.msra.mxu0 %v1298_v38 }
 0x4e3   :  { %3955 = vmatprep.subr.bf16.mxu0 %v4376_v28 }
 0x4e4   :  { %v4223_v33 = vpop.eup %4222 }
 0x4e5   :  { %v1261_v45 = vsel %vm698_vm2, %v4223_v33, 0.0  ;;  %v4225_v46 = vpop.eup %4224 }
 0x4e6   :  { %1262 = vadd.xlane.f32.xlu1 %v1261_v45  ;;  %v1267_v52 = vsel %vm698_vm2, %v4225_v46, 0.0 }
 0x4e8   :  { %v4227_v48 = vpop.eup %4226 }
 0x4e9   :  { %v1264_v50 = vsel %vm698_vm2, %v4227_v48, 0.0 }
 0x4ea   :  { %1265 = vadd.xlane.f32.xlu0 %v1264_v50  ;;  %1268 = vadd.xlane.f32.xlu1 %v1267_v52 }
 0x4ec   :  { %v4835_v53 = vpop.eup %4228 }
 0x4ed   :  { %v1270_v54 = vsel %vm698_vm2, %v4835_v53, 0.0 }
 0x4ee   :  { %1271 = vadd.xlane.f32.xlu0 %v1270_v54 }
 0x4fb   :  { %1599 = vrot.lane.b32.xlu1 %v4573_v44, %s4379_s3 }
 0x501   :  { %v1227_v57 = vpop.xlane.xlu1 %1226 }
 0x502   :  { %v1235_v42 = vsub.f32 %v4814_v11, %v1227_v57 }
 0x504   :  { %1548 = vrot.lane.b32.xlu0 %v4575_v47, %s4379_s3  ;;  %v1250_v58 = vmul.f32 1.442695, %v1235_v42 }
 0x505   :  { %v1442_v61 = vpop.permute.xlu1 %1441 }
 0x506   :  { %4230 = vpow2.f32 %v1250_v58 }
 0x508   :  { %1546 = vrot.lane.b32.xlu0 %v4581_v51, %s4379_s3 }
 0x50c   :  { %1597 = vrot.lane.b32.xlu0 %v4577_v49, %s4379_s3 }
 0x510   :  { %1648 = vrot.lane.b32.xlu0 %v4594_v8, %s4379_s3  ;;  %v4850_v59 = vpop.eup %4230 }
 0x511   :  { %v1273_v60 = vsel %vm698_vm2, %v4850_v59, 0.0 }
 0x51f   :  { %1274 = vadd.xlane.f32.xlu1 %v1273_v60 }
 0x530   :  { %1650 = vrot.lane.b32.xlu1 %v4586_v4, %s4379_s3 }
 0x534   :  { %1701 = vrot.lane.b32.xlu1 %v4584_v1, %s4379_s3 }
 0x536   :  { %v1254_v62 = vpop.xlane.xlu0 %1253 }
 0x537   :  { %4232 = vrcp.f32 %v1254_v62  ;;  %v3639_v62 = vld [vmem:[%s5474_s5 + $0x10] sm:$0xff]  }
 0x538   :  { %1699 = vrot.lane.b32.xlu1 %v4588_v6, %s4379_s3  ;;  %v1257_v63 = vpop.xlane.xlu1 %1256 }
 0x539   :  { %4234 = vrcp.f32 %v1257_v63 }
 0x541   :  { %v4233_v5 = vpop.eup %4232 }
 0x542   :  { %v1284_v10 = vmul.f32 %v4233_v5, %v4820_v18  ;;  %v3602_v5 = vunpack.c.l.bf16 %v3639_v62 }
 0x543   :  { %v4235_v7 = vpop.eup %4234 }
 0x544   :  { %v1285_v11 = vmul.f32 %v4235_v7, %v4824_v22  ;;  %v3603_v7 = vunpack.c.h.bf16 %v3639_v62 }
 0x546   :  { %v1292_v12 = vpack.c.bf16 %v1285_v11, %v1284_v10 }
 0x548   :  { %3946 = vmatmul.mubr.msk.bf16.vlgmr.msra.gmra.mrb[32].mxu0 %vm698_vm2, %v1292_v12 }
 0x549   :  { %3956 = vmatpush3.bf16.msra.mxu0 %v1394_v56  ;;  %3957 = vmatprep.mubr.msk.bf16.mxu0 %vm4377_vm0, %v4376_v28 }
 0x54a   :  { %3967 = vmatprep.subr.bf16.mxu0 %v4376_v28 }
 0x56f   :  { %v1260_v13 = vpop.xlane.xlu0 %1259 }
 0x570   :  { %4236 = vrcp.f32 %v1260_v13 }
 0x573   :  { %v1263_v14 = vpop.xlane.xlu1 %1262 }
 0x574   :  { %4238 = vrcp.f32 %v1263_v14 }
 0x577   :  { %v1266_v0 = vpop.xlane.xlu0 %1265  ;;  %v1269_v15 = vpop.xlane.xlu1 %1268 }
 0x578   :  { %4240 = vrcp.f32 %v1266_v0 }
 0x579   :  { %4242 = vrcp.f32 %v1269_v15 }
 0x57a   :  { %v4237_v16 = vpop.eup %4236 }
 0x57b   :  { %v1286_v18 = vmul.f32 %v4237_v16, %v4221_v41  ;;  %v1272_v22 = vpop.xlane.xlu0 %1271  ;;  %v1600_v32 = vpop.permute.xlu1 %1599 }
 0x57c   :  { %4244 = vrcp.f32 %v1272_v22 }
 0x57e   :  { %v4239_v17 = vpop.eup %4238 }
 0x57f   :  { %v1287_v21 = vmul.f32 %v4239_v17, %v4223_v33  ;;  %v1549_v27 = vpop.permute.xlu0 %1548  ;;  %v1605_v33 = vsel %vm509_vm1, %v1600_v32, 0  ;;  %v3641_v17 = vld [vmem:[%s5474_s5 + $0x50] sm:$0xff]  }
 0x580   :  { %v1554_v29 = vsel %vm509_vm1, %v1549_v27, 0 }
 0x581   :  { %v1293_v26 = vpack.c.bf16 %v1287_v21, %v1286_v18  ;;  %v3611_v18 = vunpack.c.h.bf16 %v3641_v17 }
 0x582   :  { %v4241_v23 = vpop.eup %4240 }
 0x583   :  { %v4243_v20 = vpop.eup %4242  ;;  %v1288_v25 = vmul.f32 %v4241_v23, %v4227_v48  ;;  %3952 = vmatmul.mubr.msk.bf16.vlgmr.msra.gmra.mrb[40].mxu1 %vm698_vm2, %v1293_v26  ;;  %v1547_v30 = vpop.permute.xlu0 %1546 }
 0x584   :  { %v1289_v24 = vmul.f32 %v4243_v20, %v4225_v46  ;;  %3962 = vmatpush3.bf16.msra.mxu1 %v1442_v61  ;;  %3963 = vmatprep.mubr.msk.bf16.mxu1 %vm4377_vm0, %v4376_v28 }
 0x585   :  { %3973 = vmatprep.subr.bf16.mxu1 %v4376_v28 }
 0x586   :  { %v1294_v19 = vpack.c.bf16 %v1289_v24, %v1288_v25  ;;  %v4245_v39 = vpop.eup %4244 }
 0x587   :  { %v1598_v31 = vpop.permute.xlu0 %1597  ;;  %v1290_v41 = vmul.f32 %v4245_v39, %v4835_v53 }
 0x588   :  { %3958 = vmatmul.mubr.msk.bf16.vlgmr.msra.gmra.mrb[36].mxu0 %vm698_vm2, %v1294_v19 }
 0x589   :  { %3968 = vmatpush3.bf16.xpose.msra.mxu0 %v1554_v29  ;;  %3969 = vmatprep.mubr.msk.bf16.mxu0 %vm4377_vm0, %v4376_v28  ;;  %v3640_v29 = vld [vmem:[%s5474_s5 + $0x30] sm:$0xff]  }
 0x58a   :  { %3979 = vmatprep.subr.bf16.mxu0 %v4376_v28  ;;  %v3606_v32 = vunpack.c.l.bf16 %v3640_v29 }
 0x58b   :  { %v1649_v43 = vpop.permute.xlu0 %1648 }
 0x590   :  { %3970 = vmatmul.mubr.msk.bf16.vlgmr.msra.gmra.mrb[40].mxu0 %vm509_vm1, %v1547_v30 }
 0x591   :  { %3981 = vmatprep.mubr.msk.bf16.mxu0 %vm4377_vm0, %v4376_v28 }
 0x5ac   :  { %v1275_v34 = vpop.xlane.xlu1 %1274 }
 0x5ad   :  { %4246 = vrcp.f32 %v1275_v34  ;;  %v3607_v34 = vunpack.c.h.bf16 %v3640_v29 }
 0x5b0   :  { %v1651_v36 = vpop.permute.xlu1 %1650 }
 0x5b1   :  { %v1656_v37 = vsel %vm509_vm1, %v1651_v36, 0 }
 0x5b2   :  { %3980 = vmatpush3.bf16.xpose.msra.mxu0 %v1656_v37 }
 0x5b3   :  { %3991 = vmatprep.subr.bf16.mxu0 %v4376_v28 }
 0x5b4   :  { %v1702_v45 = vpop.permute.xlu1 %1701 }
 0x5b5   :  { %v1707_v46 = vsel %vm509_vm1, %v1702_v45, 0 }
 0x5b7   :  { %v4247_v35 = vpop.eup %4246 }
 0x5b8   :  { %v1291_v38 = vmul.f32 %v4247_v35, %v4850_v59  ;;  %v1700_v48 = vpop.permute.xlu1 %1699  ;;  %v3610_v35 = vunpack.c.l.bf16 %v3641_v17 }
 0x5b9   :  { %3982 = vmatmul.mubr.msk.bf16.vlgmr.msra.gmra.mrb[44].mxu0 %vm509_vm1, %v1649_v43 }
 0x5ba   :  { %v1295_v40 = vpack.c.bf16 %v1291_v38, %v1290_v41  ;;  %3993 = vmatprep.mubr.msk.bf16.mxu0 %vm4377_vm0, %v4376_v28 }
 0x5bc   :  { %3964 = vmatmul.mubr.msk.bf16.vlgmr.msra.gmra.mrb[44].mxu1 %vm698_vm2, %v1295_v40  ;;  %v3642_v40 = vld [vmem:[%s5474_s5 + $0x70] sm:$0xff]  }
 0x5bd   :  { %3974 = vmatpush3.bf16.xpose.msra.mxu1 %v1605_v33  ;;  %3975 = vmatprep.mubr.msk.bf16.mxu1 %vm4377_vm0, %v4376_v28 }
 0x5be   :  { %3985 = vmatprep.subr.bf16.mxu1 %v4376_v28 }
 0x5c4   :  { %3976 = vmatmul.mubr.msk.bf16.vlgmr.msra.gmra.mrb[48].mxu1 %vm509_vm1, %v1598_v31 }
 0x5c5   :  { %3986 = vmatpush3.bf16.xpose.msra.mxu1 %v1707_v46  ;;  %3987 = vmatprep.mubr.msk.bf16.mxu1 %vm4377_vm0, %v4376_v28  ;;  %v3614_v46 = vunpack.c.l.bf16 %v3642_v40 }
 0x5c6   :  { %3997 = vmatprep.subr.bf16.mxu1 %v4376_v28 }
 0x5cc   :  { %3988 = vmatmul.mubr.msk.bf16.vlgmr.msra.gmra.mrb[52].mxu1 %vm509_vm1, %v1700_v48  ;;  %v3615_v48 = vunpack.c.h.bf16 %v3642_v40 }
 0x5cd   :  { %3999 = vmatprep.mubr.msk.bf16.mxu1 %vm4377_vm0, %v4376_v28 }
 0x61b   :  { %v4898_v50 = vpop.f32.mrb[32].mxu0 }
 0x61c   :  { %v3947_v52 = vpop.f32.mrb[33].mxu0 }
 0x61d   :  { %v4900_v53 = vpop.f32.mrb[34].mxu0 }
 0x61e   :  { %v3948_v54 = vpop.f32.mrb[35].mxu0 }
 0x656   :  { %v4902_v56 = vpop.f32.mrb[40].mxu1 }
 0x657   :  { %v3953_v57 = vpop.f32.mrb[41].mxu1 }
 0x658   :  { %v4904_v42 = vpop.f32.mrb[42].mxu1 }
 0x659   :  { %v3954_v58 = vpop.f32.mrb[43].mxu1 }
 0x65b   :  { %v4906_v59 = vpop.f32.mrb[36].mxu0 }
 0x65c   :  { %v3959_v60 = vpop.f32.mrb[37].mxu0 }
 0x65d   :  { %v4908_v61 = vpop.f32.mrb[38].mxu0 }
 0x65e   :  { %v3960_v63 = vpop.f32.mrb[39].mxu0 }
 0x663   :  { %v1590_v10 = vpop.f32.mrb[40].mxu0 }
 0x664   :  { %v1591_v11 = vadd.f32 %v3602_v5, %v1590_v10  ;;  %v3971_v12 = vpop.f32.mrb[41].mxu0 }
 0x665   :  { %v1593_v13 = vpop.f32.mrb[42].mxu0 }
 0x666   :  { %v1594_v14 = vadd.f32 %v3603_v7, %v1593_v13  ;;  %v3972_v0 = vpop.f32.mrb[43].mxu0  ;;  %v1750_v15 = vsel %vm698_vm2, %v1591_v11, -inf }
 0x667   :  { %1751 = vmax.xlane.f32.xlu0 %v1750_v15 }
 0x668   :  { %v1753_v16 = vsel %vm698_vm2, %v1594_v14, -inf }
 0x669   :  { %1754 = vmax.xlane.f32.xlu1 %v1753_v16 }
 0x68c   :  { %v1692_v21 = vpop.f32.mrb[44].mxu0 }
 0x68d   :  { %v3983_v22 = vpop.f32.mrb[45].mxu0  ;;  %v1693_v33 = vadd.f32 %v3610_v35, %v1692_v21 }
 0x68e   :  { %v1695_v26 = vpop.f32.mrb[46].mxu0 }
 0x68f   :  { %v4918_v23 = vadd.f32 %v3611_v18, %v1695_v26  ;;  %v4920_v20 = vpop.f32.mrb[44].mxu1  ;;  %v3984_v25 = vpop.f32.mrb[47].mxu0  ;;  %v1762_v63 = vsel %vm698_vm2, %v1693_v33, -inf }
 0x690   :  { %v3965_v24 = vpop.f32.mrb[45].mxu1 }
 0x691   :  { %v4922_v27 = vpop.f32.mrb[46].mxu1  ;;  %v1765_v19 = vsel %vm698_vm2, %v4918_v23, -inf }
 0x692   :  { %1766 = vmax.xlane.f32.xlu1 %v1765_v19  ;;  %v3966_v30 = vpop.f32.mrb[47].mxu1 }
 0x697   :  { %v1641_v36 = vpop.f32.mrb[48].mxu1 }
 0x698   :  { %v1642_v37 = vadd.f32 %v3606_v32, %v1641_v36  ;;  %v3977_v31 = vpop.f32.mrb[49].mxu1 }
 0x699   :  { %v1644_v39 = vpop.f32.mrb[50].mxu1 }
 0x69a   :  { %v1645_v41 = vadd.f32 %v3607_v34, %v1644_v39  ;;  %v3978_v43 = vpop.f32.mrb[51].mxu1  ;;  %v1756_v38 = vsel %vm698_vm2, %v1642_v37, -inf }
 0x69b   :  { %1757 = vmax.xlane.f32.xlu0 %v1756_v38 }
 0x69c   :  { %v1759_v45 = vsel %vm698_vm2, %v1645_v41, -inf }
 0x69f   :  { %1760 = vmax.xlane.f32.xlu0 %v1759_v45  ;;  %v1743_v52 = vpop.f32.mrb[52].mxu1 }
 0x6a0   :  { %v3989_v54 = vpop.f32.mrb[53].mxu1  ;;  %v1744_v58 = vadd.f32 %v3614_v46, %v1743_v52 }
 0x6a1   :  { %v1746_v57 = vpop.f32.mrb[54].mxu1 }
 0x6a2   :  { %v1747_v60 = vadd.f32 %v3615_v48, %v1746_v57  ;;  %v3990_v62 = vpop.f32.mrb[55].mxu1  ;;  %v1768_v7 = vsel %vm698_vm2, %v1744_v58, -inf }
 0x6a3   :  { %1763 = vmax.xlane.f32.xlu0 %v1762_v63 }
 0x6a4   :  { %v1771_v5 = vsel %vm698_vm2, %v1747_v60, -inf }
 0x6a5   :  { %1772 = vmax.xlane.f32.xlu1 %v1771_v5 }
 0x6a7   :  { %1769 = vmax.xlane.f32.xlu0 %v1768_v7 }
 0x6b6   :  { %1889 = vrot.lane.b32.xlu1 %v4707_v2, %s4379_s3 }
 0x6ba   :  { %1936 = vrot.lane.b32.xlu1 %v4709_v3, %s4379_s3 }
 0x6bd   :  { %1842 = vrot.lane.b32.xlu0 %v4701_v55, %s4379_s3 }
 0x6be   :  { %1983 = vrot.lane.b32.xlu1 %v4715_v9, %s4379_s3 }
 0x6f4   :  { %v1752_v10 = vpop.xlane.xlu0 %1751 }
 0x6f5   :  { %v1774_v12 = vsub.f32 %v1591_v11, %v1752_v10 }
 0x6f6   :  { %v1755_v13 = vpop.xlane.xlu1 %1754 }
 0x6f7   :  { %v1782_v0 = vmul.f32 1.442695, %v1774_v12  ;;  %v1775_v15 = vsub.f32 %v1594_v14, %v1755_v13 }
 0x6f9   :  { %4248 = vpow2.f32 %v1782_v0  ;;  %v1784_v16 = vmul.f32 1.442695, %v1775_v15 }
 0x6fb   :  { %4250 = vpow2.f32 %v1784_v16 }
 0x703   :  { %v4945_v17 = vpop.eup %4248 }
 0x704   :  { %v1798_v18 = vsel %vm698_vm2, %v4945_v17, 0.0 }
 0x705   :  { %v4949_v21 = vpop.eup %4250  ;;  %1799 = vadd.xlane.f32.xlu0 %v1798_v18 }
 0x706   :  { %v1801_v22 = vsel %vm698_vm2, %v4949_v21, 0.0 }
 0x707   :  { %1802 = vadd.xlane.f32.xlu1 %v1801_v22 }
 0x71f   :  { %v1767_v26 = vpop.xlane.xlu1 %1766 }
 0x720   :  { %v1779_v14 = vsub.f32 %v4918_v23, %v1767_v26 }
 0x722   :  { %v1792_v30 = vmul.f32 1.442695, %v1779_v14 }
 0x728   :  { %v1758_v11 = vpop.xlane.xlu0 %1757 }
 0x729   :  { %v1776_v25 = vsub.f32 %v1642_v37, %v1758_v11 }
 0x72b   :  { %v1786_v24 = vmul.f32 1.442695, %v1776_v25 }
 0x72c   :  { %v1761_v19 = vpop.xlane.xlu0 %1760 }
 0x72d   :  { %4252 = vpow2.f32 %v1786_v24  ;;  %v1777_v29 = vsub.f32 %v1645_v41, %v1761_v19 }
 0x72f   :  { %v1788_v32 = vmul.f32 1.442695, %v1777_v29 }
 0x730   :  { %v1764_v34 = vpop.xlane.xlu0 %1763 }
 0x731   :  { %4254 = vpow2.f32 %v1788_v32  ;;  %v1778_v36 = vsub.f32 %v1693_v33, %v1764_v34 }
 0x732   :  { %v1773_v31 = vpop.xlane.xlu1 %1772  ;;  %4256 = vpow2.f32 %v1792_v30 }
 0x733   :  { %v1790_v39 = vmul.f32 1.442695, %v1778_v36  ;;  %v1781_v35 = vsub.f32 %v1747_v60, %v1773_v31 }
 0x734   :  { %v1770_v43 = vpop.xlane.xlu0 %1769 }
 0x735   :  { %4258 = vpow2.f32 %v1790_v39  ;;  %v1796_v38 = vmul.f32 1.442695, %v1781_v35  ;;  %v1780_v40 = vsub.f32 %v1744_v58, %v1770_v43 }
 0x736   :  { %v1890_v37 = vpop.permute.xlu1 %1889 }
 0x737   :  { %v4954_v45 = vpop.eup %4252  ;;  %4260 = vpow2.f32 %v1796_v38  ;;  %v1794_v23 = vmul.f32 1.442695, %v1780_v40  ;;  %3998 = vmatpush3.bf16.msra.mxu1 %v1890_v37 }
 0x738   :  { %v1843_v41 = vpop.permute.xlu0 %1842  ;;  %v1804_v46 = vsel %vm698_vm2, %v4954_v45, 0.0  ;;  %4009 = vmatprep.subr.bf16.mxu1 %v4376_v28 }
 0x739   :  { %4262 = vpow2.f32 %v1794_v23  ;;  %1805 = vadd.xlane.f32.xlu0 %v1804_v46  ;;  %3992 = vmatpush3.bf16.msra.mxu0 %v1843_v41 }
 0x73a   :  { %4003 = vmatprep.subr.bf16.mxu0 %v4376_v28 }
 0x73b   :  { %v4255_v33 = vpop.eup %4254 }
 0x73c   :  { %v1807_v48 = vsel %vm698_vm2, %v4255_v33, 0.0  ;;  %v4257_v52 = vpop.eup %4256 }
 0x73d   :  { %1808 = vadd.xlane.f32.xlu1 %v1807_v48  ;;  %v1813_v58 = vsel %vm698_vm2, %v4257_v52, 0.0 }
 0x73f   :  { %v4259_v54 = vpop.eup %4258 }
 0x740   :  { %v1810_v57 = vsel %vm698_vm2, %v4259_v54, 0.0 }
 0x741   :  { %v4963_v60 = vpop.eup %4260  ;;  %1811 = vadd.xlane.f32.xlu0 %v1810_v57  ;;  %1814 = vadd.xlane.f32.xlu1 %v1813_v58 }
 0x742   :  { %v1819_v5 = vsel %vm698_vm2, %v4963_v60, 0.0 }
 0x743   :  { %v4263_v62 = vpop.eup %4262 }
 0x744   :  { %v1816_v63 = vsel %vm698_vm2, %v4263_v62, 0.0 }
 0x745   :  { %1817 = vadd.xlane.f32.xlu0 %v1816_v63  ;;  %1820 = vadd.xlane.f32.xlu1 %v1819_v5 }
 0x756   :  { %2141 = vrot.lane.b32.xlu1 %v4573_v44, %s4380_s7  ;;  %v1937_v44 = vpop.permute.xlu1 %1936 }
 0x75a   :  { %2139 = vrot.lane.b32.xlu1 %v4577_v49, %s4380_s7  ;;  %v1984_v49 = vpop.permute.xlu1 %1983 }
 0x75b   :  { %2090 = vrot.lane.b32.xlu0 %v4575_v47, %s4380_s7 }
 0x75e   :  { %2243 = vrot.lane.b32.xlu1 %v4584_v1, %s4380_s7 }
 0x75f   :  { %2088 = vrot.lane.b32.xlu0 %v4581_v51, %s4380_s7 }
 0x762   :  { %2241 = vrot.lane.b32.xlu1 %v4588_v6, %s4380_s7 }
 0x763   :  { %2192 = vrot.lane.b32.xlu0 %v4586_v4, %s4380_s7 }
 0x767   :  { %2190 = vrot.lane.b32.xlu0 %v4594_v8, %s4380_s7 }
 0x792   :  { %v1800_v7 = vpop.xlane.xlu0 %1799 }
 0x793   :  { %4264 = vrcp.f32 %v1800_v7  ;;  %v3643_v7 = vld [vmem:[%s5474_s5 + $0x18] sm:$0xff]  }
 0x794   :  { %v1803_v47 = vpop.xlane.xlu1 %1802 }
 0x795   :  { %4266 = vrcp.f32 %v1803_v47 }
 0x79d   :  { %v4265_v10 = vpop.eup %4264 }
 0x79e   :  { %v1830_v12 = vmul.f32 %v4265_v10, %v4945_v17 }
 0x79f   :  { %v4267_v1 = vpop.eup %4266 }
 0x7a0   :  { %v1831_v51 = vmul.f32 %v4267_v1, %v4949_v21 }
 0x7a2   :  { %v1838_v13 = vpack.c.bf16 %v1831_v51, %v1830_v12  ;;  %v3618_v12 = vunpack.c.l.bf16 %v3643_v7 }
 0x7a4   :  { %3994 = vmatmul.mubr.msk.bf16.vlgmr.msra.gmra.mrb[48].mxu0 %vm698_vm2, %v1838_v13  ;;  %v3644_v13 = vld [vmem:[%s5474_s5 + $0x38] sm:$0xff]  }
 0x7a5   :  { %4004 = vmatpush3.bf16.msra.mxu0 %v1937_v44  ;;  %4005 = vmatprep.mubr.msk.bf16.mxu0 %vm4377_vm0, %v4376_v28 }
 0x7a6   :  { %4015 = vmatprep.subr.bf16.mxu0 %v4376_v28 }
 0x7c6   :  { %v1806_v4 = vpop.xlane.xlu0 %1805 }
 0x7c7   :  { %4268 = vrcp.f32 %v1806_v4 }
 0x7ca   :  { %v1809_v6 = vpop.xlane.xlu1 %1808 }
 0x7cb   :  { %4270 = vrcp.f32 %v1809_v6  ;;  %v3619_v6 = vunpack.c.h.bf16 %v3643_v7 }
 0x7ce   :  { %v1812_v8 = vpop.xlane.xlu0 %1811  ;;  %v1815_v0 = vpop.xlane.xlu1 %1814 }
 0x7cf   :  { %4272 = vrcp.f32 %v1812_v8 }
 0x7d0   :  { %4274 = vrcp.f32 %v1815_v0 }
 0x7d1   :  { %v4269_v17 = vpop.eup %4268 }
 0x7d2   :  { %v1818_v15 = vpop.xlane.xlu0 %1817  ;;  %v1821_v16 = vpop.xlane.xlu1 %1820  ;;  %v1832_v21 = vmul.f32 %v4269_v17, %v4954_v45 }
 0x7d3   :  { %4276 = vrcp.f32 %v1818_v15 }
 0x7d4   :  { %4278 = vrcp.f32 %v1821_v16  ;;  %v3622_v16 = vunpack.c.l.bf16 %v3644_v13 }
 0x7d5   :  { %v4271_v18 = vpop.eup %4270 }
 0x7d6   :  { %v1833_v22 = vmul.f32 %v4271_v18, %v4255_v33  ;;  %v2091_v26 = vpop.permute.xlu0 %2090  ;;  %v2142_v29 = vpop.permute.xlu1 %2141 }
 0x7d7   :  { %v2096_v35 = vsel %vm509_vm1, %v2091_v26, 0  ;;  %v2147_v40 = vsel %vm509_vm1, %v2142_v29, 0  ;;  %v3623_v26 = vunpack.c.h.bf16 %v3644_v13 }
 0x7d8   :  { %v1839_v11 = vpack.c.bf16 %v1833_v22, %v1832_v21 }
 0x7d9   :  { %v4273_v25 = vpop.eup %4272 }
 0x7da   :  { %v4275_v14 = vpop.eup %4274  ;;  %v1834_v24 = vmul.f32 %v4273_v25, %v4259_v54  ;;  %4000 = vmatmul.mubr.msk.bf16.vlgmr.msra.gmra.mrb[56].mxu1 %vm698_vm2, %v1839_v11  ;;  %v2089_v31 = vpop.permute.xlu0 %2088  ;;  %v3645_v25 = vld [vmem:[%s5474_s5 + $0x58] sm:$0xff]  }
 0x7db   :  { %v1835_v19 = vmul.f32 %v4275_v14, %v4257_v52  ;;  %4010 = vmatpush3.bf16.msra.mxu1 %v1984_v49  ;;  %4011 = vmatprep.mubr.msk.bf16.mxu1 %vm4377_vm0, %v4376_v28  ;;  %v2140_v38 = vpop.permute.xlu1 %2139 }
 0x7dc   :  { %4021 = vmatprep.subr.bf16.mxu1 %v4376_v28 }
 0x7dd   :  { %v4277_v30 = vpop.eup %4276  ;;  %v1840_v32 = vpack.c.bf16 %v1835_v19, %v1834_v24 }
 0x7de   :  { %v4279_v34 = vpop.eup %4278  ;;  %v1836_v36 = vmul.f32 %v4277_v30, %v4263_v62  ;;  %v2193_v37 = vpop.permute.xlu0 %2192 }
 0x7df   :  { %v1837_v39 = vmul.f32 %v4279_v34, %v4963_v60  ;;  %4006 = vmatmul.mubr.msk.bf16.vlgmr.msra.gmra.mrb[52].mxu0 %vm698_vm2, %v1840_v32  ;;  %v2198_v45 = vsel %vm509_vm1, %v2193_v37, 0  ;;  %v2244_v23 = vpop.permute.xlu1 %2243  ;;  %v3626_v34 = vunpack.c.l.bf16 %v3645_v25 }
 0x7e0   :  { %4016 = vmatpush3.bf16.xpose.msra.mxu0 %v2096_v35  ;;  %4017 = vmatprep.mubr.msk.bf16.mxu0 %vm4377_vm0, %v4376_v28  ;;  %v2249_v41 = vsel %vm509_vm1, %v2244_v23, 0 }
 0x7e1   :  { %v1841_v43 = vpack.c.bf16 %v1837_v39, %v1836_v36  ;;  %4027 = vmatprep.subr.bf16.mxu0 %v4376_v28  ;;  %v3646_v39 = vld [vmem:[%s5474_s5 + $0x78] sm:$0xff]  }
 0x7e2   :  { %v2191_v46 = vpop.permute.xlu0 %2190 }
 0x7e3   :  { %4012 = vmatmul.mubr.msk.bf16.vlgmr.msra.gmra.mrb[60].mxu1 %vm698_vm2, %v1841_v43  ;;  %v2242_v33 = vpop.permute.xlu1 %2241 }
 0x7e4   :  { %4022 = vmatpush3.bf16.xpose.msra.mxu1 %v2147_v40  ;;  %4023 = vmatprep.mubr.msk.bf16.mxu1 %vm4377_vm0, %v4376_v28  ;;  %v3630_v40 = vunpack.c.l.bf16 %v3646_v39 }
 0x7e5   :  { %4033 = vmatprep.subr.bf16.mxu1 %v4376_v28 }
 0x7e7   :  { %4018 = vmatmul.mubr.msk.bf16.vlgmr.msra.gmra.mrb[56].mxu0 %vm509_vm1, %v2089_v31  ;;  %v3627_v31 = vunpack.c.h.bf16 %v3645_v25 }
 0x7e8   :  { %4028 = vmatpush3.bf16.xpose.msra.mxu0 %v2198_v45  ;;  %4029 = vmatprep.mubr.msk.bf16.mxu0 %vm4377_vm0, %v4376_v28 }
 0x7e9   :  { %4039 = vmatprep.subr.bf16.mxu0 %v4376_v28 }
 0x7eb   :  { %4024 = vmatmul.mubr.msk.bf16.vlgmr.msra.gmra.mrb[64].mxu1 %vm509_vm1, %v2140_v38 }
 0x7ec   :  { %4034 = vmatpush3.bf16.xpose.msra.mxu1 %v2249_v41  ;;  %4035 = vmatprep.mubr.msk.bf16.mxu1 %vm4377_vm0, %v4376_v28 }
 0x7ed   :  { %4045 = vmatprep.subr.bf16.mxu1 %v4376_v28 }
 0x7ef   :  { %4030 = vmatmul.mubr.msk.bf16.vlgmr.msra.gmra.mrb[60].mxu0 %vm509_vm1, %v2191_v46  ;;  %v3631_v46 = vunpack.c.h.bf16 %v3646_v39 }
 0x7f0   :  { %4041 = vmatprep.mubr.msk.bf16.mxu0 %vm4377_vm0, %v4376_v28 }
 0x7f3   :  { %4036 = vmatmul.mubr.msk.bf16.vlgmr.msra.gmra.mrb[68].mxu1 %vm509_vm1, %v2242_v33 }
 0x7f4   :  { %4047 = vmatprep.mubr.msk.bf16.mxu1 %vm4377_vm0, %v4376_v28 }
 0x877   :  { %v5022_v48 = vpop.f32.mrb[48].mxu0 }
 0x878   :  { %v3995_v52 = vpop.f32.mrb[49].mxu0 }
 0x879   :  { %v5024_v54 = vpop.f32.mrb[50].mxu0 }
 0x87a   :  { %v3996_v57 = vpop.f32.mrb[51].mxu0 }
 0x8ad   :  { %v5026_v58 = vpop.f32.mrb[56].mxu1 }
 0x8ae   :  { %v4001_v60 = vpop.f32.mrb[57].mxu1 }
 0x8af   :  { %v5028_v62 = vpop.f32.mrb[58].mxu1 }
 0x8b0   :  { %v4002_v63 = vpop.f32.mrb[59].mxu1 }
 0x8b2   :  { %v5030_v5 = vpop.f32.mrb[52].mxu0 }
 0x8b3   :  { %v4007_v44 = vpop.f32.mrb[53].mxu0 }
 0x8b4   :  { %v5032_v49 = vpop.f32.mrb[54].mxu0 }
 0x8b5   :  { %v4008_v47 = vpop.f32.mrb[55].mxu0 }
 0x8b6   :  { %v5037_v10 = vpop.f32.mrb[60].mxu1 }
 0x8b7   :  { %v4013_v1 = vpop.f32.mrb[61].mxu1 }
 0x8b8   :  { %v5039_v51 = vpop.f32.mrb[62].mxu1 }
 0x8b9   :  { %v4014_v4 = vpop.f32.mrb[63].mxu1 }
 0x8ba   :  { %v2132_v8 = vpop.f32.mrb[56].mxu0 }
 0x8bb   :  { %v2133_v0 = vadd.f32 %v3618_v12, %v2132_v8  ;;  %v4019_v15 = vpop.f32.mrb[57].mxu0 }
 0x8bc   :  { %v2135_v17 = vpop.f32.mrb[58].mxu0 }
 0x8bd   :  { %v2136_v18 = vadd.f32 %v3619_v6, %v2135_v17  ;;  %v4020_v21 = vpop.f32.mrb[59].mxu0  ;;  %v2292_v22 = vsel %vm698_vm2, %v2133_v0, -inf }
 0x8be   :  { %2293 = vmax.xlane.f32.xlu0 %v2292_v22  ;;  %v2183_v11 = vpop.f32.mrb[64].mxu1 }
 0x8bf   :  { %v2184_v14 = vadd.f32 %v3622_v16, %v2183_v11  ;;  %v4025_v24 = vpop.f32.mrb[65].mxu1  ;;  %v2295_v19 = vsel %vm698_vm2, %v2136_v18, -inf }
 0x8c0   :  { %2296 = vmax.xlane.f32.xlu1 %v2295_v19  ;;  %v2186_v29 = vpop.f32.mrb[66].mxu1 }
 0x8c1   :  { %v2187_v30 = vadd.f32 %v3623_v26, %v2186_v29  ;;  %v4026_v32 = vpop.f32.mrb[67].mxu1  ;;  %v2298_v36 = vsel %vm698_vm2, %v2184_v14, -inf }
 0x8c2   :  { %v2234_v35 = vpop.f32.mrb[60].mxu0  ;;  %2299 = vmax.xlane.f32.xlu0 %v2298_v36 }
 0x8c3   :  { %v4031_v43 = vpop.f32.mrb[61].mxu0  ;;  %v2235_v37 = vadd.f32 %v3626_v34, %v2234_v35  ;;  %v2301_v41 = vsel %vm698_vm2, %v2187_v30, -inf }
 0x8c4   :  { %v2237_v38 = vpop.f32.mrb[62].mxu0 }
 0x8c5   :  { %v2238_v45 = vadd.f32 %v3627_v31, %v2237_v38  ;;  %v4032_v23 = vpop.f32.mrb[63].mxu0  ;;  %v2304_v47 = vsel %vm698_vm2, %v2235_v37, -inf }
 0x8c6   :  { %2302 = vmax.xlane.f32.xlu0 %v2301_v41  ;;  %v2285_v33 = vpop.f32.mrb[68].mxu1 }
 0x8c7   :  { %v4037_v52 = vpop.f32.mrb[69].mxu1  ;;  %v2307_v57 = vsel %vm698_vm2, %v2238_v45, -inf  ;;  %v2286_v63 = vadd.f32 %v3630_v40, %v2285_v33 }
 0x8c8   :  { %2308 = vmax.xlane.f32.xlu1 %v2307_v57  ;;  %v2288_v60 = vpop.f32.mrb[70].mxu1 }
 0x8c9   :  { %v5055_v44 = vadd.f32 %v3631_v46, %v2288_v60  ;;  %v4038_v7 = vpop.f32.mrb[71].mxu1  ;;  %v2310_v12 = vsel %vm698_vm2, %v2286_v63, -inf }
 0x8ca   :  { %2305 = vmax.xlane.f32.xlu0 %v2304_v47 }
 0x8cb   :  { %v2313_v1 = vsel %vm698_vm2, %v5055_v44, -inf }
 0x8cc   :  { %2314 = vmax.xlane.f32.xlu1 %v2313_v1 }
 0x8ce   :  { %2311 = vmax.xlane.f32.xlu0 %v2310_v12 }
 0x94b   :  { %v2294_v13 = vpop.xlane.xlu0 %2293 }
 0x94c   :  { %v2316_v4 = vsub.f32 %v2133_v0, %v2294_v13 }
 0x94d   :  { %v2297_v6 = vpop.xlane.xlu1 %2296 }
 0x94e   :  { %v2324_v8 = vmul.f32 1.442695, %v2316_v4  ;;  %v2317_v15 = vsub.f32 %v2136_v18, %v2297_v6 }
 0x94f   :  { %v2300_v16 = vpop.xlane.xlu0 %2299 }
 0x950   :  { %4280 = vpow2.f32 %v2324_v8  ;;  %v2326_v17 = vmul.f32 1.442695, %v2317_v15  ;;  %v2318_v21 = vsub.f32 %v2184_v14, %v2300_v16 }
 0x952   :  { %4282 = vpow2.f32 %v2326_v17  ;;  %v2328_v22 = vmul.f32 1.442695, %v2318_v21 }
 0x953   :  { %v2303_v26 = vpop.xlane.xlu0 %2302 }
 0x954   :  { %4284 = vpow2.f32 %v2328_v22  ;;  %v2319_v11 = vsub.f32 %v2187_v30, %v2303_v26 }
 0x955   :  { %v2309_v25 = vpop.xlane.xlu1 %2308 }
 0x956   :  { %v2330_v24 = vmul.f32 1.442695, %v2319_v11  ;;  %v2321_v19 = vsub.f32 %v2238_v45, %v2309_v25 }
 0x957   :  { %v2306_v29 = vpop.xlane.xlu0 %2305 }
 0x958   :  { %4286 = vpow2.f32 %v2330_v24  ;;  %v2334_v32 = vmul.f32 1.442695, %v2321_v19  ;;  %v2320_v34 = vsub.f32 %v2235_v37, %v2306_v29 }
 0x959   :  { %v2315_v57 = vpop.xlane.xlu1 %2314 }
 0x95a   :  { %v5061_v0 = vpop.eup %4280  ;;  %4288 = vpow2.f32 %v2334_v32  ;;  %v2332_v18 = vmul.f32 1.442695, %v2320_v34  ;;  %v2323_v60 = vsub.f32 %v5055_v44, %v2315_v57 }
 0x95b   :  { %v2312_v36 = vpop.xlane.xlu0 %2311  ;;  %v2340_v14 = vsel %vm698_vm2, %v5061_v0, 0.0 }
 0x95c   :  { %v5065_v31 = vpop.eup %4282  ;;  %4290 = vpow2.f32 %v2332_v18  ;;  %v2322_v39 = vsub.f32 %v2286_v63, %v2312_v36  ;;  %2341 = vadd.xlane.f32.xlu0 %v2340_v14  ;;  %v2338_v63 = vmul.f32 1.442695, %v2323_v60 }
 0x95d   :  { %v2343_v30 = vsel %vm698_vm2, %v5065_v31, 0.0 }
 0x95e   :  { %v5069_v35 = vpop.eup %4284  ;;  %v2336_v43 = vmul.f32 1.442695, %v2322_v39  ;;  %2344 = vadd.xlane.f32.xlu1 %v2343_v30 }
 0x95f   :  { %v2346_v38 = vsel %vm698_vm2, %v5069_v35, 0.0 }
 0x960   :  { %4292 = vpow2.f32 %v2336_v43  ;;  %2347 = vadd.xlane.f32.xlu0 %v2346_v38  ;;  %v4137_v43 = vld [vmem:[%s5455_s8 + $0x8] sm:$0xff]   ;;  %v4138_v38 = vld [vmem:[%s5455_s8 + $0x10] sm:$0xff]  }
 0x961   :  { %4294 = vpow2.f32 %v2338_v63 }
 0x962   :  { %v4287_v40 = vpop.eup %4286 }
 0x963   :  { %v2349_v37 = vsel %vm698_vm2, %v4287_v40, 0.0 }
 0x964   :  { %v5074_v45 = vpop.eup %4288  ;;  %2350 = vadd.xlane.f32.xlu1 %v2349_v37  ;;  %v4140_v37 = vld [vmem:[%s5455_s8 + $0x20] sm:$0xff]  }
 0x965   :  { %v2355_v46 = vsel %vm698_vm2, %v5074_v45, 0.0 }
 0x966   :  { %v5076_v23 = vpop.eup %4290 }
 0x967   :  { %v2352_v41 = vsel %vm698_vm2, %v5076_v23, 0.0 }
 0x968   :  { %2353 = vadd.xlane.f32.xlu0 %v2352_v41  ;;  %2356 = vadd.xlane.f32.xlu1 %v2355_v46  ;;  %v4143_v41 = vld [vmem:[%s5455_s8 + $0x38] sm:$0xff]  }
 0x96a   :  { %v5082_v33 = vpop.eup %4292 }
 0x96b   :  { %v2358_v52 = vsel %vm698_vm2, %v5082_v33, 0.0 }
 0x96c   :  { %2359 = vadd.xlane.f32.xlu0 %v2358_v52 }
 0x979   :  { %2431 = vrot.lane.b32.xlu1 %v4707_v2, %s4380_s7 }
 0x97d   :  { %2478 = vrot.lane.b32.xlu1 %v4709_v3, %s4380_s7 }
 0x982   :  { %2384 = vrot.lane.b32.xlu0 %v4701_v55, %s4380_s7  ;;  %v5105_v55 = vpop.eup %4294 }
 0x983   :  { %v2361_v2 = vsel %vm698_vm2, %v5105_v55, 0.0 }
 0x986   :  { %1496 = vrot.lane.b32.xlu0 %v4898_v50, %s4380_s7 }
 0x98a   :  { %1500 = vrot.lane.b32.xlu0 %v4902_v56, %s4380_s7 }
 0x98e   :  { %2038 = vrot.lane.b32.xlu0 %v5022_v48, %s4379_s3 }
 0x992   :  { %2042 = vrot.lane.b32.xlu0 %v5026_v58, %s4379_s3 }
 0x996   :  { %1504 = vrot.lane.b32.xlu0 %v4906_v59, %s4380_s7 }
 0x99a   :  { %1508 = vrot.lane.b32.xlu0 %v4920_v20, %s4380_s7 }
 0x9a1   :  { %2362 = vadd.xlane.f32.xlu1 %v2361_v2 }
 0x9b2   :  { %2525 = vrot.lane.b32.xlu1 %v4715_v9, %s4380_s7 }
 0x9b6   :  { %1498 = vrot.lane.b32.xlu1 %v4900_v53, %s4380_s7 }
 0x9ba   :  { %1502 = vrot.lane.b32.xlu1 %v4904_v42, %s4380_s7 }
 0x9be   :  { %2040 = vrot.lane.b32.xlu1 %v5024_v54, %s4379_s3 }
 0x9c2   :  { %2044 = vrot.lane.b32.xlu1 %v5028_v62, %s4379_s3 }
 0x9c6   :  { %1506 = vrot.lane.b32.xlu1 %v4908_v61, %s4380_s7 }
 0x9ca   :  { %1510 = vrot.lane.b32.xlu1 %v4922_v27, %s4380_s7 }
 0x9e9   :  { %v2342_v3 = vpop.xlane.xlu0 %2341 }
 0x9eb   :  { %v2345_v9 = vpop.xlane.xlu1 %2344 }
 0x9ec   :  { %4296 = vrcp.f32 %v2345_v9 }
 0x9ed   :  { %v2348_v50 = vpop.xlane.xlu0 %2347  ;;  %4298 = vrcp.f32 %v2342_v3 }
 0x9ee   :  { %4300 = vrcp.f32 %v2348_v50 }
 0x9f1   :  { %v2351_v53 = vpop.xlane.xlu1 %2350 }
 0x9f2   :  { %4302 = vrcp.f32 %v2351_v53 }
 0x9f5   :  { %v2354_v56 = vpop.xlane.xlu0 %2353  ;;  %v2357_v42 = vpop.xlane.xlu1 %2356 }
 0x9f6   :  { %4304 = vrcp.f32 %v2354_v56  ;;  %v4297_v59 = vpop.eup %4296 }
 0x9f7   :  { %4306 = vrcp.f32 %v2357_v42  ;;  %v4299_v20 = vpop.eup %4298  ;;  %v2373_v27 = vmul.f32 %v4297_v59, %v5065_v31 }
 0x9f8   :  { %v4301_v61 = vpop.eup %4300  ;;  %v2372_v62 = vmul.f32 %v4299_v20, %v5061_v0 }
 0x9f9   :  { %v2360_v48 = vpop.xlane.xlu0 %2359  ;;  %v2432_v54 = vpop.permute.xlu1 %2431  ;;  %v2374_v44 = vmul.f32 %v4301_v61, %v5069_v35  ;;  %v4136_v35 = vld [vmem:[%s5455_s8] sm:$0xff]  }
 0x9fa   :  { %4046 = vmatpush3.bf16.msra.mxu1 %v2432_v54  ;;  %v2380_v1 = vpack.c.bf16 %v2373_v27, %v2372_v62  ;;  %4308 = vrcp.f32 %v2360_v48 }
 0x9fb   :  { %4057 = vmatprep.subr.bf16.mxu1 %v4376_v28 }
 0x9fc   :  { %v4303_v58 = vpop.eup %4302 }
 0x9fd   :  { %v2375_v7 = vmul.f32 %v4303_v58, %v4287_v40  ;;  %v2385_v47 = vpop.permute.xlu0 %2384  ;;  %v2479_v6 = vpop.permute.xlu1 %2478  ;;  %v4139_v40 = vld [vmem:[%s5455_s8 + $0x18] sm:$0xff]  }
 0x9fe   :  { %4040 = vmatpush3.bf16.msra.mxu0 %v2385_v47 }
 0x9ff   :  { %4051 = vmatprep.subr.bf16.mxu0 %v4376_v28  ;;  %v2381_v12 = vpack.c.bf16 %v2375_v7, %v2374_v44 }
 0xa00   :  { %v4305_v13 = vpop.eup %4304 }
 0xa01   :  { %v4307_v4 = vpop.eup %4306  ;;  %v1497_v8 = vpop.permute.xlu0 %1496  ;;  %4042 = vmatmul.mubr.msk.bf16.vlgmr.msra.gmra.mrb[64].mxu0 %vm698_vm2, %v2380_v1  ;;  %4048 = vmatmul.mubr.msk.bf16.vlgmr.msra.gmra.mrb[72].mxu1 %vm698_vm2, %v2381_v12  ;;  %v2376_v15 = vmul.f32 %v4305_v13, %v5076_v23  ;;  %v4142_v23 = vld [vmem:[%s5455_s8 + $0x30] sm:$0xff]  }
 0xa02   :  { %1521 = vst.msk [vmem:[#allocation2] sm:$0xff] %vm1520_vm3, %v1497_v8  ;;  %4052 = vmatpush3.bf16.msra.mxu0 %v2479_v6  ;;  %4053 = vmatprep.mubr.msk.bf16.mxu0 %vm4377_vm0, %v4376_v28  ;;  %v2377_v16 = vmul.f32 %v4307_v4, %v5074_v45  ;;  %v4141_v45 = vld [vmem:[%s5455_s8 + $0x28] sm:$0xff]  }
 0xa03   :  { %4059 = vmatprep.mubr.msk.bf16.mxu1 %vm4377_vm0, %v4376_v28  ;;  %4063 = vmatprep.subr.bf16.mxu0 %v4136_v35 }
 0xa04   :  { %v2382_v21 = vpack.c.bf16 %v2377_v16, %v2376_v15  ;;  %v4309_v29 = vpop.eup %4308 }
 0xa05   :  { %v1501_v17 = vpop.permute.xlu0 %1500  ;;  %v2378_v34 = vmul.f32 %v4309_v29, %v5082_v33 }
 0xa06   :  { %1523 = vst.msk [vmem:[#allocation2 + $0x10] sm:$0xff] %vm1520_vm3, %v1501_v17 }
 0xa09   :  { %v2039_v22 = vpop.permute.xlu0 %2038  ;;  %4054 = vmatmul.mubr.msk.bf16.vlgmr.msra.gmra.mrb[68].mxu0 %vm698_vm2, %v2382_v21 }
 0xa0a   :  { %2063 = vst.msk [vmem:[#allocation2] sm:$0xff] %vm2062_vm4, %v2039_v22  ;;  %4064 = vmatpush3.bf16.msra.mxu0 %v4136_v35 }
 0xa0b   :  { %4065 = vmatprep.subr.bf16.mxu0 %v4137_v43 }
 0xa0d   :  { %v2043_v26 = vpop.permute.xlu0 %2042 }
 0xa0e   :  { %2065 = vst.msk [vmem:[#allocation2 + $0x10] sm:$0xff] %vm2062_vm4, %v2043_v26  ;;  %4066 = vmatpush3.bf16.msra.mxu0 %v4137_v43  ;;  %v3522_v26 = vld [vmem:[%s5456_s9] ss:$0 sm:$0xff] }
 0xa0f   :  { %4067 = vmatprep.subr.bf16.mxu0 %v4138_v38 }
 0xa11   :  { %v1505_v11 = vpop.permute.xlu0 %1504 }
 0xa12   :  { %1525 = vst.msk [vmem:[#allocation2 + $0x20] sm:$0xff] %vm1520_vm3, %v1505_v11  ;;  %4068 = vmatpush3.bf16.msra.mxu0 %v4138_v38 }
 0xa13   :  { %4069 = vmatprep.subr.bf16.mxu0 %v4139_v40 }
 0xa15   :  { %v1509_v25 = vpop.permute.xlu0 %1508 }
 0xa16   :  { %1527 = vst.msk [vmem:[#allocation2 + $0x30] sm:$0xff] %vm1520_vm3, %v1509_v25  ;;  %4070 = vmatpush3.bf16.msra.mxu0 %v4139_v40 }
 0xa17   :  { %4071 = vmatprep.subr.bf16.mxu0 %v4140_v37 }
 0xa1a   :  { %4072 = vmatpush3.bf16.msra.mxu0 %v4140_v37 }
 0xa1b   :  { %4073 = vmatprep.subr.bf16.mxu0 %v4141_v45 }
 0xa1e   :  { %4074 = vmatpush3.bf16.msra.mxu0 %v4141_v45 }
 0xa1f   :  { %4075 = vmatprep.subr.bf16.mxu0 %v4142_v23 }
 0xa22   :  { %4076 = vmatpush3.bf16.msra.mxu0 %v4142_v23 }
 0xa23   :  { %4077 = vmatprep.subr.bf16.mxu0 %v4143_v41 }
 0xa26   :  { %4078 = vmatpush3.bf16.msra.mxu0 %v4143_v41  ;;  %v4348_v41 = vld [vmem:[%s5473_s22 + $0x20] sm:$0xff] }
 0xa2e   :  { %v2363_v28 = vpop.xlane.xlu1 %2362 }
 0xa2f   :  { %4310 = vrcp.f32 %v2363_v28 }
 0xa32   :  { %v2526_v24 = vpop.permute.xlu1 %2525 }
 0xa33   :  { %4058 = vmatpush3.bf16.msra.mxu1 %v2526_v24 }
 0xa36   :  { %v1499_v19 = vpop.permute.xlu1 %1498 }
 0xa37   :  { %1522 = vst.msk [vmem:[#allocation2 + $0x8] sm:$0xff] %vm1520_vm3, %v1499_v19 }
 0xa39   :  { %v4311_v32 = vpop.eup %4310 }
 0xa3a   :  { %v2379_v0 = vmul.f32 %v4311_v32, %v5105_v55  ;;  %v1503_v18 = vpop.permute.xlu1 %1502  ;;  %v4344_v32 = vld [vmem:[%s5473_s22] sm:$0xff] }
 0xa3b   :  { %1524 = vst.msk [vmem:[#allocation2 + $0x18] sm:$0xff] %vm1520_vm3, %v1503_v18  ;;  %v4345_v18 = vld [vmem:[%s5473_s22 + $0x8] sm:$0xff] }
 0xa3c   :  { %v2383_v36 = vpack.c.bf16 %v2379_v0, %v2378_v34 }
 0xa3e   :  { %4060 = vmatmul.mubr.msk.bf16.vlgmr.msra.gmra.mrb[76].mxu1 %vm698_vm2, %v2383_v36  ;;  %v2041_v14 = vpop.permute.xlu1 %2040 }
 0xa3f   :  { %2064 = vst.msk [vmem:[#allocation2 + $0x8] sm:$0xff] %vm2062_vm4, %v2041_v14  ;;  %v4346_v14 = vld [vmem:[%s5473_s22 + $0x10] sm:$0xff] }
 0xa42   :  { %v2045_v31 = vpop.permute.xlu1 %2044 }
 0xa43   :  { %2066 = vst.msk [vmem:[#allocation2 + $0x18] sm:$0xff] %vm2062_vm4, %v2045_v31 }
 0xa46   :  { %v1507_v39 = vpop.permute.xlu1 %1506 }
 0xa47   :  { %1526 = vst.msk [vmem:[#allocation2 + $0x28] sm:$0xff] %vm1520_vm3, %v1507_v39 }
 0xa4a   :  { %v1511_v30 = vpop.permute.xlu1 %1510 }
 0xa4b   :  { %1528 = vst.msk [vmem:[#allocation2 + $0x38] sm:$0xff] %vm1520_vm3, %v1511_v30  ;;  %v4347_v30 = vld [vmem:[%s5473_s22 + $0x18] sm:$0xff] }
 0xad4   :  { %v2424_v46 = vpop.f32.mrb[64].mxu0  ;;  %v2471_v33 = vpop.f32.mrb[72].mxu1 }
 0xad5   :  { %2580 = vrot.lane.b32.xlu0 %v2424_v46, %s4378_s1  ;;  %v4043_v52 = vpop.f32.mrb[65].mxu0  ;;  %v4049_v57 = vpop.f32.mrb[73].mxu1 }
 0xad6   :  { %v2427_v60 = vpop.f32.mrb[66].mxu0  ;;  %v2474_v63 = vpop.f32.mrb[74].mxu1  ;;  %v4349_v57 = vld [vmem:[%s5473_s22 + $0x28] sm:$0xff] }
 0xad7   :  { %2582 = vrot.lane.b32.xlu1 %v2427_v60, %s4378_s1  ;;  %v4044_v55 = vpop.f32.mrb[67].mxu0  ;;  %v4050_v2 = vpop.f32.mrb[75].mxu1 }
 0xad8   :  { %v4351_v2 = vld [vmem:[%s5473_s22 + $0x38] sm:$0xff] }
 0xad9   :  { %2584 = vrot.lane.b32.xlu0 %v2471_v33, %s4378_s1 }
 0xadb   :  { %2586 = vrot.lane.b32.xlu1 %v2474_v63, %s4378_s1  ;;  %v4350_v63 = vld [vmem:[%s5473_s22 + $0x30] sm:$0xff] }
 0xadc   :  { %v2518_v3 = vpop.f32.mrb[68].mxu0 }
 0xadd   :  { %v4055_v9 = vpop.f32.mrb[69].mxu0  ;;  %2046 = vrot.lane.b32.xlu0 %v5030_v5, %s4379_s3 }
 0xade   :  { %v2521_v50 = vpop.f32.mrb[70].mxu0  ;;  %v4144_v9 = vld [vmem:[%s5457_s10] ss:$8 sps:$4 sm:$0xff]  }
 0xadf   :  { %v4056_v53 = vpop.f32.mrb[71].mxu0  ;;  %2048 = vrot.lane.b32.xlu1 %v5032_v49, %s4379_s3 }
 0xae0   :  { %v4149_v53 = vld [vmem:[%s5457_s10 + $0x14] ss:$8 sps:$4 sm:$0xff]  }
 0xae1   :  { %2050 = vrot.lane.b32.xlu0 %v5037_v10, %s4379_s3 }
 0xae3   :  { %2052 = vrot.lane.b32.xlu1 %v5039_v51, %s4379_s3 }
 0xae5   :  { %2588 = vrot.lane.b32.xlu0 %v2518_v3, %s4378_s1 }
 0xae7   :  { %2590 = vrot.lane.b32.xlu1 %v2521_v50, %s4378_s1  ;;  %v4146_v50 = vld [vmem:[%s5457_s10 + $0x4] ss:$8 sps:$4 sm:$0xff]  }
 0xae8   :  { %3000 = vmatprep.subr.bf16.mxu1 %v4146_v50 }
 0xae9   :  { %3001 = vmatpush1.bf16.msra.mxu1 %v4144_v9 }
 0xaea   :  { %3002 = vmatprep.subr.bf16.mxu1 %v4149_v53 }
 0xb11   :  { %v2565_v56 = vpop.f32.mrb[76].mxu1 }
 0xb12   :  { %2592 = vrot.lane.b32.xlu0 %v2565_v56, %s4378_s1  ;;  %v4061_v42 = vpop.f32.mrb[77].mxu1  ;;  %v4147_v56 = vld [vmem:[%s5457_s10 + $0x10] ss:$8 sps:$4 sm:$0xff]  }
 0xb13   :  { %v2568_v5 = vpop.f32.mrb[78].mxu1  ;;  %3003 = vmatpush1.bf16.msra.mxu1 %v4147_v56 }
 0xb14   :  { %2594 = vrot.lane.b32.xlu1 %v2568_v5, %s4378_s1  ;;  %v4062_v59 = vpop.f32.mrb[79].mxu1 }
 0xb47   :  { %v2581_v49 = vpop.permute.xlu0 %2580 }
 0xb48   :  { %2605 = vst.msk [vmem:[#allocation2] sm:$0xff] %vm2604_vm5, %v2581_v49 }
 0xb49   :  { %v2583_v10 = vpop.permute.xlu1 %2582 }
 0xb4a   :  { %2606 = vst.msk [vmem:[#allocation2 + $0x8] sm:$0xff] %vm2604_vm5, %v2583_v10 }
 0xb4b   :  { %v2585_v51 = vpop.permute.xlu0 %2584 }
 0xb4c   :  { %2607 = vst.msk [vmem:[#allocation2 + $0x10] sm:$0xff] %vm2604_vm5, %v2585_v51 }
 0xb4d   :  { %v2587_v20 = vpop.permute.xlu1 %2586 }
 0xb4e   :  { %2608 = vst.msk [vmem:[#allocation2 + $0x18] sm:$0xff] %vm2604_vm5, %v2587_v20 }
 0xb4f   :  { %v2047_v48 = vpop.permute.xlu0 %2046  ;;  %v2613_v61 = vld [vmem:[#allocation2] sm:$0xff] }
 0xb50   :  { %2067 = vst.msk [vmem:[#allocation2 + $0x20] sm:$0xff] %vm2062_vm4, %v2047_v48 }
 0xb51   :  { %v2049_v54 = vpop.permute.xlu1 %2048  ;;  %v2614_v27 = vld [vmem:[#allocation2 + $0x8] sm:$0xff] }
 0xb52   :  { %2068 = vst.msk [vmem:[#allocation2 + $0x28] sm:$0xff] %vm2062_vm4, %v2049_v54  ;;  %v2621_v58 = vpack.c.bf16 %v2614_v27, %v2613_v61 }
 0xb53   :  { %v2051_v62 = vpop.permute.xlu0 %2050  ;;  %v2615_v7 = vld [vmem:[#allocation2 + $0x10] sm:$0xff] }
 0xb54   :  { %2069 = vst.msk [vmem:[#allocation2 + $0x30] sm:$0xff] %vm2062_vm4, %v2051_v62  ;;  %4079 = vmatprep.mubr.bf16.mxu0 %v2621_v58 }
 0xb55   :  { %v2053_v44 = vpop.permute.xlu1 %2052  ;;  %v2616_v47 = vld [vmem:[#allocation2 + $0x18] sm:$0xff] }
 0xb56   :  { %2070 = vst.msk [vmem:[#allocation2 + $0x38] sm:$0xff] %vm2062_vm4, %v2053_v44  ;;  %v2622_v1 = vpack.c.bf16 %v2616_v47, %v2615_v7 }
 0xb57   :  { %v2589_v12 = vpop.permute.xlu0 %2588 }
 0xb58   :  { %2609 = vst.msk [vmem:[#allocation2 + $0x20] sm:$0xff] %vm2604_vm5, %v2589_v12  ;;  %4080 = vmatmul.mubr.bf16.vlgmr.msra.gmra.mrb[72].mxu0 %v2622_v1  ;;  %v4152_v1 = vld [vmem:[%s5457_s10 + $0x24] ss:$8 sps:$4 sm:$0xff]   ;;  %v4150_v12 = vld [vmem:[%s5457_s10 + $0x20] ss:$8 sps:$4 sm:$0xff]  }
 0xb59   :  { %v2591_v13 = vpop.permute.xlu1 %2590  ;;  %3004 = vmatprep.subr.bf16.mxu1 %v4152_v1 }
 0xb5a   :  { %2610 = vst.msk [vmem:[#allocation2 + $0x28] sm:$0xff] %vm2604_vm5, %v2591_v13  ;;  %3005 = vmatpush1.bf16.msra.mxu1 %v4150_v12  ;;  %v4155_v13 = vld [vmem:[%s5457_s10 + $0x34] ss:$8 sps:$4 sm:$0xff]  }
 0xb5b   :  { %3006 = vmatprep.subr.bf16.mxu1 %v4155_v13 }
 0xb5f   :  { %v2617_v4 = vld [vmem:[#allocation2 + $0x20] sm:$0xff] }
 0xb61   :  { %v2618_v6 = vld [vmem:[#allocation2 + $0x28] sm:$0xff] }
 0xb62   :  { %v2623_v8 = vpack.c.bf16 %v2618_v6, %v2617_v4  ;;  %v4153_v4 = vld [vmem:[%s5457_s10 + $0x30] ss:$8 sps:$4 sm:$0xff]   ;;  %v4158_v6 = vld [vmem:[%s5457_s10 + $0x44] ss:$8 sps:$4 sm:$0xff]  }
 0xb63   :  { %3007 = vmatpush1.bf16.msra.mxu1 %v4153_v4 }
 0xb64   :  { %4083 = vmatprep.mubr.bf16.mxu0 %v2623_v8  ;;  %v4156_v8 = vld [vmem:[%s5457_s10 + $0x40] ss:$8 sps:$4 sm:$0xff]   ;;  %3008 = vmatprep.subr.bf16.mxu1 %v4158_v6 }
 0xb67   :  { %3009 = vmatpush1.bf16.msra.mxu1 %v4156_v8 }
 0xb84   :  { %v2593_v15 = vpop.permute.xlu0 %2592 }
 0xb85   :  { %2611 = vst.msk [vmem:[#allocation2 + $0x30] sm:$0xff] %vm2604_vm5, %v2593_v15  ;;  %v4161_v15 = vld [vmem:[%s5457_s10 + $0x54] ss:$8 sps:$4 sm:$0xff]  }
 0xb86   :  { %v2595_v16 = vpop.permute.xlu1 %2594  ;;  %3010 = vmatprep.subr.bf16.mxu1 %v4161_v15 }
 0xb87   :  { %2612 = vst.msk [vmem:[#allocation2 + $0x38] sm:$0xff] %vm2604_vm5, %v2595_v16  ;;  %v4159_v16 = vld [vmem:[%s5457_s10 + $0x50] ss:$8 sps:$4 sm:$0xff]  }
 0xb88   :  { %3011 = vmatpush1.bf16.msra.mxu1 %v4159_v16 }
 0xb8c   :  { %v2619_v17 = vld [vmem:[#allocation2 + $0x30] sm:$0xff] }
 0xb8e   :  { %v2620_v21 = vld [vmem:[#allocation2 + $0x38] sm:$0xff] }
 0xb8f   :  { %v2624_v22 = vpack.c.bf16 %v2620_v21, %v2619_v17  ;;  %v4164_v17 = vld [vmem:[%s5457_s10 + $0x64] ss:$8 sps:$4 sm:$0xff]   ;;  %v4162_v21 = vld [vmem:[%s5457_s10 + $0x60] ss:$8 sps:$4 sm:$0xff]  }
 0xb90   :  { %3012 = vmatprep.subr.bf16.mxu1 %v4164_v17 }
 0xb91   :  { %4084 = vmatmul.mubr.bf16.gmra.mrb[76].mxu0 %v2624_v22  ;;  %v4167_v22 = vld [vmem:[%s5457_s10 + $0x74] ss:$8 sps:$4 sm:$0xff]   ;;  %3013 = vmatpush1.bf16.msra.mxu1 %v4162_v21 }
 0xb92   :  { %3014 = vmatprep.subr.bf16.mxu1 %v4167_v22 }
 0xc2b   :  { %v4081_v11 = vpop.f32.mrb[72].mxu0 }
 0xc2c   :  { %v2730_v25 = vpop.f32.mrb[73].mxu0  ;;  %v2739_v29 = vadd.f32 %v4081_v11, %v3522_v26  ;;  %v4381_v11 = vmov 0  }
 0xc2d   :  { %v2731_v28 = vadd.f32 %v3522_v26, %v2730_v25  ;;  %v4082_v24 = vpop.f32.mrb[74].mxu0  ;;  %3032 = vmatprep.mubr.bf16.mxu1 %v4381_v11 }
 0xc2e   :  { %v2733_v19 = vpop.f32.mrb[75].mxu0  ;;  %v2763_v31 = vadd.f32 %v4346_v14, %v2739_v29  ;;  %v2742_v39 = vadd.f32 %v4082_v24, %v3522_v26 }
 0xc2f   :  { %v2761_v34 = vadd.f32 %v4344_v32, %v2731_v28  ;;  %v2734_v0 = vadd.f32 %v3522_v26, %v2733_v19 }
 0xc30   :  { %v2764_v35 = vadd.f32 %v4347_v30, %v2742_v39 }
 0xc31   :  { %v2762_v36 = vadd.f32 %v4345_v18, %v2734_v0  ;;  %2769 = vadd.xlane.f32.xlu0 %v2761_v34 }
 0xc33   :  { %2771 = vadd.xlane.f32.xlu1 %v2762_v36 }
 0xc35   :  { %2773 = vadd.xlane.f32.xlu0 %v2763_v31 }
 0xc39   :  { %2775 = vadd.xlane.f32.xlu0 %v2764_v35 }
 0xc64   :  { %v4085_v43 = vpop.f32.mrb[76].mxu0 }
 0xc65   :  { %v2746_v38 = vpop.f32.mrb[77].mxu0  ;;  %v2755_v23 = vadd.f32 %v4085_v43, %v3522_v26 }
 0xc66   :  { %v2747_v40 = vadd.f32 %v3522_v26, %v2746_v38  ;;  %v4086_v37 = vpop.f32.mrb[78].mxu0  ;;  %v4168_v38 = vld [vmem:[%s5459_s12 + $0x40] sm:$0xff]  }
 0xc67   :  { %v2749_v45 = vpop.f32.mrb[79].mxu0  ;;  %v2758_v52 = vadd.f32 %v4086_v37, %v3522_v26  ;;  %v5233_v55 = vadd.f32 %v4350_v63, %v2755_v23  ;;  %v4170_v37 = vld [vmem:[%s5459_s12 + $0x48] sm:$0xff]   ;;  %3759 = vmatprep.subr.bf16.mxu0 %v4168_v38  ;;  %v4172_v23 = vld [vmem:[%s5459_s12 + $0x50] sm:$0xff]  }
 0xc68   :  { %v5222_v46 = vadd.f32 %v4348_v41, %v2747_v40  ;;  %v2750_v33 = vadd.f32 %v3522_v26, %v2749_v45  ;;  %v4165_v26 = vld [vmem:[%s5457_s10 + $0x70] ss:$8 sps:$4 sm:$0xff]   ;;  %v4169_v40 = vld [vmem:[%s5459_s12] sm:$0xff]   ;;  %v4171_v45 = vld [vmem:[%s5459_s12 + $0x8] sm:$0xff]  }
 0xc69   :  { %v5239_v3 = vadd.f32 %v4351_v2, %v2758_v52  ;;  %3015 = vmatpush1.bf16.msra.mxu1 %v4165_v26  ;;  %3760 = vmatpush3.bf16.msra.mxu0 %v4169_v40  ;;  %v4173_v41 = vld [vmem:[%s5459_s12 + $0x10] sm:$0xff]   ;;  %v4176_v52 = vld [vmem:[%s5459_s12 + $0x60] sm:$0xff]  }
 0xc6a   :  { %v5227_v60 = vadd.f32 %v4349_v57, %v2750_v33  ;;  %2777 = vadd.xlane.f32.xlu0 %v5222_v46  ;;  %4087 = vmatprep.subr.bf16.mxu1 %v4168_v38  ;;  %v4175_v33 = vld [vmem:[%s5459_s12 + $0x18] sm:$0xff]   ;;  %v4177_v57 = vld [vmem:[%s5459_s12 + $0x20] sm:$0xff]  }
 0xc6b   :  { %3761 = vmatprep.subr.bf16.mxu0 %v4170_v37 }
 0xc6c   :  { %2779 = vadd.xlane.f32.xlu1 %v5227_v60 }
 0xc6d   :  { %3762 = vmatpush3.bf16.msra.mxu0 %v4171_v45 }
 0xc6e   :  { %2781 = vadd.xlane.f32.xlu0 %v5233_v55  ;;  %3763 = vmatprep.subr.bf16.mxu0 %v4172_v23 }
 0xc70   :  { %2783 = vadd.xlane.f32.xlu1 %v5239_v3 }
 0xc71   :  { %3764 = vmatpush3.bf16.msra.mxu0 %v4173_v41 }
 0xcbe   :  { %v2770_v42 = vpop.xlane.xlu0 %2769 }
 0xcbf   :  { %v2786_v5 = vmul.f32 0.0078125, %v2770_v42 }
 0xcc0   :  { %v2772_v59 = vpop.xlane.xlu1 %2771 }
 0xcc1   :  { %v5255_v49 = vsub.f32 %v2761_v34, %v2786_v5  ;;  %v2787_v10 = vmul.f32 0.0078125, %v2772_v59 }
 0xcc2   :  { %v2774_v51 = vpop.xlane.xlu0 %2773 }
 0xcc3   :  { %v5257_v20 = vsub.f32 %v2762_v36, %v2787_v10  ;;  %v2788_v48 = vmul.f32 0.0078125, %v2774_v51  ;;  %v2802_v54 = vmul.f32 %v5255_v49, %v5255_v49 }
 0xcc5   :  { %v5261_v61 = vsub.f32 %v2763_v31, %v2788_v48  ;;  %2810 = vadd.xlane.f32.xlu0 %v2802_v54  ;;  %v2803_v27 = vmul.f32 %v5257_v20, %v5257_v20  ;;  %v5364_v48 = vld [vmem:[%s5461_s14] ss:$0 sm:$0xff] }
 0xcc6   :  { %v2776_v58 = vpop.xlane.xlu0 %2775 }
 0xcc7   :  { %v2789_v62 = vmul.f32 0.0078125, %v2776_v58  ;;  %2812 = vadd.xlane.f32.xlu1 %v2803_v27  ;;  %v2804_v44 = vmul.f32 %v5261_v61, %v5261_v61 }
 0xcc9   :  { %v5267_v7 = vsub.f32 %v2764_v35, %v2789_v62  ;;  %2814 = vadd.xlane.f32.xlu0 %v2804_v44 }
 0xccb   :  { %v2805_v47 = vmul.f32 %v5267_v7, %v5267_v7 }
 0xccd   :  { %2816 = vadd.xlane.f32.xlu1 %v2805_v47  ;;  %v3532_v47 = vld [vmem:[%s5462_s15] ss:$0 sm:$0xff] }
 0xcf7   :  { %v2778_v25 = vpop.xlane.xlu0 %2777 }
 0xcf8   :  { %v2790_v28 = vmul.f32 0.0078125, %v2778_v25 }
 0xcf9   :  { %v2780_v24 = vpop.xlane.xlu1 %2779 }
 0xcfa   :  { %v5309_v19 = vsub.f32 %v5222_v46, %v2790_v28  ;;  %v2791_v29 = vmul.f32 0.0078125, %v2780_v24  ;;  %v4174_v46 = vld [vmem:[%s5459_s12 + $0x58] sm:$0xff]  }
 0xcfb   :  { %v2782_v32 = vpop.xlane.xlu0 %2781  ;;  %3765 = vmatprep.subr.bf16.mxu0 %v4174_v46 }
 0xcfc   :  { %v5312_v34 = vsub.f32 %v5227_v60, %v2791_v29  ;;  %v2792_v0 = vmul.f32 0.0078125, %v2782_v32  ;;  %v2806_v18 = vmul.f32 %v5309_v19, %v5309_v19  ;;  %3766 = vmatpush3.bf16.msra.mxu0 %v4175_v33  ;;  %v4178_v60 = vld [vmem:[%s5459_s12 + $0x68] sm:$0xff]  }
 0xcfd   :  { %v2784_v36 = vpop.xlane.xlu1 %2783  ;;  %3767 = vmatprep.subr.bf16.mxu0 %v4176_v52 }
 0xcfe   :  { %v5317_v14 = vsub.f32 %v5233_v55, %v2792_v0  ;;  %v2793_v31 = vmul.f32 0.0078125, %v2784_v36  ;;  %2818 = vadd.xlane.f32.xlu0 %v2806_v18  ;;  %v2807_v39 = vmul.f32 %v5312_v34, %v5312_v34 }
 0xd00   :  { %v5322_v30 = vsub.f32 %v5239_v3, %v2793_v31  ;;  %2820 = vadd.xlane.f32.xlu1 %v2807_v39  ;;  %v2808_v35 = vmul.f32 %v5317_v14, %v5317_v14  ;;  %3768 = vmatpush3.bf16.msra.mxu0 %v4177_v57 }
 0xd01   :  { %3769 = vmatprep.subr.bf16.mxu0 %v4178_v60 }
 0xd02   :  { %2822 = vadd.xlane.f32.xlu0 %v2808_v35  ;;  %v2809_v43 = vmul.f32 %v5322_v30, %v5322_v30 }
 0xd04   :  { %2824 = vadd.xlane.f32.xlu1 %v2809_v43 }
 0xd52   :  { %v2811_v63 = vpop.xlane.xlu0 %2810 }
 0xd53   :  { %v2826_v55 = vmul.f32 0.0078125, %v2811_v63 }
 0xd54   :  { %v2813_v2 = vpop.xlane.xlu1 %2812 }
 0xd55   :  { %v2834_v3 = vadd.f32 1e-05, %v2826_v55  ;;  %v2827_v9 = vmul.f32 0.0078125, %v2813_v2  ;;  %v4181_v55 = vld [vmem:[%s5459_s12 + $0x30] sm:$0xff]   ;;  %v4183_v2 = vld [vmem:[%s5459_s12 + $0x38] sm:$0xff]  }
 0xd56   :  { %v2815_v50 = vpop.xlane.xlu0 %2814 }
 0xd57   :  { %4312 = vrsqrt.f32 %v2834_v3  ;;  %v2835_v53 = vadd.f32 1e-05, %v2827_v9  ;;  %v2828_v56 = vmul.f32 0.0078125, %v2815_v50  ;;  %v2910_v3 = vlaneseq }
 0xd59   :  { %4314 = vrsqrt.f32 %v2835_v53  ;;  %v2836_v42 = vadd.f32 1e-05, %v2828_v56  ;;  %v2911_v9 = vshrl.u32 %v2910_v3, 7  ;;  %v2908_v53 = vld [vmem:[%s5458_s11] sm:$0x3] }
 0xd5a   :  { %v2817_v5 = vpop.xlane.xlu1 %2816  ;;  %v3549_v3 = vld [vmem:[%s5460_s13] ss:$0 sm:$0xff] }
 0xd5b   :  { %4316 = vrsqrt.f32 %v2836_v42  ;;  %v2829_v59 = vmul.f32 0.0078125, %v2817_v5  ;;  %v2912_v50 = vsub.s32 0, %v2911_v9  ;;  %v2916_v56 = vsub.s32 1, %v2911_v9 }
 0xd5d   :  { %v2837_v10 = vadd.f32 1e-05, %v2829_v59  ;;  %v2913_v42 = vrot.slane %v2908_v53, %v2912_v50  ;;  %v2917_v5 = vrot.slane %v2908_v53, %v2916_v56 }
 0xd5f   :  { %4318 = vrsqrt.f32 %v2837_v10 }
 0xd61   :  { %v4313_v51 = vpop.eup %4312 }
 0xd62   :  { %v2850_v54 = vmul.f32 %v4313_v51, %v5255_v49 }
 0xd63   :  { %v4315_v27 = vpop.eup %4314 }
 0xd64   :  { %v2851_v58 = vmul.f32 %v4315_v27, %v5257_v20  ;;  %v2865_v62 = vmul.f32 %v5364_v48, %v2850_v54 }
 0xd65   :  { %v4317_v44 = vpop.eup %4316 }
 0xd66   :  { %v2866_v1 = vmul.f32 %v5364_v48, %v2851_v58  ;;  %v2880_v12 = vadd.f32 %v3532_v47, %v2865_v62  ;;  %v2852_v4 = vmul.f32 %v4317_v44, %v5261_v61 }
 0xd68   :  { %v2881_v13 = vadd.f32 %v3532_v47, %v2866_v1  ;;  %v2867_v20 = vmul.f32 %v5364_v48, %v2852_v4 }
 0xd69   :  { %v4319_v6 = vpop.eup %4318 }
 0xd6a   :  { %v2888_v8 = vpack.c.bf16 %v2881_v13, %v2880_v12  ;;  %v2853_v49 = vmul.f32 %v4319_v6, %v5267_v7  ;;  %v2882_v17 = vadd.f32 %v3532_v47, %v2867_v20 }
 0xd6c   :  { %3033 = vmatmul.mubr.bf16.vlgmr.msra.gmra.mrb[80].mxu1 %v2888_v8  ;;  %v2868_v15 = vmul.f32 %v5364_v48, %v2853_v49 }
 0xd6d   :  { %3042 = vmatprep.mubr.bf16.mxu1 %v4381_v11  ;;  %4095 = vmatpush3.bf16.msra.mxu1 %v4169_v40 }
 0xd6e   :  { %v2883_v16 = vadd.f32 %v3532_v47, %v2868_v15  ;;  %4088 = vmatprep.subr.bf16.mxu1 %v4170_v37 }
 0xd70   :  { %v2889_v21 = vpack.c.bf16 %v2883_v16, %v2882_v17 }
 0xd71   :  { %4096 = vmatpush3.bf16.msra.mxu1 %v4171_v45 }
 0xd72   :  { %4089 = vmatprep.subr.bf16.mxu1 %v4172_v23 }
 0xd74   :  { %3043 = vmatmul.mubr.bf16.gmra.mrb[84].mxu1 %v2889_v21 }
 0xd75   :  { %3052 = vmatprep.mubr.bf16.mxu1 %v4381_v11  ;;  %4097 = vmatpush3.bf16.msra.mxu1 %v4173_v41 }
 0xd76   :  { %4090 = vmatprep.subr.bf16.mxu1 %v4174_v46 }
 0xd79   :  { %4098 = vmatpush3.bf16.msra.mxu1 %v4175_v33 }
 0xd7a   :  { %4091 = vmatprep.subr.bf16.mxu1 %v4176_v52 }
 0xd7d   :  { %4099 = vmatpush3.bf16.msra.mxu1 %v4177_v57 }
 0xd7e   :  { %4092 = vmatprep.subr.bf16.mxu1 %v4178_v60 }
 0xd8b   :  { %v2819_v61 = vpop.xlane.xlu0 %2818 }
 0xd8c   :  { %v2830_v7 = vmul.f32 0.0078125, %v2819_v61 }
 0xd8d   :  { %v2821_v22 = vpop.xlane.xlu1 %2820 }
 0xd8e   :  { %v2838_v26 = vadd.f32 1e-05, %v2830_v7  ;;  %v2831_v25 = vmul.f32 0.0078125, %v2821_v22 }
 0xd8f   :  { %v2823_v28 = vpop.xlane.xlu0 %2822 }
 0xd90   :  { %4320 = vrsqrt.f32 %v2838_v26  ;;  %v2839_v24 = vadd.f32 1e-05, %v2831_v25  ;;  %v2832_v29 = vmul.f32 0.0078125, %v2823_v28 }
 0xd91   :  { %v2825_v32 = vpop.xlane.xlu1 %2824 }
 0xd92   :  { %4322 = vrsqrt.f32 %v2839_v24  ;;  %v2840_v0 = vadd.f32 1e-05, %v2832_v29  ;;  %v2833_v18 = vmul.f32 0.0078125, %v2825_v32 }
 0xd94   :  { %4324 = vrsqrt.f32 %v2840_v0  ;;  %v2841_v36 = vadd.f32 1e-05, %v2833_v18 }
 0xd96   :  { %4326 = vrsqrt.f32 %v2841_v36 }
 0xd9a   :  { %v4321_v31 = vpop.eup %4320 }
 0xd9b   :  { %v2854_v39 = vmul.f32 %v4321_v31, %v5309_v19 }
 0xd9c   :  { %v4323_v35 = vpop.eup %4322 }
 0xd9d   :  { %v2855_v43 = vmul.f32 %v4323_v35, %v5312_v34  ;;  %v2869_v38 = vmul.f32 %v5364_v48, %v2854_v39 }
 0xd9e   :  { %v4325_v40 = vpop.eup %4324 }
 0xd9f   :  { %v2870_v37 = vmul.f32 %v5364_v48, %v2855_v43  ;;  %v2856_v45 = vmul.f32 %v4325_v40, %v5317_v14  ;;  %v2884_v41 = vadd.f32 %v3532_v47, %v2869_v38  ;;  %v4179_v14 = vld [vmem:[%s5459_s12 + $0x28] sm:$0xff]  }
 0xda0   :  { %v4327_v23 = vpop.eup %4326  ;;  %3770 = vmatpush3.bf16.msra.mxu0 %v4179_v14  ;;  %4100 = vmatpush3.bf16.msra.mxu1 %v4179_v14 }
 0xda1   :  { %v2885_v46 = vadd.f32 %v3532_v47, %v2870_v37  ;;  %v2857_v33 = vmul.f32 %v4327_v23, %v5322_v30  ;;  %v2871_v52 = vmul.f32 %v5364_v48, %v2856_v45  ;;  %v4180_v30 = vld [vmem:[%s5459_s12 + $0x70] sm:$0xff]  }
 0xda2   :  { %3771 = vmatprep.subr.bf16.mxu0 %v4180_v30  ;;  %4093 = vmatprep.subr.bf16.mxu1 %v4180_v30 }
 0xda3   :  { %v2890_v57 = vpack.c.bf16 %v2885_v46, %v2884_v41  ;;  %v2872_v19 = vmul.f32 %v5364_v48, %v2857_v33  ;;  %v2886_v60 = vadd.f32 %v3532_v47, %v2871_v52 }
 0xda4   :  { %3772 = vmatpush3.bf16.msra.mxu0 %v4181_v55  ;;  %4101 = vmatpush3.bf16.msra.mxu1 %v4181_v55 }
 0xda5   :  { %3053 = vmatmul.mubr.bf16.gmra.mrb[88].mxu1 %v2890_v57  ;;  %v2887_v34 = vadd.f32 %v3532_v47, %v2872_v19 }
 0xda6   :  { %3062 = vmatprep.mubr.bf16.mxu1 %v4381_v11  ;;  %v4182_v11 = vld [vmem:[%s5459_s12 + $0x78] sm:$0xff]  }
 0xda7   :  { %v2891_v63 = vpack.c.bf16 %v2887_v34, %v2886_v60  ;;  %3773 = vmatprep.subr.bf16.mxu0 %v4182_v11  ;;  %4094 = vmatprep.subr.bf16.mxu1 %v4182_v11 }
 0xda8   :  { %3774 = vmatpush3.bf16.msra.mxu0 %v4183_v2  ;;  %4102 = vmatpush3.bf16.msra.mxu1 %v4183_v2 }
 0xdad   :  { %3063 = vmatmul.mubr.bf16.gmra.mrb[92].mxu1 %v2891_v63 }
 0xe3f   :  { %v3034_v59 = vpop.f32.mrb[80].mxu1 }
 0xe40   :  { %v3035_v10 = vadd.f32 %v3034_v59, %v2913_v42  ;;  %v3036_v51 = vpop.f32.mrb[81].mxu1 }
 0xe41   :  { %v3037_v48 = vadd.f32 %v3036_v51, %v2917_v5  ;;  %v3038_v54 = vpop.f32.mrb[82].mxu1 }
 0xe42   :  { %v3039_v27 = vadd.f32 %v3038_v54, %v2913_v42  ;;  %v3040_v58 = vpop.f32.mrb[83].mxu1  ;;  %v3073_v44 = vmax.f32 %v3035_v10, 0.0 }
 0xe43   :  { %v3041_v62 = vadd.f32 %v3040_v58, %v2917_v5  ;;  %v3074_v1 = vmax.f32 %v3037_v48, 0.0 }
 0xe44   :  { %v3075_v47 = vmax.f32 %v3039_v27, 0.0 }
 0xe45   :  { %v3076_v12 = vmax.f32 %v3041_v62, 0.0 }
 0xe46   :  { %v3089_v13 = vpack.c.bf16 %v3075_v47, %v3073_v44 }
 0xe47   :  { %v3090_v4 = vpack.c.bf16 %v3076_v12, %v3074_v1  ;;  %v3044_v6 = vpop.f32.mrb[84].mxu1 }
 0xe48   :  { %v3045_v8 = vadd.f32 %v3044_v6, %v2913_v42  ;;  %v3046_v49 = vpop.f32.mrb[85].mxu1 }
 0xe49   :  { %v3047_v20 = vadd.f32 %v3046_v49, %v2917_v5  ;;  %v3048_v15 = vpop.f32.mrb[86].mxu1  ;;  %3264 = vmatprep.mubr.bf16.mxu0 %v3090_v4 }
 0xe4a   :  { %v3049_v16 = vadd.f32 %v3048_v15, %v2913_v42  ;;  %v3050_v17 = vpop.f32.mrb[87].mxu1  ;;  %3265 = vmatmul.mubr.bf16.vlgmr.msra.gmra.mrb[80].mxu0 %v3089_v13  ;;  %v3077_v61 = vmax.f32 %v3045_v8, 0.0 }
 0xe4b   :  { %v3051_v21 = vadd.f32 %v3050_v17, %v2917_v5  ;;  %v3078_v22 = vmax.f32 %v3047_v20, 0.0 }
 0xe4c   :  { %v3079_v7 = vmax.f32 %v3049_v16, 0.0 }
 0xe4d   :  { %v3080_v26 = vmax.f32 %v3051_v21, 0.0 }
 0xe4e   :  { %v3091_v25 = vpack.c.bf16 %v3079_v7, %v3077_v61 }
 0xe4f   :  { %v3092_v28 = vpack.c.bf16 %v3080_v26, %v3078_v22 }
 0xe51   :  { %3272 = vmatprep.mubr.bf16.mxu0 %v3092_v28 }
 0xe52   :  { %3273 = vmatmul.mubr.bf16.gmra.mrb[84].mxu0 %v3091_v25 }
 0xe78   :  { %v3054_v24 = vpop.f32.mrb[88].mxu1 }
 0xe79   :  { %v3055_v29 = vadd.f32 %v3054_v24, %v2913_v42  ;;  %v3056_v32 = vpop.f32.mrb[89].mxu1 }
 0xe7a   :  { %v3057_v0 = vadd.f32 %v3056_v32, %v2917_v5  ;;  %v3058_v18 = vpop.f32.mrb[90].mxu1 }
 0xe7b   :  { %v3059_v36 = vadd.f32 %v3058_v18, %v2913_v42  ;;  %v3060_v31 = vpop.f32.mrb[91].mxu1  ;;  %v3081_v35 = vmax.f32 %v3055_v29, 0.0 }
 0xe7c   :  { %v3061_v39 = vadd.f32 %v3060_v31, %v2917_v5  ;;  %v3082_v38 = vmax.f32 %v3057_v0, 0.0 }
 0xe7d   :  { %v3083_v43 = vmax.f32 %v3059_v36, 0.0 }
 0xe7e   :  { %v3084_v40 = vmax.f32 %v3061_v39, 0.0 }
 0xe7f   :  { %v3093_v37 = vpack.c.bf16 %v3083_v43, %v3081_v35 }
 0xe80   :  { %v3094_v45 = vpack.c.bf16 %v3084_v40, %v3082_v38  ;;  %v3064_v23 = vpop.f32.mrb[92].mxu1 }
 0xe81   :  { %v3065_v41 = vadd.f32 %v3064_v23, %v2913_v42  ;;  %v3066_v46 = vpop.f32.mrb[93].mxu1 }
 0xe82   :  { %v3067_v33 = vadd.f32 %v3066_v46, %v2917_v5  ;;  %v3068_v52 = vpop.f32.mrb[94].mxu1  ;;  %3280 = vmatprep.mubr.bf16.mxu1 %v3094_v45 }
 0xe83   :  { %v3069_v57 = vadd.f32 %v3068_v52, %v2913_v42  ;;  %v3070_v19 = vpop.f32.mrb[95].mxu1  ;;  %3281 = vmatmul.mubr.bf16.vlgmr.msra.gmra.mrb[96].mxu1 %v3093_v37  ;;  %v3085_v34 = vmax.f32 %v3065_v41, 0.0 }
 0xe84   :  { %v3071_v60 = vadd.f32 %v3070_v19, %v2917_v5  ;;  %v3086_v14 = vmax.f32 %v3067_v33, 0.0 }
 0xe85   :  { %v3087_v63 = vmax.f32 %v3069_v57, 0.0 }
 0xe86   :  { %v3088_v30 = vmax.f32 %v3071_v60, 0.0 }
 0xe87   :  { %v3095_v55 = vpack.c.bf16 %v3087_v63, %v3085_v34 }
 0xe88   :  { %v3096_v11 = vpack.c.bf16 %v3088_v30, %v3086_v14 }
 0xe8a   :  { %3288 = vmatprep.mubr.bf16.mxu1 %v3096_v11 }
 0xe8b   :  { %3289 = vmatmul.mubr.bf16.gmra.mrb[100].mxu1 %v3095_v55 }
 0xf1d   :  { %v3775_v2 = vpop.f32.mrb[80].mxu0 }
 0xf1e   :  { %v3776_v9 = vpop.f32.mrb[81].mxu0 }
 0xf1f   :  { %v3777_v50 = vadd.f32 %v3776_v9, %v3775_v2  ;;  %v3778_v53 = vpop.f32.mrb[82].mxu0 }
 0xf20   :  { %v3779_v56 = vpop.f32.mrb[83].mxu0 }
 0xf21   :  { %v3267_v42 = vadd.f32 %v3777_v50, %v3549_v3  ;;  %v3780_v59 = vadd.f32 %v3779_v56, %v3778_v53 }
 0xf23   :  { %v3270_v5 = vadd.f32 %v3780_v59, %v3549_v3  ;;  %3297 = vadd.xlane.f32.xlu0 %v3267_v42 }
 0xf25   :  { %v3781_v10 = vpop.f32.mrb[84].mxu0  ;;  %3299 = vadd.xlane.f32.xlu1 %v3270_v5 }
 0xf26   :  { %v3782_v51 = vpop.f32.mrb[85].mxu0 }
 0xf27   :  { %v3783_v48 = vadd.f32 %v3782_v51, %v3781_v10  ;;  %v3784_v54 = vpop.f32.mrb[86].mxu0 }
 0xf28   :  { %v3785_v27 = vpop.f32.mrb[87].mxu0 }
 0xf29   :  { %v3275_v58 = vadd.f32 %v3783_v48, %v3549_v3  ;;  %v3786_v62 = vadd.f32 %v3785_v27, %v3784_v54 }
 0xf2b   :  { %v3278_v44 = vadd.f32 %v3786_v62, %v3549_v3  ;;  %3301 = vadd.xlane.f32.xlu0 %v3275_v58 }
 0xf2d   :  { %3303 = vadd.xlane.f32.xlu1 %v3278_v44 }
 0xf56   :  { %v3787_v47 = vpop.f32.mrb[96].mxu1 }
 0xf57   :  { %v3788_v1 = vpop.f32.mrb[97].mxu1 }
 0xf58   :  { %v3789_v12 = vadd.f32 %v3788_v1, %v3787_v47  ;;  %v3790_v13 = vpop.f32.mrb[98].mxu1  ;;  %v3567_v47 = vld [vmem:[%s5464_s17] ss:$0 sm:$0xff] }
 0xf59   :  { %v3791_v4 = vpop.f32.mrb[99].mxu1 }
 0xf5a   :  { %v3283_v6 = vadd.f32 %v3789_v12, %v3549_v3  ;;  %v3792_v8 = vadd.f32 %v3791_v4, %v3790_v13 }
 0xf5c   :  { %v3286_v49 = vadd.f32 %v3792_v8, %v3549_v3  ;;  %3305 = vadd.xlane.f32.xlu0 %v3283_v6 }
 0xf5e   :  { %v3793_v20 = vpop.f32.mrb[100].mxu1  ;;  %3307 = vadd.xlane.f32.xlu1 %v3286_v49 }
 0xf5f   :  { %v3794_v15 = vpop.f32.mrb[101].mxu1 }
 0xf60   :  { %v3795_v16 = vadd.f32 %v3794_v15, %v3793_v20  ;;  %v3796_v17 = vpop.f32.mrb[102].mxu1 }
 0xf61   :  { %v3797_v21 = vpop.f32.mrb[103].mxu1 }
 0xf62   :  { %v3291_v61 = vadd.f32 %v3795_v16, %v3549_v3  ;;  %v3798_v7 = vadd.f32 %v3797_v21, %v3796_v17 }
 0xf64   :  { %v3294_v22 = vadd.f32 %v3798_v7, %v3549_v3  ;;  %3309 = vadd.xlane.f32.xlu0 %v3291_v61 }
 0xf66   :  { %3311 = vadd.xlane.f32.xlu1 %v3294_v22 }
 0xfb0   :  { %v3298_v26 = vpop.xlane.xlu0 %3297 }
 0xfb1   :  { %v3313_v25 = vmul.f32 0.0078125, %v3298_v26 }
 0xfb2   :  { %v3300_v28 = vpop.xlane.xlu1 %3299 }
 0xfb3   :  { %v3321_v24 = vsub.f32 %v3267_v42, %v3313_v25  ;;  %v3314_v29 = vmul.f32 0.0078125, %v3300_v28 }
 0xfb5   :  { %v3322_v32 = vsub.f32 %v3270_v5, %v3314_v29  ;;  %v3329_v0 = vmul.f32 %v3321_v24, %v3321_v24 }
 0xfb7   :  { %3337 = vadd.xlane.f32.xlu0 %v3329_v0  ;;  %v3330_v18 = vmul.f32 %v3322_v32, %v3322_v32 }
 0xfb8   :  { %v3302_v36 = vpop.xlane.xlu0 %3301 }
 0xfb9   :  { %v3315_v31 = vmul.f32 0.0078125, %v3302_v36  ;;  %3339 = vadd.xlane.f32.xlu1 %v3330_v18 }
 0xfba   :  { %v3304_v39 = vpop.xlane.xlu1 %3303 }
 0xfbb   :  { %v3323_v35 = vsub.f32 %v3275_v58, %v3315_v31  ;;  %v3316_v43 = vmul.f32 0.0078125, %v3304_v39  ;;  %v3566_v58 = vld [vmem:[%s5463_s16] ss:$0 sm:$0xff]  ;;  %s4382_s16 = smov [#allocation3]  }
 0xfbc   :  { %s3428_s17 = sshll.u32 %s4382_s16, 4  ;;  %s3429_s17 = int_to_ptr.vmem [resolvable:$true] %s3428_s17 }
 0xfbd   :  { %v3324_v38 = vsub.f32 %v3278_v44, %v3316_v43  ;;  %v3331_v40 = vmul.f32 %v3323_v35, %v3323_v35  ;;  %s4352_s8 = scalar_lea.vmem %s3429_s17, 1024  ;;  %p4357_p1 = scmp.lt.s32.totalorder %s3429_s17, %s3429_s17 }
 0xfbe   :  { %p4353_p0 = scmp.ne.s32.totalorder %s3429_s17, %s4352_s8  ;;  %p4358_p2 = scmp.lt.s32.totalorder %s4352_s8, %s4352_s8 }
 0xfbf   :  { %3341 = vadd.xlane.f32.xlu0 %v3331_v40  ;;  %v3332_v37 = vmul.f32 %v3324_v38, %v3324_v38 }
 0xfc0   :  { %p4359_p3 = por %p4358_p2, %p4357_p1 }
 0xfc1   :  { %3343 = vadd.xlane.f32.xlu1 %v3332_v37 }
 0xfc2   :  { %p4360_p4 = pnand %p4359_p3, %p4353_p0 }
 0xfe9   :  { %v3306_v45 = vpop.xlane.xlu0 %3305 }
 0xfea   :  { %v3317_v23 = vmul.f32 0.0078125, %v3306_v45 }
 0xfeb   :  { %v3308_v41 = vpop.xlane.xlu1 %3307 }
 0xfec   :  { %v5409_v46 = vsub.f32 %v3283_v6, %v3317_v23  ;;  %v3318_v33 = vmul.f32 0.0078125, %v3308_v41 }
 0xfee   :  { %v5411_v52 = vsub.f32 %v3286_v49, %v3318_v33  ;;  %v3333_v57 = vmul.f32 %v5409_v46, %v5409_v46 }
 0xff0   :  { %3345 = vadd.xlane.f32.xlu0 %v3333_v57  ;;  %v3334_v19 = vmul.f32 %v5411_v52, %v5411_v52 }
 0xff1   :  { %v3310_v60 = vpop.xlane.xlu0 %3309 }
 0xff2   :  { %v3319_v34 = vmul.f32 0.0078125, %v3310_v60  ;;  %3347 = vadd.xlane.f32.xlu1 %v3334_v19 }
 0xff3   :  { %v3312_v63 = vpop.xlane.xlu1 %3311 }
 0xff4   :  { %v5417_v14 = vsub.f32 %v3291_v61, %v3319_v34  ;;  %v3320_v30 = vmul.f32 0.0078125, %v3312_v63 }
 0xff6   :  { %v5419_v55 = vsub.f32 %v3294_v22, %v3320_v30  ;;  %v3335_v11 = vmul.f32 %v5417_v14, %v5417_v14 }
 0xff8   :  { %3349 = vadd.xlane.f32.xlu0 %v3335_v11  ;;  %v3336_v2 = vmul.f32 %v5419_v55, %v5419_v55 }
 0xffa   :  { %3351 = vadd.xlane.f32.xlu1 %v3336_v2 }
0x1044   :  { %v3338_v3 = vpop.xlane.xlu0 %3337 }
0x1045   :  { %v3353_v9 = vmul.f32 0.0078125, %v3338_v3 }
0x1046   :  { %v3340_v50 = vpop.xlane.xlu1 %3339 }
0x1047   :  { %v3361_v53 = vadd.f32 1e-05, %v3353_v9  ;;  %v3354_v56 = vmul.f32 0.0078125, %v3340_v50 }
0x1049   :  { %4328 = vrsqrt.f32 %v3361_v53  ;;  %v3362_v42 = vadd.f32 1e-05, %v3354_v56 }
0x104b   :  { %4330 = vrsqrt.f32 %v3362_v42 }
0x104c   :  { %v3342_v59 = vpop.xlane.xlu0 %3341 }
0x104d   :  { %v3355_v5 = vmul.f32 0.0078125, %v3342_v59 }
0x104e   :  { %v3344_v10 = vpop.xlane.xlu1 %3343 }
0x104f   :  { %v3363_v51 = vadd.f32 1e-05, %v3355_v5  ;;  %v3356_v48 = vmul.f32 0.0078125, %v3344_v10 }
0x1051   :  { %4332 = vrsqrt.f32 %v3363_v51  ;;  %v3364_v54 = vadd.f32 1e-05, %v3356_v48 }
0x1053   :  { %v4329_v27 = vpop.eup %4328  ;;  %4334 = vrsqrt.f32 %v3364_v54 }
0x1054   :  { %v3377_v62 = vmul.f32 %v4329_v27, %v3321_v24 }
0x1055   :  { %v4331_v44 = vpop.eup %4330 }
0x1056   :  { %v3392_v1 = vmul.f32 %v3566_v58, %v3377_v62  ;;  %v3378_v12 = vmul.f32 %v4331_v44, %v3322_v32 }
0x1058   :  { %v3407_v13 = vadd.f32 %v3567_v47, %v3392_v1  ;;  %v3393_v4 = vmul.f32 %v3566_v58, %v3378_v12 }
0x105a   :  { %3415 = vst [vmem:[#allocation3] sm:$0xff] %v3407_v13  ;;  %v3408_v6 = vadd.f32 %v3567_v47, %v3393_v4 }
0x105b   :  { %v4333_v8 = vpop.eup %4332 }
0x105c   :  { %3416 = vst [vmem:[#allocation3 + $0x8] sm:$0xff] %v3408_v6  ;;  %v3379_v49 = vmul.f32 %v4333_v8, %v3323_v35 }
0x105d   :  { %v4335_v20 = vpop.eup %4334 }
0x105e   :  { %v3394_v15 = vmul.f32 %v3566_v58, %v3379_v49  ;;  %v3380_v16 = vmul.f32 %v4335_v20, %v3324_v38 }
0x1060   :  { %v3409_v17 = vadd.f32 %v3567_v47, %v3394_v15  ;;  %v3395_v21 = vmul.f32 %v3566_v58, %v3380_v16 }
0x1062   :  { %3417 = vst [vmem:[#allocation3 + $0x10] sm:$0xff] %v3409_v17  ;;  %v3410_v61 = vadd.f32 %v3567_v47, %v3395_v21 }
0x1064   :  { %3418 = vst [vmem:[#allocation3 + $0x18] sm:$0xff] %v3410_v61 }
0x107d   :  { %v3346_v7 = vpop.xlane.xlu0 %3345 }
0x107e   :  { %v3357_v22 = vmul.f32 0.0078125, %v3346_v7 }
0x107f   :  { %v3348_v26 = vpop.xlane.xlu1 %3347 }
0x1080   :  { %v3365_v25 = vadd.f32 1e-05, %v3357_v22  ;;  %v3358_v28 = vmul.f32 0.0078125, %v3348_v26 }
0x1082   :  { %4336 = vrsqrt.f32 %v3365_v25  ;;  %v3366_v24 = vadd.f32 1e-05, %v3358_v28 }
0x1084   :  { %4338 = vrsqrt.f32 %v3366_v24 }
0x1085   :  { %v3350_v29 = vpop.xlane.xlu0 %3349 }
0x1086   :  { %v3359_v32 = vmul.f32 0.0078125, %v3350_v29 }
0x1087   :  { %v3352_v0 = vpop.xlane.xlu1 %3351 }
0x1088   :  { %v3367_v18 = vadd.f32 1e-05, %v3359_v32  ;;  %v3360_v36 = vmul.f32 0.0078125, %v3352_v0 }
0x108a   :  { %4340 = vrsqrt.f32 %v3367_v18  ;;  %v3368_v31 = vadd.f32 1e-05, %v3360_v36 }
0x108c   :  { %v4337_v39 = vpop.eup %4336  ;;  %4342 = vrsqrt.f32 %v3368_v31 }
0x108d   :  { %v3381_v35 = vmul.f32 %v4337_v39, %v5409_v46 }
0x108e   :  { %v4339_v43 = vpop.eup %4338 }
0x108f   :  { %v3396_v38 = vmul.f32 %v3566_v58, %v3381_v35  ;;  %v3382_v40 = vmul.f32 %v4339_v43, %v5411_v52 }
0x1091   :  { %v3411_v37 = vadd.f32 %v3567_v47, %v3396_v38  ;;  %v3397_v45 = vmul.f32 %v3566_v58, %v3382_v40 }
0x1093   :  { %3419 = vst [vmem:[#allocation3 + $0x20] sm:$0xff] %v3411_v37  ;;  %v3412_v23 = vadd.f32 %v3567_v47, %v3397_v45 }
0x1094   :  { %v4341_v41 = vpop.eup %4340 }
0x1095   :  { %3420 = vst [vmem:[#allocation3 + $0x28] sm:$0xff] %v3412_v23  ;;  %v3383_v33 = vmul.f32 %v4341_v41, %v5417_v14 }
0x1096   :  { %v4343_v57 = vpop.eup %4342 }
0x1097   :  { %v3398_v19 = vmul.f32 %v3566_v58, %v3383_v33  ;;  %v3384_v60 = vmul.f32 %v4343_v57, %v5419_v55 }
0x1099   :  { %v3413_v34 = vadd.f32 %v3567_v47, %v3398_v19  ;;  %v3399_v46 = vmul.f32 %v3566_v58, %v3384_v60 }
0x109b   :  { %3421 = vst [vmem:[#allocation3 + $0x30] sm:$0xff] %v3413_v34  ;;  %v3414_v63 = vadd.f32 %v3567_v47, %v3399_v46 }
0x109d   :  { %3422 = vst [vmem:[#allocation3 + $0x38] sm:$0xff] %v3414_v63 }
0x109e   :  { %4363 = shalt.err (!%p4360_p4)
}
0x109f   :  { %s4364_s22 = scalar_lea.hbm %s5465_s18, 1024 }
0x10a0   :  { %p4365_p5 = scmp.ne.s32.totalorder %s5465_s18, %s4364_s22  ;;  %p4368_p6 = scmp.lt.u32.totalorder %s4364_s22, %s5465_s18 }
0x10a2   :  { %p4370_p7 = pnand %p4368_p6, %p4365_p5 }
0x10a4   :  { %4373 = shalt.err (!%p4370_p7)
}
0x10a5   :  { %s4383_s25 = smov 128   ;;  %s4384_s9 = smov 8  }
0x10a6   :  { %3434 = dma.vmem_to_hbm [thread:$0]  %s3429_s17, 1024, %s5465_s18, [#allocation4], %s4383_s25, %s4383_s25, %s4384_s9  }
0x10a7   :  { %4374 = dma.done.wait [#allocation4], 1024  }
0x10a8   :  { %4375 = vsyncadd [#allocation4], 4294966272 }
0x10a9   :  { %3438 = vsyncpa [#allocation4], 1 }

</bundles_post_ra>
